<compile_context>
chip_gen: v5e
topology: v5e:2x2
jax: 0.10.0
libtpu: 0.0.40
codegen_flags: <defaults>
</compile_context>

<pallas_src>
import functools

import jax
import jax.numpy as jnp
from jax.experimental import pallas as pl
from jax.experimental.pallas import tpu as pltpu


# Lane-dense model widths (feature dim lives on the 128-wide lane axis).
HIDDEN = 128
OUT_EMB = 128
OUT_PAD = 128          # padded output width; real out_channels sliced after the kernel
NUM_RADIAL = 8
CUTOFF = 5.0
ENVELOPE_P = 5         # static integer envelope exponent
MAX_EDGE_ROWS = 2048   # per-tile edge-row budget (tm = S_TILE * N_pad)


def _round_up(x, m):
    return (x + m - 1) // m * m


def _pick_src_tile(n_pad, max_rows):
    """Largest divisor of n_pad that is a multiple of 8 (sublane-aligned BlockSpec)
    and keeps tm = d * n_pad within the row budget.  Falls back to 8."""
    best = 8
    for d in range(8, n_pad + 1, 8):
        if n_pad % d == 0 and d * n_pad <= max_rows:
            best = d
    return best


def _silu(x):
    return x * jax.nn.sigmoid(x)


def _bessel_rbf(dist, freqs, mask, *, cutoff, p):
    """Bessel radial basis with DimeNet polynomial envelope, VMEM-resident.

    dist: [TM,1] f32, freqs: [1,R] f32, mask: [TM,1] f32  ->  [TM,R] f32 (masked).
    Integer-power envelope (VPU multiplies) + approx reciprocal (EUP vrcp).
    """
    x = dist * (1.0 / cutoff)
    inv_x = pl.reciprocal(x, approx=True)
    a = -(p + 1.0) * (p + 2.0) / 2.0
    b = p * (p + 2.0)
    c = -p * (p + 1.0) / 2.0
    x_pm1 = x ** (p - 1)          # static int exponent -> repeated multiplies
    x_p = x_pm1 * x
    x_pp1 = x_p * x
    env = inv_x + a * x_pm1 + b * x_p + c * x_pp1
    env = jnp.where(x < 1.0, env, 0.0)
    return (env * jnp.sin(freqs * x)) * mask


# ----------------------------------------------------------------------------
# Single fused kernel: edge embedding + all interaction blocks + dst aggregation
# + output MLP.  Grid iterates src-atom tiles; node accumulator lives in VMEM.
# ----------------------------------------------------------------------------
def _fused_kernel(src_proj_ref, dst_proj_ref, dist_ref, mask_ref, freq_ref,
                  w_fold_ref, b_fold_ref,
                  w1_ref, b1_ref, wr_ref, br_ref, w2_ref, b2_ref,
                  wo1_ref, bo1_ref, wo2_ref, bo2_ref,
                  out_ref, node_acc_ref,
                  *, cutoff, p, num_blocks, s_tile, n_pad):
    t = pl.program_id(0)
    h_dim = src_proj_ref.shape[-1]
    tm = s_tile * n_pad

    mask = mask_ref[...]                                               # [tm, 1]
    rbf = _bessel_rbf(dist_ref[...], freq_ref[...], mask,
                      cutoff=cutoff, p=p)                              # [tm, R]
    rbf_b = rbf.astype(jnp.bfloat16)

    # Structured all-pairs edge layout: edge row = i * n_pad + j (i = src, j = dst).
    # Broadcast the per-node projections to edge rows in VMEM (no gather, no HBM [E,H]).
    src_block = src_proj_ref[...]                                      # [s_tile, H] f32
    dst_full = dst_proj_ref[...]                                       # [n_pad,  H] f32
    src_part = jnp.broadcast_to(src_block[:, None, :],
                                (s_tile, n_pad, h_dim)).reshape(tm, h_dim)
    dst_part = jnp.broadcast_to(dst_full[None, :, :],
                                (s_tile, n_pad, h_dim)).reshape(tm, h_dim)

    # Edge embedding: concat([h_src, h_dst, rbf_h]) @ W_edge with the node terms
    # pre-projected per node and the rbf linear folded into W_fold.
    acc = src_part + dst_part + b_fold_ref[...]
    acc = acc + jnp.dot(rbf_b, w_fold_ref[...], preferred_element_type=jnp.float32)
    x_e = _silu(acc) * mask                                            # [tm, H] f32

    # Interaction blocks: x_e stays resident in f32 (bf16 only as MXU operands).
    for blk in range(num_blocks):
        h = _silu(jnp.dot(x_e.astype(jnp.bfloat16), w1_ref[blk],
                          preferred_element_type=jnp.float32) + b1_ref[blk])
        gate = jnp.dot(rbf_b, wr_ref[blk],
                       preferred_element_type=jnp.float32) + br_ref[blk]
        h = h * gate
        h = _silu(jnp.dot(h.astype(jnp.bfloat16), w2_ref[blk],
                          preferred_element_type=jnp.float32) + b2_ref[blk])
        x_e = (x_e + h) * mask

    # Edge -> node (dst) aggregation for this src tile: sum over the src axis.
    node_partial = x_e.reshape(s_tile, n_pad, h_dim).sum(axis=0)       # [n_pad, H] f32

    @pl.when(t == 0)
    def _():
        node_acc_ref[...] = node_partial

    @pl.when(t > 0)
    def _():
        node_acc_ref[...] += node_partial

    # Finalize: per-node output MLP, lane-dense padded store (written once).
    @pl.when(t == pl.num_programs(0) - 1)
    def _():
        node = node_acc_ref[...].astype(jnp.bfloat16)
        h1 = _silu(jnp.dot(node, wo1_ref[...],
                           preferred_element_type=jnp.float32) + bo1_ref[...])
        y = (jnp.dot(h1.astype(jnp.bfloat16), wo2_ref[...],
                     preferred_element_type=jnp.float32) + bo2_ref[...])
        out_ref[...] = y.astype(out_ref.dtype)


def fused_dimenet_forward(src_proj, dst_proj, dist, mask, freqs, w_fold, b_fold,
                          w1s, b1s, wrs, brs, w2s, b2s, wo1, bo1, wo2, bo2,
                          *, s_tile, n_pad, cutoff, p, num_blocks):
    H = src_proj.shape[1]
    R = freqs.shape[1]
    OE = wo1.shape[1]
    OP = wo2.shape[1]
    tm = s_tile * n_pad
    grid = (n_pad // s_tile,)

    row = lambda t: (t, 0)
    const2 = lambda t: (0, 0)
    const3 = lambda t: (0, 0, 0)

    return pl.pallas_call(
        functools.partial(_fused_kernel, cutoff=cutoff, p=p, num_blocks=num_blocks,
                          s_tile=s_tile, n_pad=n_pad),
        out_shape=jax.ShapeDtypeStruct((n_pad, OP), jnp.float32),
        grid=grid,
        in_specs=[
            pl.BlockSpec((s_tile, H), row),            # src_proj (this tile's src rows)
            pl.BlockSpec((n_pad, H), const2),          # dst_proj (all nodes, resident)
            pl.BlockSpec((tm, 1), row),                # dist
            pl.BlockSpec((tm, 1), row),                # mask
            pl.BlockSpec((1, R), const2),              # freqs
            pl.BlockSpec((R, H), const2),              # w_fold
            pl.BlockSpec((1, H), const2),              # b_fold
            pl.BlockSpec((num_blocks, H, H), const3),  # w1 stacked
            pl.BlockSpec((num_blocks, 1, H), const3),  # b1 stacked
            pl.BlockSpec((num_blocks, R, H), const3),  # w_rbf stacked
            pl.BlockSpec((num_blocks, 1, H), const3),  # b_rbf stacked
            pl.BlockSpec((num_blocks, H, H), const3),  # w2 stacked
            pl.BlockSpec((num_blocks, 1, H), const3),  # b2 stacked
            pl.BlockSpec((H, OE), const2),             # out w1
            pl.BlockSpec((1, OE), const2),             # out b1
            pl.BlockSpec((OE, OP), const2),            # out w2
            pl.BlockSpec((1, OP), const2),             # out b2
        ],
        out_specs=pl.BlockSpec((n_pad, OP), const2),   # resident accumulator-style output
        scratch_shapes=[pltpu.VMEM((n_pad, H), jnp.float32)],
        compiler_params=pltpu.CompilerParams(
            dimension_semantics=("arbitrary",),        # node accumulator across src tiles
            vmem_limit_bytes=32 * 1024 * 1024),
    )(src_proj, dst_proj, dist, mask, freqs, w_fold, b_fold,
      w1s, b1s, wrs, brs, w2s, b2s, wo1, bo1, wo2, bo2)


# ----------------------------------------------------------------------------
# Parameters (deterministic, synthetic; weights bf16, biases f32)
# ----------------------------------------------------------------------------
def init_params(key, *, num_atom_types, hidden, num_radial, num_blocks, out_emb, out_pad):
    keys = iter(jax.random.split(key, 64))

    def w(shape, fan_in):
        return (jax.random.normal(next(keys), shape, jnp.float32)
                / jnp.sqrt(jnp.float32(fan_in))).astype(jnp.bfloat16)

    def b(n):
        return jax.random.normal(next(keys), (1, n), jnp.float32) * 0.01

    params = {
        "atom_emb": (jax.random.normal(next(keys), (num_atom_types, hidden), jnp.float32)
                     * 0.1).astype(jnp.bfloat16),
        "embed": {
            "w_rbf": w((num_radial, hidden), num_radial),
            "b_rbf": b(hidden),
            "w_src": w((hidden, hidden), hidden),
            "w_dst": w((hidden, hidden), hidden),
            "w_erbf": w((hidden, hidden), hidden),
            "b_e": b(hidden),
        },
        "blocks": [],
        "out": {
            "w1": w((hidden, out_emb), hidden),
            "b1": b(out_emb),
            "w2": w((out_emb, out_pad), out_emb),
            "b2": b(out_pad),
        },
    }
    for _ in range(num_blocks):
        params["blocks"].append({
            "w1": w((hidden, hidden), hidden),
            "b1": b(hidden),
            "w_rbf": w((num_radial, hidden), num_radial),
            "b_rbf": b(hidden),
            "w2": w((hidden, hidden), hidden),
            "b2": b(hidden),
        })
    return params


# ----------------------------------------------------------------------------
# Forward pass (MoleculeModel -> simplified DimeNet++)
# ----------------------------------------------------------------------------
def molecule_model_forward(params, z, pos, batch, *, num_graphs, out_channels,
                           cutoff=CUTOFF, envelope_exponent=ENVELOPE_P,
                           num_radial=NUM_RADIAL):
    N = z.shape[0]
    n_pad = _round_up(max(N, 8), 8)
    s_tile = _pick_src_tile(n_pad, MAX_EDGE_ROWS)

    # Per-node preprocessing (O(N*H), tiny): atom embedding gather + node projections.
    node_emb = jnp.pad(params["atom_emb"][z], ((0, n_pad - N), (0, 0)))        # [N_pad,H]
    src_proj = jnp.dot(node_emb, params["embed"]["w_src"],
                       preferred_element_type=jnp.float32)                     # [N_pad,H]
    dst_proj = jnp.dot(node_emb, params["embed"]["w_dst"],
                       preferred_element_type=jnp.float32)

    # Structured all-pairs edge geometry (e = i*n_pad + j); invalid edges masked.
    pos_p = jnp.pad(pos, ((0, n_pad - N), (0, 0)))
    batch_p = jnp.pad(batch.astype(jnp.int32), (0, n_pad - N), constant_values=-1)
    diff = pos_p[:, None, :] - pos_p[None, :, :]
    dist = jnp.sqrt(jnp.sum(diff * diff, axis=-1) + 1e-12)                     # [N_pad,N_pad]
    valid = ((batch_p[:, None] == batch_p[None, :])
             & (batch_p[:, None] >= 0)
             & (~jnp.eye(n_pad, dtype=bool))
             & (dist < cutoff))
    mask = valid.astype(jnp.float32).reshape(-1, 1)                            # [E_pad,1]
    dist_safe = jnp.where(valid, dist, cutoff).reshape(-1, 1)

    freqs = (jnp.arange(1, num_radial + 1, dtype=jnp.float32) * jnp.pi)[None, :]

    # Fold the rbf->hidden linear into the edge embedding (no nonlinearity between).
    emb = params["embed"]
    w_fold = jnp.dot(emb["w_rbf"].astype(jnp.float32),
                     emb["w_erbf"].astype(jnp.float32)).astype(jnp.bfloat16)   # [R,H]
    b_fold = jnp.dot(emb["b_rbf"], emb["w_erbf"].astype(jnp.float32)) + emb["b_e"]

    # Stack per-block weights for the in-kernel block loop.
    blocks = params["blocks"]
    w1s = jnp.stack([b["w1"] for b in blocks])
    b1s = jnp.stack([b["b1"] for b in blocks])
    wrs = jnp.stack([b["w_rbf"] for b in blocks])
    brs = jnp.stack([b["b_rbf"] for b in blocks])
    w2s = jnp.stack([b["w2"] for b in blocks])
    b2s = jnp.stack([b["b2"] for b in blocks])

    node_out = fused_dimenet_forward(
        src_proj, dst_proj, dist_safe, mask, freqs, w_fold, b_fold,
        w1s, b1s, wrs, brs, w2s, b2s,
        params["out"]["w1"], params["out"]["b1"],
        params["out"]["w2"], params["out"]["b2"],
        s_tile=s_tile, n_pad=n_pad, cutoff=cutoff, p=envelope_exponent,
        num_blocks=len(blocks))

    # Per-graph sum pooling: slice to real atoms / channels first, then a dense
    # one-hot matmul (no XLA scatter anywhere in the pipeline).
    node_out = node_out[:N, :out_channels]
    pool = (batch[None, :] == jnp.arange(num_graphs)[:, None]).astype(jnp.float32)
    return jnp.dot(pool, node_out)


# ----------------------------------------------------------------------------
# Main
# ----------------------------------------------------------------------------
if __name__ == "__main__":
    key = jax.random.PRNGKey(0)

    num_atom_types = 10
    num_blocks = 2
    out_channels = 4

    k_z, k_pos, k_params = jax.random.split(key, 3)
    N = 8
    z = jax.random.randint(k_z, (N,), 1, num_atom_types)            # atomic numbers
    pos = jax.random.normal(k_pos, (N, 3), jnp.float32) * 1.5       # 3D coordinates
    batch = jnp.array([0, 0, 0, 0, 1, 1, 1, 1], dtype=jnp.int32)    # 2 graphs x 4 atoms
    num_graphs = 2

    params = init_params(k_params, num_atom_types=num_atom_types, hidden=HIDDEN,
                         num_radial=NUM_RADIAL, num_blocks=num_blocks,
                         out_emb=OUT_EMB, out_pad=OUT_PAD)

    fwd = jax.jit(functools.partial(molecule_model_forward,
                                    num_graphs=num_graphs,
                                    out_channels=out_channels))
    out = fwd(params, z, pos, batch)
    jax.block_until_ready(out)
    assert out.shape == (num_graphs, out_channels)
    assert bool(jnp.all(jnp.isfinite(out)))
    print("KERNEL_OK")
</pallas_src>

<mosaic_0001>
module attributes {stable_mosaic.version = 11 : i64} {
  func.func @_fused_kernel(%arg0: i32, %arg1: memref<8x128xf32, #tpu.memory_space<vmem>>, %arg2: memref<8x128xf32, #tpu.memory_space<vmem>>, %arg3: memref<64x1xf32, #tpu.memory_space<vmem>>, %arg4: memref<64x1xf32, #tpu.memory_space<vmem>>, %arg5: memref<1x8xf32, #tpu.memory_space<vmem>>, %arg6: memref<8x128xbf16, #tpu.memory_space<vmem>>, %arg7: memref<1x128xf32, #tpu.memory_space<vmem>>, %arg8: memref<2x128x128xbf16, #tpu.memory_space<vmem>>, %arg9: memref<2x1x128xf32, #tpu.memory_space<vmem>>, %arg10: memref<2x8x128xbf16, #tpu.memory_space<vmem>>, %arg11: memref<2x1x128xf32, #tpu.memory_space<vmem>>, %arg12: memref<2x128x128xbf16, #tpu.memory_space<vmem>>, %arg13: memref<2x1x128xf32, #tpu.memory_space<vmem>>, %arg14: memref<128x128xbf16, #tpu.memory_space<vmem>>, %arg15: memref<1x128xf32, #tpu.memory_space<vmem>>, %arg16: memref<128x128xbf16, #tpu.memory_space<vmem>>, %arg17: memref<1x128xf32, #tpu.memory_space<vmem>>, %arg18: memref<8x128xf32, #tpu.memory_space<vmem>>, %arg19: memref<8x128xf32, #tpu.memory_space<vmem>>) attributes {dimension_semantics = [#tpu.dimension_semantics<arbitrary>], iteration_bounds = array<i64: 1>, scalar_prefetch = 0 : i64, scratch_operands = 1 : i64, tpu.core_type = #tpu.core_type<tc>, window_params = [{transform_indices = @transform_0, window_bounds = array<i64: 8, 128>}, {pipeline_mode = #tpu.pipeline_mode<synchronous>, transform_indices = @transform_1, window_bounds = array<i64: 8, 128>}, {transform_indices = @transform_2, window_bounds = array<i64: 64, 1>}, {transform_indices = @transform_3, window_bounds = array<i64: 64, 1>}, {pipeline_mode = #tpu.pipeline_mode<synchronous>, transform_indices = @transform_4, window_bounds = array<i64: 1, 8>}, {pipeline_mode = #tpu.pipeline_mode<synchronous>, transform_indices = @transform_5, window_bounds = array<i64: 8, 128>}, {pipeline_mode = #tpu.pipeline_mode<synchronous>, transform_indices = @transform_6, window_bounds = array<i64: 1, 128>}, {pipeline_mode = #tpu.pipeline_mode<synchronous>, transform_indices = @transform_7, window_bounds = array<i64: 2, 128, 128>}, {pipeline_mode = #tpu.pipeline_mode<synchronous>, transform_indices = @transform_8, window_bounds = array<i64: 2, 1, 128>}, {pipeline_mode = #tpu.pipeline_mode<synchronous>, transform_indices = @transform_9, window_bounds = array<i64: 2, 8, 128>}, {pipeline_mode = #tpu.pipeline_mode<synchronous>, transform_indices = @transform_10, window_bounds = array<i64: 2, 1, 128>}, {pipeline_mode = #tpu.pipeline_mode<synchronous>, transform_indices = @transform_11, window_bounds = array<i64: 2, 128, 128>}, {pipeline_mode = #tpu.pipeline_mode<synchronous>, transform_indices = @transform_12, window_bounds = array<i64: 2, 1, 128>}, {pipeline_mode = #tpu.pipeline_mode<synchronous>, transform_indices = @transform_13, window_bounds = array<i64: 128, 128>}, {pipeline_mode = #tpu.pipeline_mode<synchronous>, transform_indices = @transform_14, window_bounds = array<i64: 1, 128>}, {pipeline_mode = #tpu.pipeline_mode<synchronous>, transform_indices = @transform_15, window_bounds = array<i64: 128, 128>}, {pipeline_mode = #tpu.pipeline_mode<synchronous>, transform_indices = @transform_16, window_bounds = array<i64: 1, 128>}, {pipeline_mode = #tpu.pipeline_mode<synchronous>, transform_indices = @transform_17, window_bounds = array<i64: 8, 128>}]} {
    %c0 = arith.constant 0 : index
    %c0_0 = arith.constant 0 : index
    %0 = vector.load %arg4[%c0, %c0_0] : memref<64x1xf32, #tpu.memory_space<vmem>>, vector<64x1xf32>
    %c0_1 = arith.constant 0 : index
    %c0_2 = arith.constant 0 : index
    %1 = vector.load %arg3[%c0_1, %c0_2] : memref<64x1xf32, #tpu.memory_space<vmem>>, vector<64x1xf32>
    %c0_3 = arith.constant 0 : index
    %c0_4 = arith.constant 0 : index
    %2 = vector.load %arg5[%c0_3, %c0_4] : memref<1x8xf32, #tpu.memory_space<vmem>>, vector<1x8xf32>
    %cst = arith.constant 2.000000e-01 : f32
    %3 = vector.broadcast %cst : f32 to vector<64x1xf32>
    %4 = arith.mulf %1, %3 : vector<64x1xf32>
    %5 = tpu.reciprocal %4 {approx = true} : vector<64x1xf32> -> vector<64x1xf32>
    %6 = arith.mulf %4, %4 : vector<64x1xf32>
    %7 = arith.mulf %6, %6 : vector<64x1xf32>
    %8 = arith.mulf %7, %4 : vector<64x1xf32>
    %9 = arith.mulf %8, %4 : vector<64x1xf32>
    %cst_5 = arith.constant -2.100000e+01 : f32
    %10 = vector.broadcast %cst_5 : f32 to vector<64x1xf32>
    %11 = arith.mulf %10, %7 : vector<64x1xf32>
    %12 = arith.addf %5, %11 : vector<64x1xf32>
    %cst_6 = arith.constant 3.500000e+01 : f32
    %13 = vector.broadcast %cst_6 : f32 to vector<64x1xf32>
    %14 = arith.mulf %13, %8 : vector<64x1xf32>
    %15 = arith.addf %12, %14 : vector<64x1xf32>
    %cst_7 = arith.constant -1.500000e+01 : f32
    %16 = vector.broadcast %cst_7 : f32 to vector<64x1xf32>
    %17 = arith.mulf %16, %9 : vector<64x1xf32>
    %18 = arith.addf %15, %17 : vector<64x1xf32>
    %cst_8 = arith.constant 1.000000e+00 : f32
    %19 = vector.broadcast %cst_8 : f32 to vector<64x1xf32>
    %20 = arith.cmpf olt, %4, %19 : vector<64x1xf32>
    %cst_9 = arith.constant 0.000000e+00 : f32
    %21 = vector.broadcast %cst_9 : f32 to vector<64x1xf32>
    %22 = arith.select %20, %18, %21 : vector<64x1xi1>, vector<64x1xf32>
    %23 = vector.broadcast %2 : vector<1x8xf32> to vector<64x8xf32>
    %24 = vector.broadcast %4 : vector<64x1xf32> to vector<64x8xf32>
    %25 = arith.mulf %23, %24 : vector<64x8xf32>
    %26 = math.sin %25 : vector<64x8xf32>
    %27 = vector.broadcast %22 : vector<64x1xf32> to vector<64x8xf32>
    %28 = arith.mulf %27, %26 : vector<64x8xf32>
    %29 = vector.broadcast %0 : vector<64x1xf32> to vector<64x8xf32>
    %30 = arith.mulf %28, %29 : vector<64x8xf32>
    %31 = arith.truncf %30 : vector<64x8xf32> to vector<64x8xbf16>
    %c0_10 = arith.constant 0 : index
    %c0_11 = arith.constant 0 : index
    %32 = vector.load %arg1[%c0_10, %c0_11] : memref<8x128xf32, #tpu.memory_space<vmem>>, vector<8x128xf32>
    %c0_12 = arith.constant 0 : index
    %c0_13 = arith.constant 0 : index
    %33 = vector.load %arg2[%c0_12, %c0_13] : memref<8x128xf32, #tpu.memory_space<vmem>>, vector<8x128xf32>
    %34 = vector.shape_cast %32 : vector<8x128xf32> to vector<8x1x128xf32>
    %35 = vector.shape_cast %34 : vector<8x1x128xf32> to vector<8x1x128xf32>
    %36 = vector.broadcast %35 : vector<8x1x128xf32> to vector<8x8x128xf32>
    %37 = vector.shape_cast %36 : vector<8x8x128xf32> to vector<64x128xf32>
    %38 = vector.shape_cast %33 : vector<8x128xf32> to vector<1x8x128xf32>
    %39 = vector.shape_cast %38 : vector<1x8x128xf32> to vector<1x8x128xf32>
    %40 = vector.broadcast %39 : vector<1x8x128xf32> to vector<8x8x128xf32>
    %41 = vector.shape_cast %40 : vector<8x8x128xf32> to vector<64x128xf32>
    %42 = arith.addf %37, %41 : vector<64x128xf32>
    %c0_14 = arith.constant 0 : index
    %c0_15 = arith.constant 0 : index
    %43 = vector.load %arg7[%c0_14, %c0_15] : memref<1x128xf32, #tpu.memory_space<vmem>>, vector<1x128xf32>
    %44 = vector.broadcast %43 : vector<1x128xf32> to vector<64x128xf32>
    %45 = arith.addf %42, %44 : vector<64x128xf32>
    %c0_16 = arith.constant 0 : index
    %c0_17 = arith.constant 0 : index
    %46 = vector.load %arg6[%c0_16, %c0_17] : memref<8x128xbf16, #tpu.memory_space<vmem>>, vector<8x128xbf16>
    %cst_18 = arith.constant dense<0.000000e+00> : vector<64x128xf32>
    %47 = tpu.matmul %31, %46, %cst_18 {dimension_numbers = #tpu.dot_dimension_numbers<[1], [0], [0], [1], [0, 0, 1, 1], [], []>} : vector<64x8xbf16>, vector<8x128xbf16>, vector<64x128xf32> -> vector<64x128xf32>
    %48 = arith.addf %45, %47 : vector<64x128xf32>
    %49 = arith.negf %48 : vector<64x128xf32>
    %50 = math.exp %49 : vector<64x128xf32>
    %cst_19 = arith.constant 1.000000e+00 : f32
    %51 = vector.broadcast %cst_19 : f32 to vector<64x128xf32>
    %52 = arith.addf %51, %50 : vector<64x128xf32>
    %53 = arith.divf %51, %52 : vector<64x128xf32>
    %54 = arith.mulf %48, %53 : vector<64x128xf32>
    %55 = vector.broadcast %0 : vector<64x1xf32> to vector<64x128xf32>
    %56 = arith.mulf %54, %55 : vector<64x128xf32>
    %57 = arith.truncf %56 : vector<64x128xf32> to vector<64x128xbf16>
    %c0_20 = arith.constant 0 : index
    %c0_21 = arith.constant 0 : index
    %c0_22 = arith.constant 0 : index
    %58 = vector.load %arg8[%c0_20, %c0_21, %c0_22] : memref<2x128x128xbf16, #tpu.memory_space<vmem>>, vector<1x128x128xbf16>
    %59 = vector.shape_cast %58 : vector<1x128x128xbf16> to vector<128x128xbf16>
    %cst_23 = arith.constant dense<0.000000e+00> : vector<64x128xf32>
    %60 = tpu.matmul %57, %59, %cst_23 {dimension_numbers = #tpu.dot_dimension_numbers<[1], [0], [0], [1], [0, 0, 1, 1], [], []>} : vector<64x128xbf16>, vector<128x128xbf16>, vector<64x128xf32> -> vector<64x128xf32>
    %c0_24 = arith.constant 0 : index
    %c0_25 = arith.constant 0 : index
    %c0_26 = arith.constant 0 : index
    %61 = vector.load %arg9[%c0_24, %c0_25, %c0_26] : memref<2x1x128xf32, #tpu.memory_space<vmem>>, vector<1x1x128xf32>
    %62 = vector.shape_cast %61 : vector<1x1x128xf32> to vector<1x128xf32>
    %63 = vector.broadcast %62 : vector<1x128xf32> to vector<64x128xf32>
    %64 = arith.addf %60, %63 : vector<64x128xf32>
    %65 = arith.negf %64 : vector<64x128xf32>
    %66 = math.exp %65 : vector<64x128xf32>
    %cst_27 = arith.constant 1.000000e+00 : f32
    %67 = vector.broadcast %cst_27 : f32 to vector<64x128xf32>
    %68 = arith.addf %67, %66 : vector<64x128xf32>
    %69 = arith.divf %67, %68 : vector<64x128xf32>
    %70 = arith.mulf %64, %69 : vector<64x128xf32>
    %c0_28 = arith.constant 0 : index
    %c0_29 = arith.constant 0 : index
    %c0_30 = arith.constant 0 : index
    %71 = vector.load %arg10[%c0_28, %c0_29, %c0_30] : memref<2x8x128xbf16, #tpu.memory_space<vmem>>, vector<1x8x128xbf16>
    %72 = vector.shape_cast %71 : vector<1x8x128xbf16> to vector<8x128xbf16>
    %cst_31 = arith.constant dense<0.000000e+00> : vector<64x128xf32>
    %73 = tpu.matmul %31, %72, %cst_31 {dimension_numbers = #tpu.dot_dimension_numbers<[1], [0], [0], [1], [0, 0, 1, 1], [], []>} : vector<64x8xbf16>, vector<8x128xbf16>, vector<64x128xf32> -> vector<64x128xf32>
    %c0_32 = arith.constant 0 : index
    %c0_33 = arith.constant 0 : index
    %c0_34 = arith.constant 0 : index
    %74 = vector.load %arg11[%c0_32, %c0_33, %c0_34] : memref<2x1x128xf32, #tpu.memory_space<vmem>>, vector<1x1x128xf32>
    %75 = vector.shape_cast %74 : vector<1x1x128xf32> to vector<1x128xf32>
    %76 = vector.broadcast %75 : vector<1x128xf32> to vector<64x128xf32>
    %77 = arith.addf %73, %76 : vector<64x128xf32>
    %78 = arith.mulf %70, %77 : vector<64x128xf32>
    %79 = arith.truncf %78 : vector<64x128xf32> to vector<64x128xbf16>
    %c0_35 = arith.constant 0 : index
    %c0_36 = arith.constant 0 : index
    %c0_37 = arith.constant 0 : index
    %80 = vector.load %arg12[%c0_35, %c0_36, %c0_37] : memref<2x128x128xbf16, #tpu.memory_space<vmem>>, vector<1x128x128xbf16>
    %81 = vector.shape_cast %80 : vector<1x128x128xbf16> to vector<128x128xbf16>
    %cst_38 = arith.constant dense<0.000000e+00> : vector<64x128xf32>
    %82 = tpu.matmul %79, %81, %cst_38 {dimension_numbers = #tpu.dot_dimension_numbers<[1], [0], [0], [1], [0, 0, 1, 1], [], []>} : vector<64x128xbf16>, vector<128x128xbf16>, vector<64x128xf32> -> vector<64x128xf32>
    %c0_39 = arith.constant 0 : index
    %c0_40 = arith.constant 0 : index
    %c0_41 = arith.constant 0 : index
    %83 = vector.load %arg13[%c0_39, %c0_40, %c0_41] : memref<2x1x128xf32, #tpu.memory_space<vmem>>, vector<1x1x128xf32>
    %84 = vector.shape_cast %83 : vector<1x1x128xf32> to vector<1x128xf32>
    %85 = vector.broadcast %84 : vector<1x128xf32> to vector<64x128xf32>
    %86 = arith.addf %82, %85 : vector<64x128xf32>
    %87 = arith.negf %86 : vector<64x128xf32>
    %88 = math.exp %87 : vector<64x128xf32>
    %cst_42 = arith.constant 1.000000e+00 : f32
    %89 = vector.broadcast %cst_42 : f32 to vector<64x128xf32>
    %90 = arith.addf %89, %88 : vector<64x128xf32>
    %91 = arith.divf %89, %90 : vector<64x128xf32>
    %92 = arith.mulf %86, %91 : vector<64x128xf32>
    %93 = arith.addf %56, %92 : vector<64x128xf32>
    %94 = vector.broadcast %0 : vector<64x1xf32> to vector<64x128xf32>
    %95 = arith.mulf %93, %94 : vector<64x128xf32>
    %96 = arith.truncf %95 : vector<64x128xf32> to vector<64x128xbf16>
    %c1 = arith.constant 1 : index
    %c0_43 = arith.constant 0 : index
    %c0_44 = arith.constant 0 : index
    %97 = vector.load %arg8[%c1, %c0_43, %c0_44] : memref<2x128x128xbf16, #tpu.memory_space<vmem>>, vector<1x128x128xbf16>
    %98 = vector.shape_cast %97 : vector<1x128x128xbf16> to vector<128x128xbf16>
    %cst_45 = arith.constant dense<0.000000e+00> : vector<64x128xf32>
    %99 = tpu.matmul %96, %98, %cst_45 {dimension_numbers = #tpu.dot_dimension_numbers<[1], [0], [0], [1], [0, 0, 1, 1], [], []>} : vector<64x128xbf16>, vector<128x128xbf16>, vector<64x128xf32> -> vector<64x128xf32>
    %c1_46 = arith.constant 1 : index
    %c0_47 = arith.constant 0 : index
    %c0_48 = arith.constant 0 : index
    %100 = vector.load %arg9[%c1_46, %c0_47, %c0_48] : memref<2x1x128xf32, #tpu.memory_space<vmem>>, vector<1x1x128xf32>
    %101 = vector.shape_cast %100 : vector<1x1x128xf32> to vector<1x128xf32>
    %102 = vector.broadcast %101 : vector<1x128xf32> to vector<64x128xf32>
    %103 = arith.addf %99, %102 : vector<64x128xf32>
    %104 = arith.negf %103 : vector<64x128xf32>
    %105 = math.exp %104 : vector<64x128xf32>
    %cst_49 = arith.constant 1.000000e+00 : f32
    %106 = vector.broadcast %cst_49 : f32 to vector<64x128xf32>
    %107 = arith.addf %106, %105 : vector<64x128xf32>
    %108 = arith.divf %106, %107 : vector<64x128xf32>
    %109 = arith.mulf %103, %108 : vector<64x128xf32>
    %c1_50 = arith.constant 1 : index
    %c0_51 = arith.constant 0 : index
    %c0_52 = arith.constant 0 : index
    %110 = vector.load %arg10[%c1_50, %c0_51, %c0_52] : memref<2x8x128xbf16, #tpu.memory_space<vmem>>, vector<1x8x128xbf16>
    %111 = vector.shape_cast %110 : vector<1x8x128xbf16> to vector<8x128xbf16>
    %cst_53 = arith.constant dense<0.000000e+00> : vector<64x128xf32>
    %112 = tpu.matmul %31, %111, %cst_53 {dimension_numbers = #tpu.dot_dimension_numbers<[1], [0], [0], [1], [0, 0, 1, 1], [], []>} : vector<64x8xbf16>, vector<8x128xbf16>, vector<64x128xf32> -> vector<64x128xf32>
    %c1_54 = arith.constant 1 : index
    %c0_55 = arith.constant 0 : index
    %c0_56 = arith.constant 0 : index
    %113 = vector.load %arg11[%c1_54, %c0_55, %c0_56] : memref<2x1x128xf32, #tpu.memory_space<vmem>>, vector<1x1x128xf32>
    %114 = vector.shape_cast %113 : vector<1x1x128xf32> to vector<1x128xf32>
    %115 = vector.broadcast %114 : vector<1x128xf32> to vector<64x128xf32>
    %116 = arith.addf %112, %115 : vector<64x128xf32>
    %117 = arith.mulf %109, %116 : vector<64x128xf32>
    %118 = arith.truncf %117 : vector<64x128xf32> to vector<64x128xbf16>
    %c1_57 = arith.constant 1 : index
    %c0_58 = arith.constant 0 : index
    %c0_59 = arith.constant 0 : index
    %119 = vector.load %arg12[%c1_57, %c0_58, %c0_59] : memref<2x128x128xbf16, #tpu.memory_space<vmem>>, vector<1x128x128xbf16>
    %120 = vector.shape_cast %119 : vector<1x128x128xbf16> to vector<128x128xbf16>
    %cst_60 = arith.constant dense<0.000000e+00> : vector<64x128xf32>
    %121 = tpu.matmul %118, %120, %cst_60 {dimension_numbers = #tpu.dot_dimension_numbers<[1], [0], [0], [1], [0, 0, 1, 1], [], []>} : vector<64x128xbf16>, vector<128x128xbf16>, vector<64x128xf32> -> vector<64x128xf32>
    %c1_61 = arith.constant 1 : index
    %c0_62 = arith.constant 0 : index
    %c0_63 = arith.constant 0 : index
    %122 = vector.load %arg13[%c1_61, %c0_62, %c0_63] : memref<2x1x128xf32, #tpu.memory_space<vmem>>, vector<1x1x128xf32>
    %123 = vector.shape_cast %122 : vector<1x1x128xf32> to vector<1x128xf32>
    %124 = vector.broadcast %123 : vector<1x128xf32> to vector<64x128xf32>
    %125 = arith.addf %121, %124 : vector<64x128xf32>
    %126 = arith.negf %125 : vector<64x128xf32>
    %127 = math.exp %126 : vector<64x128xf32>
    %cst_64 = arith.constant 1.000000e+00 : f32
    %128 = vector.broadcast %cst_64 : f32 to vector<64x128xf32>
    %129 = arith.addf %128, %127 : vector<64x128xf32>
    %130 = arith.divf %128, %129 : vector<64x128xf32>
    %131 = arith.mulf %125, %130 : vector<64x128xf32>
    %132 = arith.addf %95, %131 : vector<64x128xf32>
    %133 = vector.broadcast %0 : vector<64x1xf32> to vector<64x128xf32>
    %134 = arith.mulf %132, %133 : vector<64x128xf32>
    %135 = vector.shape_cast %134 : vector<64x128xf32> to vector<8x8x128xf32>
    %cst_65 = arith.constant dense<0.000000e+00> : vector<8x128xf32>
    %136 = vector.multi_reduction <add>, %135, %cst_65 [0] : vector<8x8x128xf32> to vector<8x128xf32>
    %c0_i32 = arith.constant 0 : i32
    %137 = arith.cmpi eq, %arg0, %c0_i32 : i32
    %138 = arith.extui %137 : i1 to i32
    %c0_i32_66 = arith.constant 0 : i32
    %139 = arith.cmpi ne, %138, %c0_i32_66 : i32
    scf.if %139 {
      %c0_71 = arith.constant 0 : index
      %c0_72 = arith.constant 0 : index
      %146 = vector.load %arg19[%c0_71, %c0_72] : memref<8x128xf32, #tpu.memory_space<vmem>>, vector<8x128xf32>
      tpu.vector_store %arg19[%c0_71, %c0_72], %136 {strides = array<i32>} : memref<8x128xf32, #tpu.memory_space<vmem>>, vector<8x128xf32>,
    } else {
    }
    %c0_i32_67 = arith.constant 0 : i32
    %140 = arith.cmpi sgt, %arg0, %c0_i32_67 : i32
    %141 = arith.extui %140 : i1 to i32
    %c0_i32_68 = arith.constant 0 : i32
    %142 = arith.cmpi ne, %141, %c0_i32_68 : i32
    scf.if %142 {
      %c0_71 = arith.constant 0 : index
      %c0_72 = arith.constant 0 : index
      %146 = vector.load %arg19[%c0_71, %c0_72] : memref<8x128xf32, #tpu.memory_space<vmem>>, vector<8x128xf32>
      %147 = arith.addf %146, %136 : vector<8x128xf32>
      %c0_73 = arith.constant 0 : index
      %c0_74 = arith.constant 0 : index
      %148 = vector.load %arg19[%c0_73, %c0_74] : memref<8x128xf32, #tpu.memory_space<vmem>>, vector<8x128xf32>
      tpu.vector_store %arg19[%c0_73, %c0_74], %147 {strides = array<i32>} : memref<8x128xf32, #tpu.memory_space<vmem>>, vector<8x128xf32>,
    } else {
    }
    %c0_i32_69 = arith.constant 0 : i32
    %143 = arith.cmpi eq, %arg0, %c0_i32_69 : i32
    %144 = arith.extui %143 : i1 to i32
    %c0_i32_70 = arith.constant 0 : i32
    %145 = arith.cmpi ne, %144, %c0_i32_70 : i32
    scf.if %145 {
      %c0_71 = arith.constant 0 : index
      %c0_72 = arith.constant 0 : index
      %146 = vector.load %arg19[%c0_71, %c0_72] : memref<8x128xf32, #tpu.memory_space<vmem>>, vector<8x128xf32>
      %147 = arith.truncf %146 : vector<8x128xf32> to vector<8x128xbf16>
      %c0_73 = arith.constant 0 : index
      %c0_74 = arith.constant 0 : index
      %148 = vector.load %arg14[%c0_73, %c0_74] : memref<128x128xbf16, #tpu.memory_space<vmem>>, vector<128x128xbf16>
      %cst_75 = arith.constant dense<0.000000e+00> : vector<8x128xf32>
      %149 = tpu.matmul %147, %148, %cst_75 {dimension_numbers = #tpu.dot_dimension_numbers<[1], [0], [0], [1], [0, 0, 1, 1], [], []>} : vector<8x128xbf16>, vector<128x128xbf16>, vector<8x128xf32> -> vector<8x128xf32>
      %c0_76 = arith.constant 0 : index
      %c0_77 = arith.constant 0 : index
      %150 = vector.load %arg15[%c0_76, %c0_77] : memref<1x128xf32, #tpu.memory_space<vmem>>, vector<1x128xf32>
      %151 = vector.broadcast %150 : vector<1x128xf32> to vector<8x128xf32>
      %152 = arith.addf %149, %151 : vector<8x128xf32>
      %153 = arith.negf %152 : vector<8x128xf32>
      %154 = math.exp %153 : vector<8x128xf32>
      %cst_78 = arith.constant 1.000000e+00 : f32
      %155 = vector.broadcast %cst_78 : f32 to vector<8x128xf32>
      %156 = arith.addf %155, %154 : vector<8x128xf32>
      %157 = arith.divf %155, %156 : vector<8x128xf32>
      %158 = arith.mulf %152, %157 : vector<8x128xf32>
      %159 = arith.truncf %158 : vector<8x128xf32> to vector<8x128xbf16>
      %c0_79 = arith.constant 0 : index
      %c0_80 = arith.constant 0 : index
      %160 = vector.load %arg16[%c0_79, %c0_80] : memref<128x128xbf16, #tpu.memory_space<vmem>>, vector<128x128xbf16>
      %cst_81 = arith.constant dense<0.000000e+00> : vector<8x128xf32>
      %161 = tpu.matmul %159, %160, %cst_81 {dimension_numbers = #tpu.dot_dimension_numbers<[1], [0], [0], [1], [0, 0, 1, 1], [], []>} : vector<8x128xbf16>, vector<128x128xbf16>, vector<8x128xf32> -> vector<8x128xf32>
      %c0_82 = arith.constant 0 : index
      %c0_83 = arith.constant 0 : index
      %162 = vector.load %arg17[%c0_82, %c0_83] : memref<1x128xf32, #tpu.memory_space<vmem>>, vector<1x128xf32>
      %163 = vector.broadcast %162 : vector<1x128xf32> to vector<8x128xf32>
      %164 = arith.addf %161, %163 : vector<8x128xf32>
      %c0_84 = arith.constant 0 : index
      %c0_85 = arith.constant 0 : index
      %165 = vector.load %arg18[%c0_84, %c0_85] : memref<8x128xf32, #tpu.memory_space<vmem>>, vector<8x128xf32>
      tpu.vector_store %arg18[%c0_84, %c0_85], %164 {strides = array<i32>} : memref<8x128xf32, #tpu.memory_space<vmem>>, vector<8x128xf32>,
    } else {
    }
    return
  }
  func.func @transform_0(%arg0: i32) -> (i32, i32) {
    %c0_i32 = arith.constant 0 : i32
    %c0_i32_0 = arith.constant 0 : i32
    return %arg0, %c0_i32 : i32, i32
  }
  func.func @transform_1(%arg0: i32) -> (i32, i32) {
    %c0_i32 = arith.constant 0 : i32
    %c0_i32_0 = arith.constant 0 : i32
    %c0_i32_1 = arith.constant 0 : i32
    return %c0_i32, %c0_i32_0 : i32, i32
  }
  func.func @transform_2(%arg0: i32) -> (i32, i32) {
    %c0_i32 = arith.constant 0 : i32
    %c0_i32_0 = arith.constant 0 : i32
    return %arg0, %c0_i32 : i32, i32
  }
  func.func @transform_3(%arg0: i32) -> (i32, i32) {
    %c0_i32 = arith.constant 0 : i32
    %c0_i32_0 = arith.constant 0 : i32
    return %arg0, %c0_i32 : i32, i32
  }
  func.func @transform_4(%arg0: i32) -> (i32, i32) {
    %c0_i32 = arith.constant 0 : i32
    %c0_i32_0 = arith.constant 0 : i32
    %c0_i32_1 = arith.constant 0 : i32
    return %c0_i32, %c0_i32_0 : i32, i32
  }
  func.func @transform_5(%arg0: i32) -> (i32, i32) {
    %c0_i32 = arith.constant 0 : i32
    %c0_i32_0 = arith.constant 0 : i32
    %c0_i32_1 = arith.constant 0 : i32
    return %c0_i32, %c0_i32_0 : i32, i32
  }
  func.func @transform_6(%arg0: i32) -> (i32, i32) {
    %c0_i32 = arith.constant 0 : i32
    %c0_i32_0 = arith.constant 0 : i32
    %c0_i32_1 = arith.constant 0 : i32
    return %c0_i32, %c0_i32_0 : i32, i32
  }
  func.func @transform_7(%arg0: i32) -> (i32, i32, i32) {
    %c0_i32 = arith.constant 0 : i32
    %c0_i32_0 = arith.constant 0 : i32
    %c0_i32_1 = arith.constant 0 : i32
    %c0_i32_2 = arith.constant 0 : i32
    return %c0_i32, %c0_i32_0, %c0_i32_1 : i32, i32, i32
  }
  func.func @transform_8(%arg0: i32) -> (i32, i32, i32) {
    %c0_i32 = arith.constant 0 : i32
    %c0_i32_0 = arith.constant 0 : i32
    %c0_i32_1 = arith.constant 0 : i32
    %c0_i32_2 = arith.constant 0 : i32
    return %c0_i32, %c0_i32_0, %c0_i32_1 : i32, i32, i32
  }
  func.func @transform_9(%arg0: i32) -> (i32, i32, i32) {
    %c0_i32 = arith.constant 0 : i32
    %c0_i32_0 = arith.constant 0 : i32
    %c0_i32_1 = arith.constant 0 : i32
    %c0_i32_2 = arith.constant 0 : i32
    return %c0_i32, %c0_i32_0, %c0_i32_1 : i32, i32, i32
  }
  func.func @transform_10(%arg0: i32) -> (i32, i32, i32) {
    %c0_i32 = arith.constant 0 : i32
    %c0_i32_0 = arith.constant 0 : i32
    %c0_i32_1 = arith.constant 0 : i32
    %c0_i32_2 = arith.constant 0 : i32
    return %c0_i32, %c0_i32_0, %c0_i32_1 : i32, i32, i32
  }
  func.func @transform_11(%arg0: i32) -> (i32, i32, i32) {
    %c0_i32 = arith.constant 0 : i32
    %c0_i32_0 = arith.constant 0 : i32
    %c0_i32_1 = arith.constant 0 : i32
    %c0_i32_2 = arith.constant 0 : i32
    return %c0_i32, %c0_i32_0, %c0_i32_1 : i32, i32, i32
  }
  func.func @transform_12(%arg0: i32) -> (i32, i32, i32) {
    %c0_i32 = arith.constant 0 : i32
    %c0_i32_0 = arith.constant 0 : i32
    %c0_i32_1 = arith.constant 0 : i32
    %c0_i32_2 = arith.constant 0 : i32
    return %c0_i32, %c0_i32_0, %c0_i32_1 : i32, i32, i32
  }
  func.func @transform_13(%arg0: i32) -> (i32, i32) {
    %c0_i32 = arith.constant 0 : i32
    %c0_i32_0 = arith.constant 0 : i32
    %c0_i32_1 = arith.constant 0 : i32
    return %c0_i32, %c0_i32_0 : i32, i32
  }
  func.func @transform_14(%arg0: i32) -> (i32, i32) {
    %c0_i32 = arith.constant 0 : i32
    %c0_i32_0 = arith.constant 0 : i32
    %c0_i32_1 = arith.constant 0 : i32
    return %c0_i32, %c0_i32_0 : i32, i32
  }
  func.func @transform_15(%arg0: i32) -> (i32, i32) {
    %c0_i32 = arith.constant 0 : i32
    %c0_i32_0 = arith.constant 0 : i32
    %c0_i32_1 = arith.constant 0 : i32
    return %c0_i32, %c0_i32_0 : i32, i32
  }
  func.func @transform_16(%arg0: i32) -> (i32, i32) {
    %c0_i32 = arith.constant 0 : i32
    %c0_i32_0 = arith.constant 0 : i32
    %c0_i32_1 = arith.constant 0 : i32
    return %c0_i32, %c0_i32_0 : i32, i32
  }
  func.func @transform_17(%arg0: i32) -> (i32, i32) {
    %c0_i32 = arith.constant 0 : i32
    %c0_i32_0 = arith.constant 0 : i32
    %c0_i32_1 = arith.constant 0 : i32
    return %c0_i32, %c0_i32_0 : i32, i32
  }
}

</mosaic_0001>

<bundles_post_ra>
// kernel: molecule_model_forward.1
= control target key start
LH: loop header
LB: loop body
LE: loop exit
PB: predicated region body
PF: predicated region fallthrough
CT: control target
= control target key end

     0   :  { %v6252_v0 = vmov 0   ;;  %s6217_s2 = inlined_call_operand.vmem [shape: f32[64,1], index: 2, kind: input, shape index: {}]   ;;  %s6218_s4 = inlined_call_operand.vmem [shape: f32[1,8], index: 4, kind: input, shape index: {}]   ;;  %s6219_s3 = inlined_call_operand.vmem [shape: f32[64,1], index: 3, kind: input, shape index: {}]   ;;  %s6220_s6 = inlined_call_operand.vmem [shape: f32[1,128], index: 6, kind: input, shape index: {}]   ;;  %s6221_s5 = inlined_call_operand.vmem [shape: bf16[8,128], index: 5, kind: input, shape index: {}]   ;;  %s6222_s9 = inlined_call_operand.vmem [shape: bf16[2,8,128], index: 9, kind: input, shape index: {}]   ;;  %s6223_s10 = inlined_call_operand.vmem [shape: f32[2,1,128], index: 10, kind: input, shape index: {}]   ;;  %s6224_s0 = inlined_call_operand.vmem [shape: f32[8,128], index: 0, kind: input, shape index: {}]   ;;  %s6225_s1 = inlined_call_operand.vmem [shape: f32[8,128], index: 1, kind: input, shape index: {}]   ;;  %s6226_s8 = inlined_call_operand.vmem [shape: f32[2,1,128], index: 8, kind: input, shape index: {}]   ;;  %s6227_s7 = inlined_call_operand.vmem [shape: bf16[2,128,128], index: 7, kind: input, shape index: {}]   ;;  %s6228_s12 = inlined_call_operand.vmem [shape: f32[2,1,128], index: 12, kind: input, shape index: {}]   ;;  %s6229_s11 = inlined_call_operand.vmem [shape: bf16[2,128,128], index: 11, kind: input, shape index: {}]   ;;  %s6230_s14 = inlined_call_operand.vmem [shape: f32[1,128], index: 14, kind: input, shape index: {}]   ;;  %s6231_s13 = inlined_call_operand.vmem [shape: bf16[128,128], index: 13, kind: input, shape index: {}]   ;;  %s6232_s16 = inlined_call_operand.vmem [shape: f32[1,128], index: 16, kind: input, shape index: {}]   ;;  %s6233_s15 = inlined_call_operand.vmem [shape: bf16[128,128], index: 15, kind: input, shape index: {}]   ;;  %s6234_s17 = inlined_call_operand.vmem [shape: f32[8,128], index: 17, kind: output, shape index: {}]  }
   0x1   :  { %6304 = sst [smem:[#allocation29_spill]] %s6217_s2  ;;  %3600 = vset.pattern.permute.xlu2 %v6252_v0  ;;  %3599 = vset.pattern.permute.xlu1 %v6252_v0 }
   0x2   :  { %6305 = sst [smem:[#allocation30_spill]] %s6218_s4  ;;  %3598 = vset.pattern.permute.xlu0 %v6252_v0 }
   0x3   :  { %s6306_s26 = sld [smem:[#allocation29_spill]] }
   0x4   :  { %s6307_s29 = sld [smem:[#allocation30_spill]] }
   0x9   :  { %v69_v1 = vld [vmem:[%s6306_s26 + $0x20] sm:$0xff]  ;;  %v67_v2 = vld [vmem:[%s6306_s26 + $0x10] sm:$0xff]  ;;  %v68_v7 = vld [vmem:[%s6306_s26 + $0x18] sm:$0xff] }
   0xa   :  { %v65_v3 = vld [vmem:[%s6306_s26] sm:$0xff]  ;;  %v3900_v4 = vmul.f32 0.2, %v69_v1  ;;  %v3902_v5 = vmul.f32 0.2, %v67_v2  ;;  %v66_v8 = vld [vmem:[%s6306_s26 + $0x8] sm:$0xff] }
   0xb   :  { %v74_v6 = vmul.f32 0.2, %v65_v3  ;;  %v3912_v9 = vmul.f32 0.2, %v66_v8  ;;  %v70_v10 = vld [vmem:[%s6306_s26 + $0x28] sm:$0xff]  ;;  %v72_v29 = vld [vmem:[%s6306_s26 + $0x38] sm:$0xff] }
   0xc   :  { %211 = vperm.xlu2 %3600, %v3900_v4   ;;  %201 = vperm.xlu1 %3599, %v3902_v5   ;;  %v3917_v11 = vmul.f32 0.2, %v68_v7  ;;  %v3924_v16 = vmul.f32 0.2, %v70_v10  ;;  %v92_v20 = vmul.f32 %v3902_v5, %v3902_v5  ;;  %v71_v33 = vld [vmem:[%s6306_s26 + $0x30] sm:$0xff]  ;;  %v94_v42 = vmul.f32 %v3900_v4, %v3900_v4  ;;  %v57_v3 = vld [vmem:[%s6219_s3] sm:$0xff] }
   0xd   :  { %3611 = vrcp.f32 %v74_v6  ;;  %191 = vperm.xlu0 %3598, %v74_v6   ;;  %v90_v12 = vmul.f32 %v74_v6, %v74_v6  ;;  %v91_v13 = vmul.f32 %v3912_v9, %v3912_v9  ;;  %vm170_vm0 = vcmp.lt.f32.partialorder %v74_v6, 1.0 }
   0xe   :  { %3613 = vrcp.f32 %v3912_v9  ;;  %v93_v15 = vmul.f32 %v3917_v11, %v3917_v11  ;;  %v100_v32 = vmul.f32 %v92_v20, %v92_v20  ;;  %v3942_v41 = vmul.f32 0.2, %v72_v29 }
   0xf   :  { %v98_v14 = vmul.f32 %v90_v12, %v90_v12  ;;  %v99_v17 = vmul.f32 %v91_v13, %v91_v13  ;;  %3615 = vrcp.f32 %v3917_v11  ;;  %v3946_v43 = vmul.f32 0.2, %v71_v33 }
  0x10   :  { %v101_v27 = vmul.f32 %v93_v15, %v93_v15  ;;  %3617 = vrcp.f32 %v3902_v5  ;;  %v108_v45 = vmul.f32 %v100_v32, %v3902_v5  ;;  %v124_v48 = vmul.f32 -21.0, %v100_v32 }
  0x11   :  { %v106_v18 = vmul.f32 %v98_v14, %v74_v6  ;;  %v122_v19 = vmul.f32 -21.0, %v98_v14  ;;  %v107_v22 = vmul.f32 %v99_v17, %v3912_v9  ;;  %v123_v23 = vmul.f32 -21.0, %v99_v17 }
  0x12   :  { %v109_v38 = vmul.f32 %v101_v27, %v3917_v11  ;;  %v125_v39 = vmul.f32 -21.0, %v101_v27  ;;  %v95_v49 = vmul.f32 %v3924_v16, %v3924_v16  ;;  %3619 = vrcp.f32 %v3900_v4 }
  0x13   :  { %v3612_v21 = vpop.eup %3611  ;;  %v114_v24 = vmul.f32 %v106_v18, %v74_v6  ;;  %v138_v26 = vmul.f32 35.0, %v106_v18  ;;  %v115_v34 = vmul.f32 %v107_v22, %v3912_v9  ;;  %v139_v36 = vmul.f32 35.0, %v107_v22  ;;  %v58_v6 = vld [vmem:[%s6219_s3 + $0x8] sm:$0xff] }
  0x14   :  { %v130_v25 = vadd.f32 %v3612_v21, %v122_v19  ;;  %v3614_v28 = vpop.eup %3613  ;;  %216 = vperm.xlu2 %3600, %v3924_v16   ;;  %206 = vperm.xlu1 %3599, %v3917_v11   ;;  %v117_v51 = vmul.f32 %v109_v38, %v3917_v11  ;;  %v141_v53 = vmul.f32 35.0, %v109_v38  ;;  %v102_v54 = vmul.f32 %v94_v42, %v94_v42 }
  0x15   :  { %196 = vperm.xlu0 %3598, %v3912_v9   ;;  %v154_v31 = vmul.f32 -15.0, %v114_v24  ;;  %v131_v35 = vadd.f32 %v3614_v28, %v123_v23  ;;  %v3616_v40 = vpop.eup %3615  ;;  %v155_v47 = vmul.f32 -15.0, %v115_v34  ;;  %3621 = vrcp.f32 %v3924_v16 }
  0x16   :  { %v146_v30 = vadd.f32 %v138_v26, %v130_v25  ;;  %v3618_v50 = vpop.eup %3617  ;;  %v133_v52 = vadd.f32 %v3616_v40, %v125_v39  ;;  %v103_v55 = vmul.f32 %v95_v49, %v95_v49  ;;  %v116_v57 = vmul.f32 %v108_v45, %v3902_v5  ;;  %v59_v26 = vld [vmem:[%s6219_s3 + $0x10] sm:$0xff] }
  0x17   :  { %v147_v46 = vadd.f32 %v139_v36, %v131_v35  ;;  %v132_v58 = vadd.f32 %v3618_v50, %v124_v48  ;;  %v140_v59 = vmul.f32 35.0, %v108_v45  ;;  %vm171_vm1 = vcmp.lt.f32.partialorder %v3912_v9, 1.0 }
  0x18   :  { %v162_v37 = vadd.f32 %v154_v31, %v146_v30  ;;  %v149_v60 = vadd.f32 %v141_v53, %v133_v52  ;;  %v157_v61 = vmul.f32 -15.0, %v117_v51  ;;  %v110_v62 = vmul.f32 %v102_v54, %v3900_v4  ;;  %v3620_v2 = vpop.eup %3619  ;;  %v62_v51 = vld [vmem:[%s6219_s3 + $0x28] sm:$0xff]  ;;  %v61_v53 = vld [vmem:[%s6219_s3 + $0x20] sm:$0xff] }
  0x19   :  { %v163_v56 = vadd.f32 %v155_v47, %v147_v46  ;;  %v126_v63 = vmul.f32 -21.0, %v102_v54  ;;  %v96_v1 = vmul.f32 %v3946_v43, %v3946_v43  ;;  %v111_v7 = vmul.f32 %v103_v55, %v3924_v16  ;;  %v60_v46 = vld [vmem:[%s6219_s3 + $0x18] sm:$0xff] }
  0x1a   :  { %v178_v44 = vsel %vm170_vm0, %v162_v37, 0.0  ;;  %v127_v8 = vmul.f32 -21.0, %v103_v55  ;;  %v148_v12 = vadd.f32 %v140_v59, %v132_v58  ;;  %v156_v13 = vmul.f32 -15.0, %v116_v57  ;;  %v64_v57 = vld [vmem:[%s6219_s3 + $0x38] sm:$0xff]  ;;  %v4005_v59 = vld [vmem:[%s6307_s29] ss:$0 sm:$0xff] }
  0x1b   :  { %v3622_v9 = vpop.eup %3621  ;;  %v179_v10 = vsel %vm171_vm1, %v163_v56, 0.0  ;;  %v165_v14 = vadd.f32 %v157_v61, %v149_v60  ;;  %vm173_vm2 = vcmp.lt.f32.partialorder %v3917_v11, 1.0  ;;  %v118_v15 = vmul.f32 %v110_v62, %v3900_v4 }
  0x1c   :  { %226 = vperm.xlu1 %3599, %v3942_v41   ;;  %1479 = vperm.xlu2 %3600, %v178_v44   ;;  %v134_v17 = vadd.f32 %v3620_v2, %v126_v63  ;;  %3623 = vrcp.f32 %v3946_v43  ;;  %v104_v18 = vmul.f32 %v96_v1, %v96_v1  ;;  %v142_v19 = vmul.f32 35.0, %v110_v62 }
  0x1d   :  { %221 = vperm.xlu0 %3598, %v3946_v43   ;;  %v119_v20 = vmul.f32 %v111_v7, %v3924_v16  ;;  %v135_v21 = vadd.f32 %v3622_v9, %v127_v8  ;;  %v143_v22 = vmul.f32 35.0, %v111_v7  ;;  %v164_v23 = vadd.f32 %v156_v13, %v148_v12 }
  0x1e   :  { %vm172_vm3 = vcmp.lt.f32.partialorder %v3902_v5, 1.0  ;;  %v181_v24 = vsel %vm173_vm2, %v165_v14, 0.0  ;;  %v112_v11 = vmul.f32 %v104_v18, %v3946_v43  ;;  %v128_v25 = vmul.f32 -21.0, %v104_v18 }
  0x1f   :  { %v150_v27 = vadd.f32 %v142_v19, %v134_v17  ;;  %v158_v28 = vmul.f32 -15.0, %v118_v15  ;;  %v151_v29 = vadd.f32 %v143_v22, %v135_v21  ;;  %v159_v30 = vmul.f32 -15.0, %v119_v20 }
  0x20   :  { %v180_v32 = vsel %vm172_vm3, %v164_v23, 0.0  ;;  %v97_v33 = vmul.f32 %v3942_v41, %v3942_v41  ;;  %v120_v5 = vmul.f32 %v112_v11, %v3946_v43  ;;  %3625 = vrcp.f32 %v3942_v41 }
  0x21   :  { %v166_v34 = vadd.f32 %v158_v28, %v150_v27  ;;  %v167_v35 = vadd.f32 %v159_v30, %v151_v29  ;;  %v144_v37 = vmul.f32 35.0, %v112_v11  ;;  %vm174_vm4 = vcmp.lt.f32.partialorder %v3900_v4, 1.0 }
  0x22   :  { %v3624_v31 = vpop.eup %3623  ;;  %vm175_vm5 = vcmp.lt.f32.partialorder %v3924_v16, 1.0  ;;  %v105_v38 = vmul.f32 %v97_v33, %v97_v33  ;;  %v160_v44 = vmul.f32 -15.0, %v120_v5  ;;  %vm176_vm6 = vcmp.lt.f32.partialorder %v3946_v43, 1.0  ;;  %v63_v43 = vld [vmem:[%s6219_s3 + $0x30] sm:$0xff] }
  0x23   :  { %v136_v36 = vadd.f32 %v3624_v31, %v128_v25  ;;  %v182_v39 = vsel %vm174_vm4, %v166_v34, 0.0  ;;  %v183_v40 = vsel %vm175_vm5, %v167_v35, 0.0  ;;  %vm177_vm7 = vcmp.lt.f32.partialorder %v3942_v41, 1.0 }
  0x24   :  { %1527 = vperm.xlu1 %3599, %v57_v3   ;;  %1532 = vperm.xlu2 %3600, %v58_v6   ;;  %v113_v47 = vmul.f32 %v105_v38, %v3942_v41  ;;  %v129_v48 = vmul.f32 -21.0, %v105_v38  ;;  %v6249_v12 = vmov 683565275   ;;  %v6238_v14 = vmov 2475754826  }
  0x25   :  { %1484 = vperm.xlu0 %3598, %v179_v10   ;;  %v152_v42 = vadd.f32 %v144_v37, %v136_v36  ;;  %v6240_v19 = vmov 2131351028   ;;  %v6243_v22 = vmov 2102212464   ;;  %v6247_v11 = vmov 920167782  }
  0x26   :  { %v3626_v45 = vpop.eup %3625  ;;  %v121_v4 = vmul.f32 %v113_v47, %v3942_v41  ;;  %v145_v50 = vmul.f32 35.0, %v113_v47  ;;  %v6245_v27 = vmov 1326507024  }
  0x27   :  { %v168_v49 = vadd.f32 %v160_v44, %v152_v42  ;;  %v137_v16 = vadd.f32 %v3626_v45, %v129_v48 }
  0x28   :  { %v161_v55 = vmul.f32 -15.0, %v121_v4 }
  0x29   :  { %v184_v52 = vsel %vm176_vm6, %v168_v49, 0.0  ;;  %v153_v54 = vadd.f32 %v145_v50, %v137_v16 }
  0x2b   :  { %v169_v56 = vadd.f32 %v161_v55, %v153_v54 }
  0x2c   :  { %1494 = vperm.xlu1 %3599, %v181_v24   ;;  %1537 = vperm.xlu2 %3600, %v59_v26  }
  0x2d   :  { %1489 = vperm.xlu0 %3598, %v180_v32   ;;  %v185_v58 = vsel %vm177_vm7, %v169_v56, 0.0 }
  0x34   :  { %1499 = vperm.xlu1 %3599, %v182_v39   ;;  %1504 = vperm.xlu2 %3600, %v183_v40  }
  0x35   :  { %1542 = vperm.xlu0 %3598, %v60_v46  }
  0x3c   :  { %1552 = vperm.xlu1 %3599, %v62_v51   ;;  %1509 = vperm.xlu2 %3600, %v184_v52  }
  0x3d   :  { %1547 = vperm.xlu0 %3598, %v61_v53  }
  0x44   :  { %1557 = vperm.xlu1 %3599, %v63_v43   ;;  %1562 = vperm.xlu2 %3600, %v64_v57  }
  0x45   :  { %1514 = vperm.xlu0 %3598, %v185_v58  }
  0x66   :  { %v4020_v17 = vpop.permute.xlu2 %211 }
  0x6e   :  { %v217_v4 = vpop.permute.xlu2 %216 }
  0x6f   :  { %v4071_v55 = vmul.f32 %v4005_v59, %v217_v4 }
  0x71   :  { %6309 = vst [vmem:[#allocation4_spill] sm:$0xff] %v4071_v55 }
  0x7f   :  { %v192_v60 = vpop.permute.xlu0 %191 }
  0x80   :  { %v4008_v41 = vmul.f32 %v4005_v59, %v192_v60 }
  0x82   :  { %6308 = vst [vmem:[#allocation3_spill] sm:$0xff] %v4008_v41  ;;  %v240_v61 = vand.u32 2139095040, %v4008_v41  ;;  %v6242_v1 = vand.u32 2147483647, %v4008_v41 }
  0x84   :  { %v241_v62 = vshrl.u32 %v240_v61, 23  ;;  %v244_v6 = vand.u32 8388607, %v6242_v1 }
  0x86   :  { %v3230_v63 = vadd.s32 4294967169, %v241_v62  ;;  %v245_v9 = vor.u32 8388608, %v244_v6 }
  0x88   :  { %v247_v2 = vadd.s32 1, %v3230_v63  ;;  %v4042_v5 = vshll.u32 %v245_v9, 8  ;;  %v1015_v63 = vand.u32 2139095040, %v4071_v55  ;;  %v197_v9 = vpop.permute.xlu0 %196 }
  0x8a   :  { %vm248_vm8 = vcmp.gt.s32.totalorder %v247_v2, 0  ;;  %v286_v44 = vand.u32 65535, %v4042_v5  ;;  %v287_v49 = vshrl.u32 %v4042_v5, 16 }
  0x8b   :  { %v249_v3 = vsel %vm248_vm8, %v247_v2, 0 }
  0x8c   :  { %v251_v7 = vand.u32 31, %v249_v3  ;;  %v4016_v10 = vshrl.u32 %v249_v3, 5 }
  0x8e   :  { %v4014_v8 = vsub.s32 32, %v251_v7  ;;  %v254_v13 = vshll.u32 %v6249_v12, %v251_v7  ;;  %v257_v15 = vshll.u32 %v6238_v14, %v251_v7  ;;  %v260_v21 = vshll.u32 %v6240_v19, %v251_v7 }
  0x8f   :  { %v263_v24 = vshll.u32 %v6243_v22, %v251_v7  ;;  %v266_v26 = vshll.u32 %v6247_v11, %v251_v7  ;;  %vm269_vm9 = vcmp.lt.s32.totalorder %v4016_v10, 1  ;;  %vm272_vm10 = vcmp.lt.s32.totalorder %v4016_v10, 4 }
  0x90   :  { %v255_v18 = vshrl.u32 %v6238_v14, %v4014_v8  ;;  %v258_v20 = vshrl.u32 %v6240_v19, %v4014_v8  ;;  %v261_v23 = vshrl.u32 %v6243_v22, %v4014_v8  ;;  %v264_v25 = vshrl.u32 %v6247_v11, %v4014_v8 }
  0x91   :  { %v267_v28 = vshrl.u32 %v6245_v27, %v4014_v8  ;;  %vm271_vm11 = vcmp.lt.s32.totalorder %v4016_v10, 3  ;;  %vm270_vm12 = vcmp.lt.s32.totalorder %v4016_v10, 2 }
  0x92   :  { %v4035_v29 = vor.u32 %v255_v18, %v254_v13  ;;  %v4037_v30 = vor.u32 %v258_v20, %v257_v15  ;;  %v4039_v31 = vor.u32 %v261_v23, %v260_v21  ;;  %v265_v32 = vor.u32 %v264_v25, %v263_v24 }
  0x93   :  { %v268_v33 = vor.u32 %v267_v28, %v266_v26  ;;  %v1016_v18 = vshrl.u32 %v1015_v63, 23  ;;  %v4079_v21 = vmul.f32 %v4005_v59, %v197_v9  ;;  %v4083_v23 = vmul.f32 %v4005_v59, %v4020_v17 }
  0x94   :  { %v277_v34 = vsel %vm269_vm9, %v4035_v29, %v4037_v30  ;;  %v281_v35 = vsel %vm269_vm9, %v4037_v30, %v4039_v31  ;;  %v278_v36 = vsel %vm272_vm10, %v265_v32, 920167782  ;;  %v274_v17 = vsel %vm272_vm10, %v4039_v31, 2102212464 }
  0x95   :  { %v282_v37 = vsel %vm272_vm10, %v268_v33, 1326507024  ;;  %v279_v38 = vsel %vm271_vm11, %v4039_v31, %v278_v36  ;;  %6310 = vst [vmem:[#allocation5_spill] sm:$0xff] %v4079_v21  ;;  %v3245_v26 = vadd.s32 4294967169, %v1016_v18  ;;  %v395_v33 = vand.u32 2139095040, %v4079_v21 }
  0x96   :  { %v283_v39 = vsel %vm271_vm11, %v265_v32, %v282_v37  ;;  %v280_v40 = vsel %vm270_vm12, %v277_v34, %v279_v38  ;;  %6311 = vst [vmem:[#allocation6_spill] sm:$0xff] %v4083_v23  ;;  %v860_v34 = vand.u32 2139095040, %v4083_v23 }
  0x97   :  { %v284_v42 = vsel %vm270_vm12, %v281_v35, %v283_v39  ;;  %v310_v47 = vand.u32 65535, %v280_v40  ;;  %v311_v48 = vshrl.u32 %v280_v40, 16  ;;  %v1022_v37 = vadd.s32 1, %v3245_v26 }
  0x98   :  { %v288_v45 = vand.u32 65535, %v284_v42  ;;  %v289_v46 = vshrl.u32 %v284_v42, 16  ;;  %v396_v40 = vshrl.u32 %v395_v33, 23  ;;  %v861_v42 = vshrl.u32 %v860_v34, 23 }
  0x99   :  { %v313_v50 = vmul.u32 %v311_v48, %v286_v44  ;;  %v314_v51 = vmul.u32 %v310_v47, %v287_v49  ;;  %v312_v56 = vmul.u32 %v310_v47, %v286_v44  ;;  %v315_v3 = vmul.u32 %v311_v48, %v287_v49 }
  0x9a   :  { %v291_v16 = vmul.u32 %v289_v46, %v286_v44  ;;  %v290_v52 = vmul.u32 %v288_v45, %v286_v44  ;;  %v292_v53 = vmul.u32 %v288_v45, %v287_v49  ;;  %v293_v6 = vmul.u32 %v289_v46, %v287_v49 }
  0x9b   :  { %v316_v43 = vshll.u32 %v313_v50, 16  ;;  %v318_v58 = vshll.u32 %v314_v51, 16  ;;  %v317_v28 = vshrl.u32 %v313_v50, 16  ;;  %v319_v38 = vshrl.u32 %v314_v51, 16 }
  0x9c   :  { %v294_v54 = vshll.u32 %v291_v16, 16  ;;  %v296_v61 = vshll.u32 %v292_v53, 16  ;;  %v295_v32 = vshrl.u32 %v291_v16, 16  ;;  %v297_v39 = vshrl.u32 %v292_v53, 16 }
  0x9d   :  { %vm320_vm14 = vc.u32 %v312_v56, %v316_v43  ;;  %v322_v60 = vadd.s32 %v316_v43, %v312_v56  ;;  %v253_v45 = vshrl.u32 %v6249_v12, %v4014_v8  ;;  %vm1023_vm1 = vcmp.gt.s32.totalorder %v1022_v37, 0  ;;  %v202_v8 = vpop.permute.xlu1 %201 }
  0x9e   :  { %vm298_vm13 = vc.u32 %v290_v52, %v294_v54  ;;  %v300_v57 = vadd.s32 %v294_v54, %v290_v52  ;;  %v321_v62 = vsel %vm320_vm14, 1, %v6252_v0  ;;  %v275_v48 = vsel %vm271_vm11, %v4037_v30, %v274_v17 }
  0x9f   :  { %v299_v2 = vsel %vm298_vm13, 1, %v6252_v0  ;;  %vm324_vm15 = vc.u32 %v322_v60, %v318_v58  ;;  %v323_v7 = vadd.s32 %v321_v62, %v315_v3  ;;  %v273_v47 = vsel %vm269_vm9, %v253_v45, %v4035_v29 }
  0xa0   :  { %vm302_vm0 = vc.u32 %v300_v57, %v296_v61  ;;  %v301_v13 = vadd.s32 %v299_v2, %v293_v6  ;;  %v325_v15 = vsel %vm324_vm15, 1, %v6252_v0  ;;  %v4100_v49 = vadd.s32 %v322_v60, %v318_v58 }
  0xa1   :  { %v303_v20 = vsel %vm302_vm0, 1, %v6252_v0  ;;  %v327_v24 = vadd.s32 %v325_v15, %v323_v7  ;;  %v3233_v4 = vadd.s32 4294967169, %v396_v40  ;;  %v3242_v16 = vadd.s32 4294967169, %v861_v42 }
  0xa2   :  { %v305_v25 = vadd.s32 %v303_v20, %v301_v13  ;;  %v1024_v50 = vsel %vm1023_vm1, %v1022_v37, 0  ;;  %v276_v51 = vsel %vm270_vm12, %v273_v47, %v275_v48  ;;  %v4108_v30 = vmul.f32 %v4005_v59, %v202_v8 }
  0xa3   :  { %v328_v35 = vadd.s32 %v327_v24, %v317_v28  ;;  %v402_v52 = vadd.s32 1, %v3233_v4  ;;  %v867_v53 = vadd.s32 1, %v3242_v16  ;;  %v1026_v29 = vand.u32 31, %v1024_v50 }
  0xa4   :  { %v306_v36 = vadd.s32 %v305_v25, %v295_v32  ;;  %v330_v56 = vmul.u32 %v4042_v5, %v276_v51  ;;  %6312 = vst [vmem:[#allocation7_spill] sm:$0xff] %v4108_v30  ;;  %v550_v58 = vand.u32 2139095040, %v4108_v30  ;;  %v6237_v62 = vand.u32 2147483647, %v4071_v55 }
  0xa5   :  { %v329_v44 = vadd.s32 %v328_v35, %v319_v38  ;;  %vm403_vm3 = vcmp.gt.s32.totalorder %v402_v52, 0  ;;  %vm868_vm4 = vcmp.gt.s32.totalorder %v867_v53, 0  ;;  %v4110_v57 = vsub.s32 32, %v1026_v29  ;;  %v207_v6 = vpop.permute.xlu1 %206 }
  0xa6   :  { %v4092_v46 = vadd.s32 %v306_v36, %v297_v39  ;;  %v404_v60 = vsel %vm403_vm3, %v402_v52, 0  ;;  %v869_v61 = vsel %vm868_vm4, %v867_v53, 0  ;;  %v1038_v63 = vshll.u32 %v6243_v22, %v1026_v29 }
  0xa7   :  { %v333_v31 = vadd.s32 1, %v329_v44  ;;  %v1039_v5 = vshrl.u32 %v6247_v11, %v4110_v57  ;;  %v1041_v2 = vshll.u32 %v6247_v11, %v1026_v29  ;;  %v1042_v3 = vshrl.u32 %v6245_v27, %v4110_v57 }
  0xa8   :  { %vm332_vm2 = vc.u32 %v4092_v46, %v4100_v49  ;;  %v4120_v7 = vshrl.u32 %v1024_v50, 5  ;;  %v406_v9 = vand.u32 31, %v404_v60  ;;  %v1029_v13 = vshll.u32 %v6249_v12, %v1026_v29 }
  0xa9   :  { %v334_v54 = vsel %vm332_vm2, %v333_v31, %v329_v44  ;;  %v551_v15 = vshrl.u32 %v550_v58, 23  ;;  %v1030_v18 = vshrl.u32 %v6238_v14, %v4110_v57  ;;  %v1032_v20 = vshll.u32 %v6238_v14, %v1026_v29 }
  0xaa   :  { %v335_v43 = vadd.s32 %v334_v54, %v330_v56  ;;  %v1033_v24 = vshrl.u32 %v6240_v19, %v4110_v57  ;;  %v4128_v25 = vand.u32 31, %v869_v61  ;;  %v4133_v28 = vmul.f32 %v4005_v59, %v207_v6 }
  0xab   :  { %v1040_v32 = vor.u32 %v1039_v5, %v1038_v63  ;;  %v1043_v33 = vor.u32 %v1042_v3, %v1041_v2  ;;  %v1019_v34 = vand.u32 8388607, %v6237_v62  ;;  %vm1047_vm5 = vcmp.lt.s32.totalorder %v4120_v7, 4 }
  0xac   :  { %v336_v10 = vadd.s32 536870912, %v335_v43  ;;  %6313 = vst [vmem:[#allocation8_spill] sm:$0xff] %v4128_v25  ;;  %v4138_v35 = vsub.s32 32, %v406_v9  ;;  %v1035_v36 = vshll.u32 %v6240_v19, %v1026_v29  ;;  %v1036_v37 = vshrl.u32 %v6243_v22, %v4110_v57 }
  0xad   :  { %6314 = vst [vmem:[#allocation9_spill] sm:$0xff] %v4133_v28  ;;  %v4143_v38 = vshrl.u32 %v869_v61, 5  ;;  %v3236_v39 = vadd.s32 4294967169, %v551_v15  ;;  %v4145_v40 = vor.u32 %v1030_v18, %v1029_v13  ;;  %v4147_v42 = vor.u32 %v1033_v24, %v1032_v20 }
  0xae   :  { %v4130_v26 = vshrl.u32 %v336_v10, 30  ;;  %v4150_v17 = vsub.s32 32, %v4128_v25  ;;  %v705_v45 = vand.u32 2139095040, %v4133_v28  ;;  %vm1044_vm6 = vcmp.lt.s32.totalorder %v4120_v7, 1 }
  0xaf   :  { %6315 = vst [vmem:[#allocation10_spill] sm:$0xff] %v4143_v38  ;;  %v883_v47 = vshll.u32 %v6243_v22, %v4128_v25  ;;  %v1053_v48 = vsel %vm1047_vm5, %v1040_v32, 920167782  ;;  %v1057_v4 = vsel %vm1047_vm5, %v1043_v33, 1326507024  ;;  %v1020_v16 = vor.u32 8388608, %v1019_v34 }
  0xb0   :  { %6316 = vst [vmem:[#allocation11_spill] sm:$0xff] %v4150_v17  ;;  %v338_v44 = vshll.u32 %v4130_v26, 30  ;;  %v4161_v31 = vshrl.u32 %v404_v60, 5  ;;  %v419_v50 = vshrl.u32 %v6247_v11, %v4138_v35  ;;  %v422_v8 = vshrl.u32 %v6245_v27, %v4138_v35 }
  0xb1   :  { %v4167_v51 = vor.u32 %v1036_v37, %v1035_v36  ;;  %v557_v52 = vadd.s32 1, %v3236_v39  ;;  %vm1045_vm7 = vcmp.lt.s32.totalorder %v4120_v7, 2  ;;  %vm1046_vm8 = vcmp.lt.s32.totalorder %v4120_v7, 3 }
  0xb2   :  { %v1052_v53 = vsel %vm1044_vm6, %v4145_v40, %v4147_v42  ;;  %v4175_v29 = vsub.s32 %v335_v43, %v338_v44  ;;  %v706_v54 = vshrl.u32 %v705_v45, 23  ;;  %v418_v56 = vshll.u32 %v6243_v22, %v406_v9 }
  0xb3   :  { %v421_v58 = vshll.u32 %v6247_v11, %v406_v9  ;;  %v6236_v60 = vand.u32 2147483647, %v4079_v21  ;;  %v410_v61 = vshrl.u32 %v6238_v14, %v4138_v35  ;;  %v413_v10 = vshrl.u32 %v6240_v19, %v4138_v35 }
  0xb4   :  { %v416_v63 = vshrl.u32 %v6243_v22, %v4138_v35  ;;  %v420_v5 = vor.u32 %v419_v50, %v418_v56  ;;  %vm427_vm9 = vcmp.lt.s32.totalorder %v4161_v31, 4  ;;  %v1054_v43 = vsel %vm1046_vm8, %v4167_v51, %v1053_v48 }
  0xb5   :  { %v423_v2 = vor.u32 %v422_v8, %v421_v58  ;;  %v1056_v3 = vsel %vm1044_vm6, %v4147_v42, %v4167_v51  ;;  %v409_v6 = vshll.u32 %v6249_v12, %v406_v9  ;;  %v412_v13 = vshll.u32 %v6238_v14, %v406_v9 }
  0xb6   :  { %v415_v15 = vshll.u32 %v6240_v19, %v406_v9  ;;  %vm340_vm10 = vcmp.lt.s32.totalorder %v4175_v29, 0  ;;  %v341_v18 = vsub.s32 0, %v4175_v29  ;;  %v1058_v20 = vsel %vm1046_vm8, %v1040_v32, %v1057_v4 }
  0xb7   :  { %v4201_v24 = vshll.u32 %v1020_v16, 8  ;;  %v399_v33 = vand.u32 8388607, %v6236_v60  ;;  %v4205_v34 = vor.u32 %v410_v61, %v409_v6  ;;  %v4207_v36 = vor.u32 %v413_v10, %v412_v13  ;;  %v227_v13 = vpop.permute.xlu1 %226 }
  0xb8   :  { %v4209_v37 = vor.u32 %v416_v63, %v415_v15  ;;  %v884_v9 = vshrl.u32 %v6247_v11, %v4150_v17  ;;  %v4215_v39 = vshll.u32 %v6247_v11, %v4128_v25  ;;  %v433_v32 = vsel %vm427_vm9, %v420_v5, 920167782 }
  0xb9   :  { %v4221_v44 = vsel %vm1045_vm7, %v1052_v53, %v1054_v43  ;;  %vm558_vm11 = vcmp.gt.s32.totalorder %v557_v52, 0  ;;  %v3239_v45 = vadd.s32 4294967169, %v706_v54  ;;  %v437_v48 = vsel %vm427_vm9, %v423_v2, 1326507024 }
  0xba   :  { %v4227_v4 = vsel %vm1045_vm7, %v1056_v3, %v1058_v20  ;;  %v342_v16 = vsel %vm340_vm10, %v341_v18, %v4175_v29  ;;  %v1061_v50 = vand.u32 65535, %v4201_v24  ;;  %vm424_vm12 = vcmp.lt.s32.totalorder %v4161_v31, 1  ;;  %v222_v20 = vpop.permute.xlu0 %221 }
  0xbb   :  { %vm426_vm13 = vcmp.lt.s32.totalorder %v4161_v31, 3  ;;  %v1086_v8 = vshrl.u32 %v4221_v44, 16  ;;  %v400_v53 = vor.u32 8388608, %v399_v33  ;;  %v432_v54 = vsel %vm424_vm12, %v4205_v34, %v4207_v36 }
  0xbc   :  { %v434_v56 = vsel %vm426_vm13, %v4209_v37, %v433_v32  ;;  %v4245_v58 = vshrl.u32 %v6245_v27, %v4150_v17  ;;  %v1064_v61 = vshrl.u32 %v4227_v4, 16  ;;  %v436_v10 = vsel %vm424_vm12, %v4207_v36, %v4209_v37 }
  0xbd   :  { %v438_v63 = vsel %vm426_vm13, %v420_v5, %v437_v48  ;;  %v4254_v2 = vor.u32 %v884_v9, %v883_v47  ;;  %vm892_vm14 = vcmp.lt.s32.totalorder %v4143_v38, 4  ;;  %v559_v43 = vsel %vm558_vm11, %v557_v52, 0 }
  0xbe   :  { %vm425_vm15 = vcmp.lt.s32.totalorder %v4161_v31, 2  ;;  %v343_v3 = vclz %v342_v16  ;;  %v712_v6 = vadd.s32 1, %v3239_v45  ;;  %v1062_v15 = vshrl.u32 %v4201_v24, 16 }
  0xbf   :  { %6317 = vst [vmem:[#allocation12_spill] sm:$0xff] %v4254_v2  ;;  %v4262_v18 = vsel %vm425_vm15, %v432_v54, %v434_v56  ;;  %v1085_v5 = vand.u32 65535, %v4221_v44  ;;  %v4265_v47 = vmul.u32 %v1086_v8, %v1061_v50  ;;  %v4269_v33 = vsel %vm425_vm15, %v436_v10, %v438_v63 }
  0xc0   :  { %v4271_v52 = vshll.u32 %v400_v53, 8  ;;  %v4275_v32 = vand.u32 31, %v559_v43  ;;  %v1063_v45 = vand.u32 65535, %v4227_v4  ;;  %v4278_v48 = vmul.u32 %v1064_v61, %v1061_v50 }
  0xc1   :  { %v4283_v44 = vsel %vm892_vm14, %v4254_v2, 920167782  ;;  %v4285_v16 = vshrl.u32 %v559_v43, 5  ;;  %v4288_v54 = vmul.f32 %v4005_v59, %v227_v13  ;;  %v6251_v53 = vshrl.u32 %v4262_v18, 16 }
  0xc2   :  { %6318 = vst [vmem:[#allocation13_spill] sm:$0xff] %v4275_v32  ;;  %v3231_v56 = vadd.s32 4294967294, %v343_v3  ;;  %vm713_vm0 = vcmp.gt.s32.totalorder %v712_v6, 0  ;;  %v4292_v10 = vmul.f32 %v4005_v59, %v222_v20  ;;  %v6256_v4 = vshrl.u32 %v4269_v33, 16 }
  0xc3   :  { %6319 = vst [vmem:[#allocation14_spill] sm:$0xff] %v4283_v44  ;;  %v1087_v63 = vmul.u32 %v1085_v5, %v1061_v50  ;;  %v4295_v60 = vmul.u32 %v1085_v5, %v1062_v15  ;;  %v1091_v62 = vshll.u32 %v4265_v47, 16  ;;  %v441_v43 = vand.u32 65535, %v4271_v52 }
  0xc4   :  { %6320 = vst [vmem:[#allocation15_spill] sm:$0xff] %v4288_v54  ;;  %v4300_v14 = vsub.s32 32, %v4275_v32  ;;  %v1065_v13 = vmul.u32 %v1063_v45, %v1061_v50  ;;  %v4302_v19 = vmul.u32 %v1063_v45, %v1062_v15  ;;  %v1069_v3 = vshll.u32 %v4278_v48, 16 }
  0xc5   :  { %6321 = vst [vmem:[#allocation16_spill] sm:$0xff] %v4292_v10  ;;  %v4307_v59 = vshll.u32 %v6243_v22, %v4275_v32  ;;  %v4311_v20 = vshll.u32 %v6247_v11, %v4275_v32  ;;  %v4313_v5 = vsel %vm713_vm0, %v712_v6, 0  ;;  %v4317_v1 = vmul.u32 %v6251_v53, %v441_v43 }
  0xc6   :  { %vm3232_vm1 = vcmp.lt.s32.totalorder %v3231_v56, 0  ;;  %v1325_v50 = vand.u32 2139095040, %v4288_v54  ;;  %v1170_v45 = vand.u32 2139095040, %v4292_v10  ;;  %v4323_v9 = vmul.u32 %v6256_v4, %v441_v43 }
  0xc7   :  { %vm1095_vm2 = vc.u32 %v1087_v63, %v1091_v62  ;;  %v4326_v27 = vadd.s32 %v1091_v62, %v1087_v63  ;;  %v465_v6 = vand.u32 65535, %v4262_v18  ;;  %v1071_v11 = vshll.u32 %v4302_v19, 16 }
  0xc8   :  { %vm1073_vm3 = vc.u32 %v1065_v13, %v1069_v3  ;;  %v1075_v12 = vadd.s32 %v1069_v3, %v1065_v13  ;;  %v443_v53 = vand.u32 65535, %v4269_v33  ;;  %v4331_v0 = vsel %vm3232_vm1, 0, %v3231_v56 }
  0xc9   :  { %v1090_v54 = vmul.u32 %v1086_v8, %v1062_v15  ;;  %v442_v44 = vshrl.u32 %v4271_v52, 16  ;;  %v471_v4 = vshll.u32 %v4317_v1, 16  ;;  %v1171_v2 = vshrl.u32 %v1170_v45, 23 }
  0xca   :  { %v1068_v22 = vmul.u32 %v1064_v61, %v1062_v15  ;;  %v6322_v17 = vmov 0   ;;  %v449_v63 = vshll.u32 %v4323_v9, 16  ;;  %v6323_v21 = vshll.u32 %v4295_v60, 16 }
  0xcb   :  { %v1096_v62 = vsel %vm1095_vm2, 1, %v6322_v17  ;;  %v1074_v25 = vsel %vm1073_vm3, 1, %v6322_v17  ;;  %v467_v13 = vmul.u32 %v465_v6, %v441_v43  ;;  %v4341_v56 = vmul.u32 %v465_v6, %v442_v44 }
  0xcc   :  { %vm1099_vm4 = vc.u32 %v4326_v27, %v6323_v21  ;;  %v351_v8 = vsub.s32 4294967266, %v4331_v0  ;;  %vm1077_vm10 = vc.u32 %v1075_v12, %v1071_v11  ;;  %v445_v3 = vmul.u32 %v443_v53, %v441_v43 }
  0xcd   :  { %v4344_v23 = vmul.u32 %v443_v53, %v442_v44  ;;  %v4347_v61 = vand.u32 31, %v4313_v5  ;;  %v1098_v15 = vadd.s32 %v1096_v62, %v1090_v54  ;;  %vm475_vm11 = vc.u32 %v467_v13, %v471_v4 }
  0xce   :  { %v4349_v45 = vadd.s32 %v471_v4, %v467_v13  ;;  %v1076_v32 = vadd.s32 %v1074_v25, %v1068_v22  ;;  %v1100_v30 = vsel %vm1099_vm4, 1, %v6322_v17  ;;  %vm453_vm0 = vc.u32 %v445_v3, %v449_v63 }
  0xcf   :  { %v455_v21 = vadd.s32 %v449_v63, %v445_v3  ;;  %v1326_v6 = vshrl.u32 %v1325_v50, 23  ;;  %v3248_v55 = vadd.s32 4294967169, %v1171_v2  ;;  %v1078_v28 = vsel %vm1077_vm10, 1, %v6322_v17 }
  0xd0   :  { %v6276_v12 = vshll.u32 %v4341_v56, 16  ;;  %v352_v11 = vadd.s32 127, %v351_v8  ;;  %v1092_v53 = vshrl.u32 %v4265_v47, 16  ;;  %v451_v43 = vshll.u32 %v4344_v23, 16 }
  0xd1   :  { %v476_v54 = vsel %vm475_vm11, 1, %v6322_v17  ;;  %v1102_v4 = vadd.s32 %v1100_v30, %v1098_v15  ;;  %v454_v22 = vsel %vm453_vm0, 1, %v6322_v17  ;;  %v6324_v25 = vshrl.u32 %v4262_v18, 16 }
  0xd2   :  { %vm479_vm1 = vc.u32 %v4349_v45, %v6276_v12  ;;  %v1070_v2 = vshrl.u32 %v4278_v48, 16  ;;  %v1080_v50 = vadd.s32 %v1078_v28, %v1076_v32  ;;  %v6325_v63 = vshrl.u32 %v4269_v33, 16 }
  0xd3   :  { %v470_v62 = vmul.u32 %v6324_v25, %v442_v44  ;;  %vm457_vm2 = vc.u32 %v455_v21, %v451_v43  ;;  %v331_v13 = vadd.s32 %v4100_v49, %v4092_v46  ;;  %v347_v30 = vsub.s32 32, %v4331_v0 }
  0xd4   :  { %v448_v47 = vmul.u32 %v6325_v63, %v442_v44  ;;  %v3251_v8 = vadd.s32 4294967169, %v1326_v6  ;;  %v1177_v18 = vadd.s32 1, %v3248_v55  ;;  %v6326_v15 = vmov 683565275  }
  0xd5   :  { %v478_v3 = vadd.s32 %v476_v54, %v470_v62  ;;  %v1028_v25 = vshrl.u32 %v6326_v15, %v4110_v57  ;;  %v480_v12 = vsel %vm479_vm1, 1, %v6322_v17  ;;  %v353_v48 = vshll.u32 %v352_v11, 23 }
  0xd6   :  { %v456_v10 = vadd.s32 %v454_v22, %v448_v47  ;;  %v1094_v28 = vshrl.u32 %v4295_v60, 16  ;;  %v1103_v33 = vadd.s32 %v1102_v4, %v1092_v53  ;;  %v458_v32 = vsel %vm457_vm2, 1, %v6322_v17 }
  0xd7   :  { %v6327_v44 = vmov 920167782   ;;  %v6328_v49 = vmov 1326507024   ;;  %v1072_v55 = vshrl.u32 %v4302_v19, 16  ;;  %v1081_v6 = vadd.s32 %v1080_v50, %v1070_v2 }
  0xd8   :  { %v574_v46 = vshrl.u32 %v6327_v44, %v4300_v14  ;;  %v4378_v21 = vshrl.u32 %v6328_v49, %v4300_v14  ;;  %v349_v57 = vshrl.u32 %v331_v13, %v347_v30  ;;  %v4382_v43 = vsub.s32 32, %v4347_v61 }
  0xd9   :  { %v1049_v11 = vsel %vm1047_vm5, %v4167_v51, 2102212464  ;;  %v482_v53 = vadd.s32 %v480_v12, %v478_v3  ;;  %v1332_v54 = vadd.s32 1, %v3251_v8  ;;  %vm1178_vm3 = vcmp.gt.s32.totalorder %v1177_v18, 0 }
  0xda   :  { %v1048_v4 = vsel %vm1044_vm6, %v1028_v25, %v4145_v40  ;;  %v460_v22 = vadd.s32 %v458_v32, %v456_v10  ;;  %v348_v19 = vshll.u32 %v4175_v29, %v4331_v0  ;;  %v354_v62 = vor.u32 4788187, %v353_v48 }
  0xdb   :  { %v1104_v2 = vadd.s32 %v1103_v33, %v1094_v28  ;;  %v472_v50 = vshrl.u32 %v4317_v1, 16  ;;  %v1050_v63 = vsel %vm1046_vm8, %v4147_v42, %v1049_v11  ;;  %v4396_v51 = vadd.s32 %v1081_v6, %v1072_v55 }
  0xdc   :  { %v6329_v12 = vshll.u32 %v4295_v60, 16  ;;  %v450_v40 = vshrl.u32 %v4323_v9, 16  ;;  %vm582_vm5 = vcmp.lt.s32.totalorder %v4285_v16, 4  ;;  %v350_v0 = vor.u32 %v349_v57, %v348_v19 }
  0xdd   :  { %v4406_v29 = vshrl.u32 %v4313_v5, 5  ;;  %v6330_v1 = vmov 2102212464   ;;  %v483_v13 = vadd.s32 %v482_v53, %v472_v50  ;;  %v729_v42 = vshrl.u32 %v6327_v44, %v4382_v43 }
  0xde   :  { %v4401_v47 = vadd.s32 %v4326_v27, %v6329_v12  ;;  %v728_v10 = vshll.u32 %v6330_v1, %v4347_v61  ;;  %v731_v60 = vshll.u32 %v6327_v44, %v4347_v61  ;;  %v1179_v27 = vsel %vm1178_vm3, %v1177_v18, 0 }
  0xdf   :  { %v461_v30 = vadd.s32 %v460_v22, %v450_v40  ;;  %v355_v9 = vand.u32 2147483647, %v354_v62  ;;  %v1051_v8 = vsel %vm1045_vm7, %v1048_v4, %v1050_v63  ;;  %v1108_v3 = vadd.s32 1, %v1104_v2 }
  0xe0   :  { %v474_v5 = vshrl.u32 %v4341_v56, 16  ;;  %v732_v25 = vshrl.u32 %v6328_v49, %v4382_v43  ;;  %vm1333_vm6 = vcmp.gt.s32.totalorder %v1332_v54, 0  ;;  %vm1107_vm8 = vc.u32 %v4396_v51, %v4401_v47 }
  0xe1   :  { %v452_v48 = vshrl.u32 %v4344_v23, 16  ;;  %v357_v28 = vcvt.s32.f32 %v350_v0  ;;  %v4423_v33 = vand.u32 31, %v1179_v27  ;;  %v429_v7 = vsel %vm427_vm9, %v4209_v37, 2102212464 }
  0xe2   :  { %v484_v18 = vadd.s32 %v483_v13, %v474_v5  ;;  %v4429_v32 = vor.u32 %v574_v46, %v4307_v59  ;;  %v1105_v55 = vmul.u32 %v4201_v24, %v1051_v8  ;;  %v408_v6 = vshrl.u32 %v6326_v15, %v4138_v35  ;;  %v6339_v5 = vld [vmem:[#allocation16_spill] sm:$0xff] }
  0xe3   :  { %v4434_v57 = vadd.s32 %v461_v30, %v452_v48  ;;  %v578_v23 = vor.u32 %v4378_v21, %v4311_v20  ;;  %v358_v11 = vmul.f32 %v357_v28, %v355_v9  ;;  %v1334_v53 = vsel %vm1333_vm6, %v1332_v54, 0 }
  0xe4   :  { %v1109_v4 = vsel %vm1107_vm8, %v1108_v3, %v1104_v2  ;;  %v4438_v22 = vor.u32 %v729_v42, %v728_v10  ;;  %v428_v37 = vsel %vm424_vm12, %v408_v6, %v4205_v34  ;;  %v430_v24 = vsel %vm426_vm13, %v4207_v36, %v429_v7 }
  0xe5   :  { %v6331_v35 = vshll.u32 %v4341_v56, 16  ;;  %v733_v46 = vor.u32 %v732_v25, %v731_v60  ;;  %vm737_vm7 = vcmp.lt.s32.totalorder %v4406_v29, 4  ;;  %v4453_v20 = vsub.s32 32, %v4423_v33 }
  0xe6   :  { %v488_v21 = vadd.s32 1, %v484_v18  ;;  %v6332_v54 = vor.u32 %v4245_v58, %v4215_v39  ;;  %v4462_v36 = vand.u32 31, %v1334_v53  ;;  %v4464_v56 = vadd.s32 %v1109_v4, %v1105_v55 }
  0xe7   :  { %v4449_v59 = vadd.s32 %v4349_v45, %v6331_v35  ;;  %v6335_v45 = vand.u32 2147483647, %v4008_v41  ;;  %vm239_vm13 = vcmp.lt.s32.totalorder %v4008_v41, 0  ;;  %v359_v39 = vxor.u32 2147483648, %v358_v11 }
  0xe8   :  { %v4460_v34 = vsel %vm892_vm14, %v6332_v54, 1326507024  ;;  %6334 = vst [vmem:[#allocation18_spill] sm:$0xff] %v4462_v36  ;;  %v431_v58 = vsel %vm425_vm15, %v428_v37, %v430_v24  ;;  %v4480_v62 = vsel %vm582_vm5, %v4429_v32, 920167782  ;;  %v361_v63 = vsub.s32 4, %v4130_v26 }
  0xe9   :  { %6333 = vst [vmem:[#allocation17_spill] sm:$0xff] %v4460_v34  ;;  %vm487_vm9 = vc.u32 %v4434_v57, %v4449_v59  ;;  %vm4470_vm12 = vcmp.le.f32.partialorder %v6335_v45, 0.7853982  ;;  %v4484_v2 = vsel %vm582_vm5, %v578_v23, 1326507024  ;;  %v1197_v12 = vshrl.u32 %v6328_v49, %v4453_v20 }
  0xea   :  { %v4489_v50 = vsel %vm737_vm7, %v4438_v22, 920167782  ;;  %v4494_v31 = vsel %vm737_vm7, %v733_v46, 1326507024  ;;  %v489_v40 = vsel %vm487_vm9, %v488_v21, %v484_v18  ;;  %v4499_v0 = vsub.s32 32, %v4462_v36 }
  0xeb   :  { %v1194_v10 = vshrl.u32 %v6327_v44, %v4453_v20  ;;  %v1111_v13 = vadd.s32 536870912, %v4464_v56  ;;  %v485_v42 = vmul.u32 %v4271_v52, %v431_v58  ;;  %v360_v60 = vsel %vm239_vm13, %v359_v39, %v358_v11 }
  0xec   :  { %6338 = vst [vmem:[#allocation19_spill] sm:$0xff] %v4499_v0  ;;  %v4507_v30 = vshrl.u32 %v1179_v27, 5  ;;  %v1193_v9 = vshll.u32 %v6330_v1, %v4423_v33  ;;  %v1196_v8 = vshll.u32 %v6327_v44, %v4423_v33  ;;  %v6277_v25 = vand.u32 2147483647, %v6339_v5 }
  0xed   :  { %v4513_v3 = vadd.s32 %v489_v40, %v485_v42  ;;  %v6340_v48 = vmov 2131351028   ;;  %v1191_v52 = vshrl.u32 %v6330_v1, %v4453_v20  ;;  %v4523_v27 = vsel %vm239_vm13, %v361_v63, %v4130_v26  ;;  %v6344_v40 = vld [vmem:[#allocation9_spill] sm:$0xff] }
  0xee   :  { %v1188_v28 = vshrl.u32 %v6340_v48, %v4453_v20  ;;  %v4525_v7 = vshrl.u32 %v1334_v53, 5  ;;  %v1348_v18 = vshll.u32 %v6330_v1, %v4462_v36  ;;  %v1198_v55 = vor.u32 %v1197_v12, %v1196_v8 }
  0xef   :  { %v1195_v6 = vor.u32 %v1194_v10, %v1193_v9  ;;  %v4529_v23 = vshrl.u32 %v1111_v13, 30  ;;  %v6342_v11 = vmov 2475754826   ;;  %v1190_v37 = vshll.u32 %v6340_v48, %v4423_v33 }
  0xf0   :  { %6341 = vst [vmem:[#allocation20_spill] sm:$0xff] %v4525_v7  ;;  %v1187_v4 = vshll.u32 %v6342_v11, %v4423_v33  ;;  %v4538_v26 = vsel %vm4470_vm12, %v4008_v41, %v360_v60  ;;  %v1349_v53 = vshrl.u32 %v6327_v44, %v4499_v0  ;;  %v4544_v24 = vshll.u32 %v6327_v44, %v4462_v36 }
  0xf1   :  { %6343 = vst [vmem:[#allocation21_spill] sm:$0xff] %v4538_v26  ;;  %vm1202_vm15 = vcmp.lt.s32.totalorder %v4507_v30, 4  ;;  %v491_v35 = vadd.s32 536870912, %v4513_v3  ;;  %v1174_v46 = vand.u32 8388607, %v6277_v25  ;;  %v4552_v54 = vor.u32 %v1191_v52, %v1190_v37 }
  0xf2   :  { %v4550_v21 = vor.u32 %v1188_v28, %v1187_v4  ;;  %v364_v45 = vsel %vm4470_vm12, 0, %v4523_v27  ;;  %v4559_v39 = vshrl.u32 %v6328_v49, %v4499_v0  ;;  %v1212_v44 = vsel %vm1202_vm15, %v1198_v55, 1326507024 }
  0xf3   :  { %v1185_v58 = vshrl.u32 %v6342_v11, %v4453_v20  ;;  %v4567_v63 = vmul.f32 %v4538_v26, %v4538_v26  ;;  %v1208_v12 = vsel %vm1202_vm15, %v1195_v6, 920167782  ;;  %v1113_v19 = vshll.u32 %v4529_v23, 30 }
  0xf4   :  { %v6278_v10 = vand.u32 2147483647, %v6344_v40  ;;  %v1184_v49 = vshll.u32 %v6326_v15, %v4423_v33  ;;  %vm1199_vm4 = vcmp.lt.s32.totalorder %v4507_v30, 1  ;;  %vm1201_vm10 = vcmp.lt.s32.totalorder %v4507_v30, 3 }
  0xf5   :  { %v719_v13 = vshll.u32 %v6326_v15, %v4347_v61  ;;  %v4579_v42 = vshrl.u32 %v491_v35, 30  ;;  %v1175_v60 = vor.u32 8388608, %v1174_v46  ;;  %v1211_v9 = vsel %vm1199_vm4, %v4550_v21, %v4552_v54 }
  0xf6   :  { %v1213_v8 = vsel %vm1201_vm10, %v1195_v6, %v1212_v44  ;;  %v4587_v28 = vor.u32 %v1185_v58, %v1184_v49  ;;  %v709_v33 = vand.u32 8388607, %v6278_v10  ;;  %v720_v52 = vshrl.u32 %v6342_v11, %v4382_v43 }
  0xf7   :  { %6345 = vst [vmem:[#allocation22_spill] sm:$0xff] %v4579_v42  ;;  %v722_v27 = vshll.u32 %v6342_v11, %v4347_v61  ;;  %vm6296_vm11 = vcmp.lt.s32.totalorder %v4525_v7, 4  ;;  %vm1200_vm0 = vcmp.lt.s32.totalorder %v4507_v30, 2  ;;  %v723_v55 = vshrl.u32 %v6340_v48, %v4382_v43 }
  0xf8   :  { %v725_v6 = vshll.u32 %v6340_v48, %v4347_v61  ;;  %v726_v4 = vshrl.u32 %v6330_v1, %v4382_v43  ;;  %v373_v37 = vmul.f32 -0.00019511016, %v4567_v63  ;;  %v4606_v35 = vsel %vm1200_vm0, %v1211_v9, %v1213_v8 }
  0xf9   :  { %v710_v46 = vor.u32 8388608, %v709_v33  ;;  %v4608_v44 = vor.u32 %v720_v52, %v719_v13  ;;  %v493_v58 = vshll.u32 %v4579_v42, 30  ;;  %v4611_v49 = vor.u32 %v723_v55, %v722_v27 }
  0xfa   :  { %v4613_v25 = vor.u32 %v726_v4, %v725_v6  ;;  %vm734_vm1 = vcmp.lt.s32.totalorder %v4406_v29, 1  ;;  %v4616_v61 = vor.u32 %v1349_v53, %v1348_v18  ;;  %v4619_v10 = vsub.s32 %v4464_v56, %v1113_v19 }
  0xfb   :  { %v4621_v41 = vshll.u32 %v1175_v60, 8  ;;  %vm736_vm2 = vcmp.lt.s32.totalorder %v4406_v29, 3  ;;  %v1207_v13 = vsel %vm1199_vm4, %v4587_v28, %v4550_v21  ;;  %v1209_v9 = vsel %vm1201_vm10, %v4552_v54, %v1208_v12 }
  0xfc   :  { %6346 = vst [vmem:[#allocation23_spill] sm:$0xff] %v4616_v61  ;;  %vm735_vm3 = vcmp.lt.s32.totalorder %v4406_v29, 2  ;;  %v4632_v18 = vshll.u32 %v710_v46, 8  ;;  %v6281_v56 = vshrl.u32 %v4606_v35, 16  ;;  %v742_v53 = vsel %vm734_vm1, %v4608_v44, %v4611_v49 }
  0xfd   :  { %v744_v19 = vsel %vm736_vm2, %v4613_v25, %v4489_v50  ;;  %v746_v12 = vsel %vm734_vm1, %v4611_v49, %v4613_v25  ;;  %v374_v60 = vadd.f32 0.008332121, %v373_v37  ;;  %v1353_v8 = vor.u32 %v4559_v39, %v4544_v24  ;;  %v6347_v24 = vld [vmem:[#allocation4_spill] sm:$0xff] }
  0xfe   :  { %v4650_v33 = vsub.s32 %v4513_v3, %v493_v58  ;;  %v748_v52 = vsel %vm736_vm2, %v4438_v22, %v4494_v31  ;;  %v1116_v27 = vsub.s32 0, %v4619_v10  ;;  %v4659_v50 = vsel %vm1200_vm0, %v1207_v13, %v1209_v9 }
  0xff   :  { %v1216_v55 = vand.u32 65535, %v4621_v41  ;;  %v749_v6 = vsel %vm735_vm3, %v746_v12, %v748_v52  ;;  %vm1014_vm6 = vcmp.lt.s32.totalorder %v6347_v24, 0  ;;  %v745_v3 = vsel %vm735_vm3, %v742_v53, %v744_v19 }
 0x100   :  { %v751_v39 = vand.u32 65535, %v4632_v18  ;;  %v753_v4 = vand.u32 65535, %v749_v6  ;;  %v754_v22 = vshrl.u32 %v749_v6, 16  ;;  %v4668_v31 = vadd.s32 3, %v364_v45 }
 0x101   :  { %v4673_v37 = vsel %vm6296_vm11, %v4616_v61, 920167782  ;;  %vm1115_vm8 = vcmp.lt.s32.totalorder %v4619_v10, 0  ;;  %v4678_v46 = vmul.u32 %v6281_v56, %v1216_v55  ;;  %v496_v58 = vsub.s32 0, %v4650_v33 }
 0x102   :  { %6348 = vst [vmem:[#allocation24_spill] sm:$0xff] %v4668_v31  ;;  %v752_v9 = vshrl.u32 %v4632_v18, 16  ;;  %v4683_v53 = vmul.u32 %v754_v22, %v751_v39  ;;  %v375_v45 = vmul.f32 %v374_v60, %v4567_v63  ;;  %vm495_vm9 = vcmp.lt.s32.totalorder %v4650_v33, 0 }
 0x103   :  { %6349 = vst [vmem:[#allocation25_spill] sm:$0xff] %v4673_v37  ;;  %v1218_v19 = vand.u32 65535, %v4606_v35  ;;  %v776_v12 = vshrl.u32 %v745_v3, 16  ;;  %v1117_v52 = vsel %vm1115_vm8, %v1116_v27, %v4619_v10  ;;  %v755_v6 = vmul.u32 %v753_v4, %v751_v39 }
 0x104   :  { %v4689_v56 = vmul.u32 %v753_v4, %v752_v9  ;;  %v759_v5 = vshll.u32 %v4683_v53, 16  ;;  %v4694_v13 = vsel %vm6296_vm11, %v1353_v8, 1326507024  ;;  %v1136_v40 = vsub.s32 4, %v4529_v23 }
 0x105   :  { %6350 = vst [vmem:[#allocation26_spill] sm:$0xff] %v4694_v13  ;;  %v1217_v60 = vshrl.u32 %v4621_v41, 16  ;;  %v1224_v37 = vshll.u32 %v4678_v46, 16  ;;  %v497_v61 = vsel %vm495_vm9, %v496_v58, %v4650_v33  ;;  %v6351_v36 = vshrl.u32 %v4659_v50, 16 }
 0x106   :  { %vm763_vm12 = vc.u32 %v755_v6, %v759_v5  ;;  %v765_v4 = vadd.s32 %v759_v5, %v755_v6  ;;  %v376_v0 = vadd.f32 -0.16666654, %v375_v45  ;;  %v1118_v42 = vclz %v1117_v52 }
 0x107   :  { %v4702_v27 = vmul.u32 %v6351_v36, %v1216_v55  ;;  %v1220_v31 = vmul.u32 %v1218_v19, %v1216_v55  ;;  %v4704_v7 = vmul.u32 %v776_v12, %v751_v39  ;;  %v4708_v8 = vadd.s32 %v4401_v47, %v4396_v51 }
 0x108   :  { %v4710_v13 = vmul.u32 %v1218_v19, %v1217_v60  ;;  %v1240_v26 = vand.u32 65535, %v4659_v50  ;;  %v761_v58 = vshll.u32 %v4689_v56, 16  ;;  %v498_v34 = vclz %v497_v61 }
 0x109   :  { %vm1228_vm13 = vc.u32 %v1220_v31, %v1224_v37  ;;  %v764_v36 = vsel %vm763_vm12, 1, %v6322_v17  ;;  %v775_v5 = vand.u32 65535, %v745_v3  ;;  %v1230_v45 = vadd.s32 %v1224_v37, %v1220_v31 }
 0x10a   :  { %v1246_v52 = vshll.u32 %v4702_v27, 16  ;;  %v758_v6 = vmul.u32 %v754_v22, %v752_v9  ;;  %vm767_vm8 = vc.u32 %v765_v4, %v761_v58  ;;  %v4717_v38 = vmul.f32 %v376_v0, %v4567_v63 }
 0x10b   :  { %v4719_v51 = vadd.s32 4294967294, %v1118_v42  ;;  %v4724_v47 = vsel %vm1014_vm6, %v1136_v40, %v4529_v23  ;;  %v781_v61 = vshll.u32 %v4704_v7, 16  ;;  %v1226_v19 = vshll.u32 %v4710_v13, 16 }
 0x10c   :  { %6352 = vst [vmem:[#allocation27_spill] sm:$0xff] %v4717_v38  ;;  %v1242_v3 = vmul.u32 %v1240_v26, %v1216_v55  ;;  %v4728_v31 = vmul.u32 %v1240_v26, %v1217_v60  ;;  %v766_v37 = vadd.s32 %v764_v36, %v758_v6  ;;  %v1229_v22 = vsel %vm1228_vm13, 1, %v6322_v17 }
 0x10d   :  { %6353 = vst [vmem:[#allocation28_spill] sm:$0xff] %v4724_v47  ;;  %v768_v0 = vsel %vm767_vm8, 1, %v6322_v17  ;;  %v777_v4 = vmul.u32 %v775_v5, %v751_v39  ;;  %v779_v42 = vmul.u32 %v775_v5, %v752_v9  ;;  %v4732_v58 = vadd.s32 4294967294, %v498_v34 }
 0x10e   :  { %v6354_v38 = vshrl.u32 %v4606_v35, 16  ;;  %vm1232_vm9 = vc.u32 %v1230_v45, %v1226_v19  ;;  %v4736_v40 = vadd.s32 %v1246_v52, %v1242_v3  ;;  %vm1250_vm12 = vc.u32 %v1242_v3, %v1246_v52 }
 0x10f   :  { %v780_v47 = vmul.u32 %v776_v12, %v752_v9  ;;  %vm785_vm11 = vc.u32 %v777_v4, %v781_v61  ;;  %v787_v26 = vadd.s32 %v781_v61, %v777_v4  ;;  %v1248_v36 = vshll.u32 %v4728_v31, 16 }
 0x110   :  { %v1223_v23 = vmul.u32 %v6354_v38, %v1217_v60  ;;  %v770_v6 = vadd.s32 %v768_v0, %v766_v37  ;;  %v786_v24 = vsel %vm785_vm11, 1, %v6322_v17  ;;  %v1225_v39 = vshrl.u32 %v4678_v46, 16  ;;  %v6356_v46 = vld [vmem:[#allocation7_spill] sm:$0xff] }
 0x111   :  { %v1233_v34 = vsel %vm1232_vm9, 1, %v6322_v17  ;;  %v783_v5 = vshll.u32 %v779_v42, 16  ;;  %v788_v35 = vadd.s32 %v786_v24, %v780_v47  ;;  %v1227_v38 = vshrl.u32 %v4710_v13, 16 }
 0x112   :  { %v1231_v55 = vadd.s32 %v1229_v22, %v1223_v23  ;;  %v1251_v45 = vsel %vm1250_vm12, 1, %v6322_v17  ;;  %vm1254_vm13 = vc.u32 %v4736_v40, %v1248_v36  ;;  %v760_v9 = vshrl.u32 %v4683_v53, 16 }
 0x113   :  { %vm3235_vm8 = vcmp.lt.s32.totalorder %v4732_v58, 0  ;;  %v6355_v12 = vshrl.u32 %v4659_v50, 16  ;;  %vm789_vm11 = vc.u32 %v787_v26, %v783_v5  ;;  %v6299_v61 = vand.u32 2147483647, %v6356_v46 }
 0x114   :  { %v1235_v19 = vadd.s32 %v1233_v34, %v1231_v55  ;;  %v1247_v24 = vshrl.u32 %v4702_v27, 16  ;;  %v771_v47 = vadd.s32 %v770_v6, %v760_v9  ;;  %v790_v3 = vsel %vm789_vm11, 1, %v6322_v17  ;;  %v6357_v55 = vld [vmem:[#allocation13_spill] sm:$0xff] }
 0x115   :  { %v1245_v52 = vmul.u32 %v6355_v12, %v1217_v60  ;;  %v1255_v22 = vsel %vm1254_vm13, 1, %v6322_v17  ;;  %v782_v0 = vshrl.u32 %v4704_v7, 16  ;;  %v792_v53 = vadd.s32 %v790_v3, %v788_v35 }
 0x116   :  { %vm3247_vm9 = vcmp.lt.s32.totalorder %v4719_v51, 0  ;;  %v718_v50 = vshrl.u32 %v6326_v15, %v4382_v43  ;;  %v762_v60 = vshrl.u32 %v4689_v56, 16  ;;  %v784_v4 = vshrl.u32 %v779_v42, 16 }
 0x117   :  { %v1253_v37 = vadd.s32 %v1251_v45, %v1245_v52  ;;  %v554_v27 = vand.u32 8388607, %v6299_v61  ;;  %v793_v23 = vadd.s32 %v792_v53, %v782_v0  ;;  %v564_v6 = vshll.u32 %v6326_v15, %v6357_v55 }
 0x118   :  { %v565_v34 = vshrl.u32 %v6342_v11, %v4300_v14  ;;  %v567_v7 = vshll.u32 %v6342_v11, %v6357_v55  ;;  %v739_v43 = vsel %vm737_vm7, %v4613_v25, 2102212464  ;;  %v4771_v35 = vadd.s32 %v771_v47, %v762_v60 }
 0x119   :  { %v555_v56 = vor.u32 8388608, %v554_v27  ;;  %v568_v42 = vshrl.u32 %v6340_v48, %v4300_v14  ;;  %v794_v45 = vadd.s32 %v793_v23, %v784_v4  ;;  %v570_v12 = vshll.u32 %v6340_v48, %v6357_v55 }
 0x11a   :  { %v4775_v9 = vor.u32 %v565_v34, %v564_v6  ;;  %v571_v52 = vshrl.u32 %v6330_v1, %v4300_v14  ;;  %v1257_v3 = vadd.s32 %v1255_v22, %v1253_v37  ;;  %v738_v25 = vsel %vm734_vm1, %v718_v50, %v4608_v44 }
 0x11b   :  { %v4784_v47 = vor.u32 %v568_v42, %v567_v7  ;;  %vm579_vm7 = vcmp.lt.s32.totalorder %v4285_v16, 1  ;;  %v740_v0 = vsel %vm736_vm2, %v4611_v49, %v739_v43  ;;  %v4790_v53 = vadd.s32 %v787_v26, %v783_v5 }
 0x11c   :  { %v4792_v60 = vor.u32 %v571_v52, %v570_v12  ;;  %vm581_vm12 = vcmp.lt.s32.totalorder %v4285_v16, 3  ;;  %v798_v4 = vadd.s32 1, %v794_v45  ;;  %vm580_vm13 = vcmp.lt.s32.totalorder %v4285_v16, 2 }
 0x11d   :  { %v593_v44 = vsel %vm581_vm12, %v4429_v32, %v4484_v2  ;;  %v4800_v37 = vshll.u32 %v555_v56, 8  ;;  %vm797_vm1 = vc.u32 %v4771_v35, %v4790_v53  ;;  %v587_v49 = vsel %vm579_vm7, %v4775_v9, %v4784_v47 }
 0x11e   :  { %v589_v26 = vsel %vm581_vm12, %v4792_v60, %v4480_v62  ;;  %v591_v32 = vsel %vm579_vm7, %v4784_v47, %v4792_v60  ;;  %v4819_v2 = vsel %vm3235_vm8, 0, %v4732_v58  ;;  %v1236_v5 = vadd.s32 %v1235_v19, %v1225_v39 }
 0x11f   :  { %v1258_v22 = vadd.s32 %v1257_v3, %v1247_v24  ;;  %v741_v50 = vsel %vm735_vm3, %v738_v25, %v740_v0  ;;  %v1249_v27 = vshrl.u32 %v4728_v31, 16  ;;  %v594_v62 = vsel %vm580_vm13, %v591_v32, %v593_v44 }
 0x120   :  { %v596_v23 = vand.u32 65535, %v4800_v37  ;;  %v597_v55 = vshrl.u32 %v4800_v37, 16  ;;  %v799_v6 = vsel %vm797_vm1, %v798_v4, %v794_v45  ;;  %v590_v34 = vsel %vm580_vm13, %v587_v49, %v589_v26 }
 0x121   :  { %v598_v58 = vand.u32 65535, %v594_v62  ;;  %v599_v7 = vshrl.u32 %v594_v62, 16  ;;  %v1121_v29 = vsel %vm3247_vm9, 0, %v4719_v51  ;;  %v506_v39 = vsub.s32 4294967266, %v4819_v2 }
 0x122   :  { %v1183_v19 = vshrl.u32 %v6326_v15, %v4453_v20  ;;  %v795_v24 = vmul.u32 %v4632_v18, %v741_v50  ;;  %v1204_v43 = vsel %vm1202_vm15, %v4552_v54, 2102212464  ;;  %v4842_v56 = vadd.s32 %v1236_v5, %v1227_v38 }
 0x123   :  { %v1259_v42 = vadd.s32 %v1258_v22, %v1249_v27  ;;  %v601_v45 = vmul.u32 %v599_v7, %v596_v23  ;;  %v600_v51 = vmul.u32 %v598_v58, %v596_v23  ;;  %v4846_v52 = vmul.u32 %v598_v58, %v597_v55 }
 0x124   :  { %v4844_v12 = vadd.s32 %v799_v6, %v795_v24  ;;  %v621_v3 = vshrl.u32 %v590_v34, 16  ;;  %v1122_v25 = vsub.s32 32, %v1121_v29  ;;  %v1126_v20 = vsub.s32 4294967266, %v1121_v29 }
 0x125   :  { %v1203_v18 = vsel %vm1199_vm4, %v1183_v19, %v4587_v28  ;;  %v4854_v54 = vadd.s32 %v4736_v40, %v1248_v36  ;;  %v507_v13 = vadd.s32 127, %v506_v39  ;;  %v1205_v38 = vsel %vm1201_vm10, %v4550_v21, %v1204_v43 }
 0x126   :  { %v604_v0 = vshll.u32 %v601_v45, 16  ;;  %v606_v4 = vshll.u32 %v4846_v52, 16  ;;  %v1263_v44 = vadd.s32 1, %v1259_v42  ;;  %v603_v49 = vmul.u32 %v599_v7, %v597_v55 }
 0x127   :  { %vm1262_vm15 = vc.u32 %v4842_v56, %v4854_v54  ;;  %v620_v26 = vand.u32 65535, %v590_v34  ;;  %v801_v28 = vadd.s32 536870912, %v4844_v12  ;;  %v623_v40 = vmul.u32 %v621_v3, %v596_v23 }
 0x128   :  { %vm608_vm4 = vc.u32 %v600_v51, %v604_v0  ;;  %v610_v31 = vadd.s32 %v604_v0, %v600_v51  ;;  %v1123_v36 = vshll.u32 %v4619_v10, %v1121_v29  ;;  %v1127_v32 = vadd.s32 127, %v1126_v20 }
 0x129   :  { %v366_v5 = vmul.f32 -0.001358992, %v4567_v63  ;;  %v1206_v21 = vsel %vm1200_vm0, %v1203_v18, %v1205_v38  ;;  %v502_v22 = vsub.s32 32, %v4819_v2  ;;  %v508_v50 = vshll.u32 %v507_v13, 23 }
 0x12a   :  { %v609_v27 = vsel %vm608_vm4, 1, %v6322_v17  ;;  %vm612_vm10 = vc.u32 %v610_v31, %v606_v4  ;;  %v486_v62 = vadd.s32 %v4449_v59, %v4434_v57  ;;  %v1264_v6 = vsel %vm1262_vm15, %v1263_v44, %v1259_v42 }
 0x12b   :  { %v611_v10 = vadd.s32 %v609_v27, %v603_v49  ;;  %v624_v34 = vmul.u32 %v620_v26, %v597_v55  ;;  %v4874_v58 = vshrl.u32 %v801_v28, 30  ;;  %v613_v30 = vsel %vm612_vm10, 1, %v6322_v17  ;;  %v6363_v27 = vld [vmem:[#allocation27_spill] sm:$0xff] }
 0x12c   :  { %v622_v7 = vmul.u32 %v620_v26, %v596_v23  ;;  %v626_v29 = vshll.u32 %v623_v40, 16  ;;  %v1124_v39 = vshrl.u32 %v4708_v8, %v1122_v25  ;;  %v1128_v19 = vshll.u32 %v1127_v32, 23 }
 0x12d   :  { %v1260_v24 = vmul.u32 %v4621_v41, %v1206_v21  ;;  %v615_v43 = vadd.s32 %v613_v30, %v611_v10  ;;  %v367_v51 = vadd.f32 0.041655596, %v366_v5  ;;  %v503_v57 = vshll.u32 %v4650_v33, %v4819_v2 }
 0x12e   :  { %v504_v59 = vshrl.u32 %v486_v62, %v502_v22  ;;  %v509_v42 = vor.u32 4788187, %v508_v50  ;;  %v605_v18 = vshrl.u32 %v601_v45, 16  ;;  %v625_v13 = vmul.u32 %v621_v3, %v597_v55  ;;  %v6362_v22 = vld [vmem:[#allocation6_spill] sm:$0xff] }
 0x12f   :  { %v4881_v20 = vadd.s32 %v1264_v6, %v1260_v24  ;;  %v628_v38 = vshll.u32 %v624_v34, 16  ;;  %v803_v23 = vshll.u32 %v4874_v58, 30  ;;  %v563_v8 = vshrl.u32 %v6326_v15, %v4300_v14 }
 0x130   :  { %vm630_vm0 = vc.u32 %v622_v7, %v626_v29  ;;  %v632_v25 = vadd.s32 %v626_v29, %v622_v7  ;;  %v1125_v41 = vor.u32 %v1124_v39, %v1123_v36  ;;  %v1129_v0 = vor.u32 4788187, %v1128_v19  ;;  %v6358_v36 = vld [vmem:[#allocation4_spill] sm:$0xff] }
 0x131   :  { %v584_v33 = vsel %vm582_vm5, %v4792_v60, 2102212464  ;;  %v616_v2 = vadd.s32 %v615_v43, %v605_v18  ;;  %v368_v4 = vmul.f32 %v367_v51, %v4567_v63  ;;  %v505_v44 = vor.u32 %v504_v59, %v503_v57  ;;  %v6366_v59 = vld [vmem:[#allocation8_spill] sm:$0xff]  ;;  %v6367_v18 = vld [vmem:[#allocation11_spill] sm:$0xff] }
 0x132   :  { %v510_v45 = vand.u32 2147483647, %v509_v42  ;;  %v631_v55 = vsel %vm630_vm0, 1, %v6322_v17  ;;  %v1266_v3 = vadd.s32 536870912, %v4881_v20  ;;  %v607_v49 = vshrl.u32 %v4846_v52, 16 }
 0x133   :  { %v633_v14 = vadd.s32 %v631_v55, %v625_v13  ;;  %vm634_vm2 = vc.u32 %v632_v25, %v628_v38  ;;  %v4894_v26 = vsub.s32 %v4844_v12, %v803_v23  ;;  %v583_v60 = vsel %vm579_vm7, %v563_v8, %v4775_v9  ;;  %v6369_v55 = vld [vmem:[#allocation17_spill] sm:$0xff] }
 0x134   :  { %v585_v28 = vsel %vm581_vm12, %v4784_v47, %v584_v33  ;;  %v635_v31 = vsel %vm634_vm2, 1, %v6322_v17  ;;  %v6359_v32 = vand.u32 2147483647, %v6358_v36  ;;  %v4909_v52 = vadd.s32 %v616_v2, %v607_v49  ;;  %v6368_v33 = vld [vmem:[#allocation10_spill] sm:$0xff] }
 0x135   :  { %v627_v12 = vshrl.u32 %v623_v40, 16  ;;  %v637_v21 = vadd.s32 %v635_v31, %v633_v14  ;;  %v6298_v50 = vand.u32 2147483647, %v6362_v22  ;;  %v378_v9 = vadd.f32 1.0, %v6363_v27 }
 0x136   :  { %vm4905_vm5 = vcmp.le.f32.partialorder %v6359_v32, 0.7853982  ;;  %v1130_v62 = vand.u32 2147483647, %v1129_v0  ;;  %v1132_v6 = vcvt.s32.f32 %v1125_v41  ;;  %v512_v10 = vcvt.s32.f32 %v505_v44 }
 0x137   :  { %v629_v47 = vshrl.u32 %v624_v34, 16  ;;  %v4913_v30 = vadd.s32 %v632_v25, %v628_v38  ;;  %v638_v7 = vadd.s32 %v637_v21, %v627_v12  ;;  %v864_v29 = vand.u32 8388607, %v6298_v50  ;;  %v6365_v34 = vld [vmem:[#allocation5_spill] sm:$0xff] }
 0x138   :  { %v369_v39 = vadd.f32 -0.4999988, %v368_v4  ;;  %v513_v19 = vmul.f32 %v512_v10, %v510_v45  ;;  %v4917_v24 = vshrl.u32 %v1266_v3, 30  ;;  %v586_v40 = vsel %vm580_vm13, %v583_v60, %v585_v28  ;;  %v6370_v3 = vld [vmem:[#allocation12_spill] sm:$0xff]  ;;  %v6374_v21 = vld [vmem:[#allocation21_spill] sm:$0xff] }
 0x139   :  { %vm805_vm3 = vcmp.lt.s32.totalorder %v4894_v26, 0  ;;  %v806_v43 = vsub.s32 0, %v4894_v26  ;;  %v639_v51 = vadd.s32 %v638_v7, %v629_v47  ;;  %vm642_vm8 = vc.u32 %v4909_v52, %v4913_v30 }
 0x13a   :  { %6364 = vst [vmem:[#allocation7_spill] sm:$0xff] %v4917_v24  ;;  %vm394_vm11 = vcmp.lt.s32.totalorder %v6365_v34, 0  ;;  %v865_v57 = vor.u32 8388608, %v864_v29  ;;  %v877_v42 = vshll.u32 %v6342_v11, %v6366_v59  ;;  %v878_v13 = vshrl.u32 %v6340_v48, %v6367_v18  ;;  %v6376_v29 = vld [vmem:[#allocation24_spill] sm:$0xff] }
 0x13b   :  { %v880_v16 = vshll.u32 %v6340_v48, %v6366_v59  ;;  %v640_v38 = vmul.u32 %v4800_v37, %v586_v40  ;;  %v643_v23 = vadd.s32 1, %v639_v51  ;;  %v874_v8 = vshll.u32 %v6326_v15, %v6366_v59 }
 0x13c   :  { %v881_v25 = vshrl.u32 %v6330_v1, %v6367_v18  ;;  %v875_v41 = vshrl.u32 %v6342_v11, %v6367_v18  ;;  %v4939_v0 = vor.u32 %v878_v13, %v877_v42  ;;  %vm889_vm9 = vcmp.lt.s32.totalorder %v6368_v33, 1 }
 0x13d   :  { %vm891_vm7 = vcmp.lt.s32.totalorder %v6368_v33, 3  ;;  %v1133_v2 = vmul.f32 %v1132_v6, %v1130_v62  ;;  %v807_v37 = vsel %vm805_vm3, %v806_v43, %v4894_v26  ;;  %v644_v4 = vsel %vm642_vm8, %v643_v23, %v639_v51  ;;  %v6375_v62 = vld [vmem:[#allocation28_spill] sm:$0xff] }
 0x13e   :  { %v4949_v44 = vor.u32 %v881_v25, %v880_v16  ;;  %v645_v45 = vadd.s32 %v644_v4, %v640_v38  ;;  %vm890_vm12 = vcmp.lt.s32.totalorder %v6368_v33, 2  ;;  %v903_v49 = vsel %vm891_vm7, %v6370_v3, %v6369_v55  ;;  %v6377_v25 = vld [vmem:[#allocation14_spill] sm:$0xff] }
 0x13f   :  { %v4956_v14 = vshll.u32 %v865_v57, 8  ;;  %v6371_v60 = vand.u32 2147483647, %v6365_v34  ;;  %v514_v31 = vxor.u32 2147483648, %v513_v19  ;;  %v1268_v32 = vshll.u32 %v4917_v24, 30 }
 0x140   :  { %v901_v12 = vsel %vm889_vm9, %v4939_v0, %v4949_v44  ;;  %v4970_v27 = vmul.f32 %v378_v9, %v6374_v21  ;;  %v1139_v6 = vsel %vm4905_vm5, 0, %v6375_v62  ;;  %v646_v10 = vadd.s32 536870912, %v645_v45  ;;  %v6378_v62 = vld [vmem:[#allocation22_spill] sm:$0xff] }
 0x141   :  { %vm4960_vm13 = vcmp.le.f32.partialorder %v6371_v60, 0.7853982  ;;  %v4975_v47 = vor.u32 %v875_v41, %v874_v8  ;;  %v370_v7 = vmul.f32 %v369_v39, %v4567_v63  ;;  %v4979_v40 = vand.u32 3, %v6376_v29 }
 0x142   :  { %v808_v43 = vclz %v807_v37  ;;  %v904_v51 = vsel %vm890_vm12, %v901_v12, %v903_v49  ;;  %v1134_v57 = vxor.u32 2147483648, %v1133_v2  ;;  %v4983_v59 = vshrl.u32 %v646_v10, 30 }
 0x143   :  { %v906_v9 = vand.u32 65535, %v4956_v14  ;;  %v4987_v42 = vshrl.u32 %v4956_v14, 16  ;;  %v515_v13 = vsel %vm394_vm11, %v514_v31, %v513_v19  ;;  %v4992_v63 = vsub.s32 %v4881_v20, %v1268_v32 }
 0x144   :  { %v908_v39 = vand.u32 65535, %v904_v51  ;;  %v909_v16 = vshrl.u32 %v904_v51, 16  ;;  %v385_v38 = vxor.u32 2147483648, %v4970_v27  ;;  %v648_v23 = vshll.u32 %v4983_v59, 30 }
 0x145   :  { %v897_v8 = vsel %vm889_vm9, %v4975_v47, %v4939_v0  ;;  %v899_v41 = vsel %vm891_vm7, %v4949_v44, %v6377_v25  ;;  %v3240_v19 = vadd.s32 4294967294, %v808_v43  ;;  %v1135_v55 = vsel %vm1014_vm6, %v1134_v57, %v1133_v2 }
 0x146   :  { %v910_v37 = vmul.u32 %v908_v39, %v906_v9  ;;  %v5004_v20 = vmul.u32 %v909_v16, %v906_v9  ;;  %v5007_v4 = vmul.u32 %v908_v39, %v4987_v42  ;;  %v5011_v3 = vadd.f32 1.0, %v370_v7 }
 0x147   :  { %v5016_v49 = vsel %vm4960_vm13, %v6365_v34, %v515_v13  ;;  %v5018_v60 = vsub.s32 %v645_v45, %v648_v23  ;;  %v1271_v31 = vsub.s32 0, %v4992_v63  ;;  %v900_v32 = vsel %vm890_vm12, %v897_v8, %v899_v41 }
 0x148   :  { %v914_v12 = vshll.u32 %v5004_v20, 16  ;;  %v916_v21 = vshll.u32 %v5007_v4, 16  ;;  %v516_v2 = vsub.s32 4, %v6378_v62  ;;  %vm1270_vm6 = vcmp.lt.s32.totalorder %v4992_v63, 0 }
 0x149   :  { %vm650_vm1 = vcmp.lt.s32.totalorder %v5018_v60, 0  ;;  %v651_v10 = vsub.s32 0, %v5018_v60  ;;  %vm3241_vm15 = vcmp.lt.s32.totalorder %v3240_v19, 0  ;;  %v913_v45 = vmul.u32 %v909_v16, %v4987_v42 }
 0x14a   :  { %vm918_vm4 = vc.u32 %v910_v37, %v914_v12  ;;  %v920_v7 = vadd.s32 %v914_v12, %v910_v37  ;;  %v5032_v29 = vmul.f32 %v5016_v49, %v5016_v49  ;;  %v931_v57 = vshrl.u32 %v900_v32, 16 }
 0x14b   :  { %v652_v43 = vsel %vm650_vm1, %v651_v10, %v5018_v60  ;;  %v919_v51 = vsel %vm918_vm4, 1, %v6322_v17  ;;  %v1272_v13 = vsel %vm1270_vm6, %v1271_v31, %v4992_v63  ;;  %v930_v23 = vand.u32 65535, %v900_v32 }
 0x14c   :  { %v653_v39 = vclz %v652_v43  ;;  %vm922_vm10 = vc.u32 %v920_v7, %v916_v21  ;;  %v5040_v16 = vsel %vm4905_vm5, %v6358_v36, %v1135_v55  ;;  %v5042_v8 = vadd.s32 3, %v1139_v6 }
 0x14d   :  { %vm384_vm0 = vcmp.eq.s32.totalorder %v4979_v40, 0  ;;  %v811_v25 = vsel %vm3241_vm15, 0, %v3240_v19  ;;  %v5051_v37 = vsel %vm394_vm11, %v516_v2, %v6378_v62  ;;  %v921_v32 = vadd.s32 %v919_v51, %v913_v45 }
 0x14e   :  { %v5046_v41 = vsel %vm384_vm0, %v5011_v3, %v385_v38  ;;  %v3237_v31 = vadd.s32 4294967294, %v653_v39  ;;  %v528_v12 = vmul.f32 -0.00019511016, %v5032_v29  ;;  %v1273_v5 = vclz %v1272_v13 }
 0x14f   :  { %v923_v55 = vsel %vm922_vm10, 1, %v6322_v17  ;;  %v933_v6 = vmul.u32 %v931_v57, %v906_v9  ;;  %v5057_v21 = vmul.f32 %v5040_v16, %v5040_v16  ;;  %v816_v19 = vsub.s32 4294967266, %v811_v25 }
 0x150   :  { %v934_v10 = vmul.u32 %v930_v23, %v4987_v42  ;;  %v812_v2 = vsub.s32 32, %v811_v25  ;;  %vm3238_vm2 = vcmp.lt.s32.totalorder %v3237_v31, 0  ;;  %v932_v45 = vmul.u32 %v930_v23, %v906_v9 }
 0x151   :  { %v5065_v7 = vmul.f32 -0.001358992, %v5032_v29  ;;  %v915_v43 = vshrl.u32 %v5004_v20, 16  ;;  %v925_v51 = vadd.s32 %v923_v55, %v921_v32  ;;  %v936_v13 = vshll.u32 %v933_v6, 16 }
 0x152   :  { %v529_v39 = vadd.f32 0.008332121, %v528_v12  ;;  %v5068_v50 = vadd.s32 4294967294, %v1273_v5  ;;  %v796_v38 = vadd.s32 %v4790_v53, %v4771_v35  ;;  %v935_v61 = vmul.u32 %v931_v57, %v4987_v42 }
 0x153   :  { %v817_v36 = vadd.s32 127, %v816_v19  ;;  %v656_v62 = vsel %vm3238_vm2, 0, %v3237_v31  ;;  %v873_v9 = vshrl.u32 %v6326_v15, %v6367_v18  ;;  %v938_v23 = vshll.u32 %v934_v10, 16  ;;  %v6379_v19 = vld [vmem:[#allocation15_spill] sm:$0xff] }
 0x154   :  { %v814_v24 = vshrl.u32 %v796_v38, %v812_v2  ;;  %v894_v20 = vsel %vm892_vm14, %v4949_v44, 2102212464  ;;  %vm940_vm5 = vc.u32 %v932_v45, %v936_v13  ;;  %v942_v32 = vadd.s32 %v936_v13, %v932_v45 }
 0x155   :  { %v813_v12 = vshll.u32 %v4894_v26, %v811_v25  ;;  %v917_v5 = vshrl.u32 %v5007_v4, 16  ;;  %v926_v35 = vadd.s32 %v925_v51, %v915_v43  ;;  %v941_v53 = vsel %vm940_vm5, 1, %v6322_v17  ;;  %v6380_v51 = vld [vmem:[#allocation19_spill] sm:$0xff] }
 0x156   :  { %v661_v42 = vsub.s32 4294967266, %v656_v62  ;;  %v937_v57 = vshrl.u32 %v933_v6, 16  ;;  %v943_v31 = vadd.s32 %v941_v53, %v935_v61  ;;  %vm944_vm3 = vc.u32 %v942_v32, %v938_v23 }
 0x157   :  { %v818_v18 = vshll.u32 %v817_v36, 23  ;;  %v893_v55 = vsel %vm889_vm9, %v873_v9, %v4975_v47  ;;  %v895_v44 = vsel %vm891_vm7, %v4939_v0, %v894_v20  ;;  %v945_v26 = vsel %vm944_vm3, 1, %v6322_v17  ;;  %v6381_v9 = vld [vmem:[#allocation18_spill] sm:$0xff] }
 0x158   :  { %v815_v25 = vor.u32 %v814_v24, %v813_v12  ;;  %v939_v4 = vshrl.u32 %v934_v10, 16  ;;  %v947_v38 = vadd.s32 %v945_v26, %v943_v31  ;;  %v6303_v2 = vand.u32 2147483647, %v6379_v19  ;;  %v6382_v31 = vld [vmem:[#allocation20_spill] sm:$0xff] }
 0x159   :  { %v641_v61 = vadd.s32 %v4913_v30, %v4909_v52  ;;  %v657_v6 = vsub.s32 32, %v656_v62  ;;  %v5091_v36 = vadd.s32 %v926_v35, %v917_v5  ;;  %v5093_v45 = vadd.s32 %v942_v32, %v938_v23 }
 0x15a   :  { %v662_v47 = vadd.s32 127, %v661_v42  ;;  %v896_v43 = vsel %vm890_vm12, %v893_v55, %v895_v44  ;;  %v948_v0 = vadd.s32 %v947_v38, %v937_v57  ;;  %v1329_v24 = vand.u32 8388607, %v6303_v2  ;;  %v6383_v55 = vld [vmem:[#allocation26_spill] sm:$0xff]  ;;  %v6384_v44 = vld [vmem:[#allocation23_spill] sm:$0xff] }
 0x15b   :  { %v819_v10 = vor.u32 4788187, %v818_v18  ;;  %v1340_v13 = vshrl.u32 %v6342_v11, %v6380_v51  ;;  %v1342_v52 = vshll.u32 %v6342_v11, %v6381_v9  ;;  %v1343_v30 = vshrl.u32 %v6340_v48, %v6380_v51 }
 0x15c   :  { %v949_v23 = vadd.s32 %v948_v0, %v939_v4  ;;  %v1330_v20 = vor.u32 8388608, %v1329_v24  ;;  %v1345_v33 = vshll.u32 %v6340_v48, %v6381_v9  ;;  %v1346_v32 = vshrl.u32 %v6330_v1, %v6380_v51  ;;  %v6385_v0 = vld [vmem:[#allocation25_spill] sm:$0xff] }
 0x15d   :  { %v659_v12 = vshrl.u32 %v641_v61, %v657_v6  ;;  %v950_v5 = vmul.u32 %v4956_v14, %v896_v43  ;;  %vm952_vm14 = vc.u32 %v5091_v36, %v5093_v45  ;;  %v1339_v11 = vshll.u32 %v6326_v15, %v6381_v9 }
 0x15e   :  { %v663_v35 = vshll.u32 %v662_v47, 23  ;;  %v953_v53 = vadd.s32 1, %v949_v23  ;;  %v5114_v42 = vor.u32 %v1343_v30, %v1342_v52  ;;  %v5116_v57 = vor.u32 %v1346_v32, %v1345_v33 }
 0x15f   :  { %v530_v48 = vmul.f32 %v529_v39, %v5032_v29  ;;  %vm3250_vm8 = vcmp.lt.s32.totalorder %v5068_v50, 0  ;;  %v5120_v1 = vor.u32 %v1340_v13, %v1339_v11  ;;  %vm1356_vm11 = vcmp.lt.s32.totalorder %v6382_v31, 3 }
 0x160   :  { %v658_v14 = vshll.u32 %v5018_v60, %v656_v62  ;;  %v954_v18 = vsel %vm952_vm14, %v953_v53, %v949_v23  ;;  %v1368_v26 = vsel %vm1356_vm11, %v6384_v44, %v6383_v55  ;;  %v5128_v4 = vshll.u32 %v1330_v20, 8 }
 0x161   :  { %v820_v38 = vand.u32 2147483647, %v819_v10  ;;  %v822_v61 = vcvt.s32.f32 %v815_v25  ;;  %v955_v6 = vadd.s32 %v954_v18, %v950_v5  ;;  %vm1354_vm9 = vcmp.lt.s32.totalorder %v6382_v31, 1  ;;  %v6386_v10 = vld [vmem:[#allocation9_spill] sm:$0xff] }
 0x162   :  { %v660_v39 = vor.u32 %v659_v12, %v658_v14  ;;  %v664_v47 = vor.u32 4788187, %v663_v35  ;;  %vm1355_vm7 = vcmp.lt.s32.totalorder %v6382_v31, 2  ;;  %v1366_v60 = vsel %vm1354_vm9, %v5114_v42, %v5116_v57 }
 0x163   :  { %v956_v62 = vadd.s32 536870912, %v955_v6  ;;  %v1362_v43 = vsel %vm1354_vm9, %v5120_v1, %v5114_v42  ;;  %v1364_v25 = vsel %vm1356_vm11, %v5116_v57, %v6385_v0  ;;  %v1369_v24 = vsel %vm1355_vm7, %v1366_v60, %v1368_v26 }
 0x164   :  { %vm704_vm12 = vcmp.lt.s32.totalorder %v6386_v10, 0  ;;  %v1371_v13 = vand.u32 65535, %v5128_v4  ;;  %v5149_v9 = vshrl.u32 %v5128_v4, 16  ;;  %v1373_v52 = vand.u32 65535, %v1369_v24 }
 0x165   :  { %v1374_v30 = vshrl.u32 %v1369_v24, 16  ;;  %v522_v23 = vadd.f32 0.041655596, %v5065_v7  ;;  %v5155_v20 = vsel %vm3250_vm8, 0, %v5068_v50  ;;  %v823_v33 = vmul.f32 %v822_v61, %v820_v38 }
 0x166   :  { %v5157_v32 = vshrl.u32 %v956_v62, 30  ;;  %v665_v12 = vand.u32 2147483647, %v664_v47  ;;  %v1365_v5 = vsel %vm1355_vm7, %v1362_v43, %v1364_v25  ;;  %v5164_v35 = vmul.u32 %v1373_v52, %v5149_v9 }
 0x167   :  { %v5161_v11 = vmul.u32 %v1374_v30, %v1371_v13  ;;  %v5167_v53 = vmul.f32 -0.00019511016, %v5057_v21  ;;  %v531_v7 = vadd.f32 -0.16666654, %v530_v48  ;;  %v6387_v50 = vsel %vm4960_vm13, 0, %v5051_v37 }
 0x168   :  { %v5173_v14 = vadd.s32 3, %v6387_v50  ;;  %v958_v18 = vshll.u32 %v5157_v32, 30  ;;  %v1281_v55 = vsub.s32 4294967266, %v5155_v20  ;;  %v667_v44 = vcvt.s32.f32 %v660_v39 }
 0x169   :  { %v1375_v26 = vmul.u32 %v1373_v52, %v1371_v13  ;;  %v1379_v38 = vshll.u32 %v5161_v11, 16  ;;  %vm549_vm6 = vcmp.lt.s32.totalorder %v6356_v46, 0  ;;  %v523_v61 = vmul.f32 %v522_v23, %v5032_v29 }
 0x16a   :  { %v824_v47 = vxor.u32 2147483648, %v823_v33  ;;  %v959_v48 = vsub.s32 %v955_v6, %v958_v18  ;;  %v1396_v60 = vshrl.u32 %v1365_v5, 16  ;;  %v668_v28 = vmul.f32 %v667_v44, %v665_v12 }
 0x16b   :  { %v1381_v37 = vshll.u32 %v5164_v35, 16  ;;  %vm1383_vm13 = vc.u32 %v1375_v26, %v1379_v38  ;;  %v1385_v62 = vadd.s32 %v1379_v38, %v1375_v26  ;;  %v532_v43 = vmul.f32 %v531_v7, %v5032_v29 }
 0x16c   :  { %v1277_v0 = vsub.s32 32, %v5155_v20  ;;  %vm960_vm1 = vcmp.lt.s32.totalorder %v959_v48, 0  ;;  %v961_v39 = vsub.s32 0, %v959_v48  ;;  %v5183_v25 = vadd.s32 127, %v1281_v55 }
 0x16d   :  { %v1378_v24 = vmul.u32 %v1374_v30, %v5149_v9  ;;  %v1384_v52 = vsel %vm1383_vm13, 1, %v6322_v17  ;;  %vm1387_vm15 = vc.u32 %v1385_v62, %v1381_v37  ;;  %v825_v6 = vsel %vm704_vm12, %v824_v47, %v823_v33  ;;  %v6408_v30 = vld [vmem:[#allocation4_spill] sm:$0xff] }
 0x16e   :  { %v962_v23 = vsel %vm960_vm1, %v961_v39, %v959_v48  ;;  %v1395_v12 = vand.u32 65535, %v1365_v5  ;;  %v1398_v50 = vmul.u32 %v1396_v60, %v1371_v13  ;;  %v1261_v7 = vadd.s32 %v4854_v54, %v4842_v56 }
 0x16f   :  { %v669_v18 = vxor.u32 2147483648, %v668_v28  ;;  %v963_v44 = vclz %v962_v23  ;;  %v1386_v26 = vadd.s32 %v1384_v52, %v1378_v24  ;;  %v524_v38 = vadd.f32 -0.4999988, %v523_v61 }
 0x170   :  { %v533_v55 = vadd.f32 1.0, %v532_v43  ;;  %v6388_v2 = vand.u32 2147483647, %v6386_v10  ;;  %v1388_v37 = vsel %vm1387_vm15, 1, %v6322_v17  ;;  %v1279_v33 = vshrl.u32 %v1261_v7, %v1277_v0 }
 0x171   :  { %v6391_v56 = vand.u32 2147483647, %v6356_v46  ;;  %v3243_v61 = vadd.s32 4294967294, %v963_v44  ;;  %v1397_v47 = vmul.u32 %v1395_v12, %v1371_v13  ;;  %v1399_v62 = vmul.u32 %v1395_v12, %v5149_v9 }
 0x172   :  { %vm5193_vm4 = vcmp.le.f32.partialorder %v6388_v2, 0.7853982  ;;  %v1283_v2 = vshll.u32 %v5183_v25, 23  ;;  %v1401_v43 = vshll.u32 %v1398_v50, 16  ;;  %v670_v0 = vsel %vm549_vm6, %v669_v18, %v668_v28 }
 0x173   :  { %v5201_v5 = vsel %vm5193_vm4, %v6386_v10, %v825_v6  ;;  %vm5205_vm10 = vcmp.le.f32.partialorder %v6391_v56, 0.7853982  ;;  %v951_v39 = vadd.s32 %v5093_v45, %v5091_v36  ;;  %vm3244_vm0 = vcmp.lt.s32.totalorder %v3243_v61, 0 }
 0x174   :  { %v1390_v24 = vadd.s32 %v1388_v37, %v1386_v26  ;;  %vm387_vm2 = vcmp.eq.s32.totalorder %v4979_v40, 2  ;;  %v5218_v52 = vmul.f32 %v5201_v5, %v5201_v5  ;;  %v966_v6 = vsel %vm3244_vm0, 0, %v3243_v61 }
 0x175   :  { %v1380_v13 = vshrl.u32 %v5161_v11, 16  ;;  %vm1405_vm5 = vc.u32 %v1397_v47, %v1401_v43  ;;  %v967_v25 = vsub.s32 32, %v966_v6  ;;  %v968_v23 = vshll.u32 %v959_v48, %v966_v6 }
 0x176   :  { %v971_v12 = vsub.s32 4294967266, %v966_v6  ;;  %v1400_v28 = vmul.u32 %v1396_v60, %v5149_v9  ;;  %v5225_v36 = vsel %vm5205_vm10, %v6356_v46, %v670_v0  ;;  %v1403_v45 = vshll.u32 %v1399_v62, 16 }
 0x177   :  { %v1406_v7 = vsel %vm1405_vm5, 1, %v6322_v17  ;;  %v1407_v18 = vadd.s32 %v1401_v43, %v1397_v47  ;;  %v969_v44 = vshrl.u32 %v951_v39, %v967_v25  ;;  %v1391_v37 = vadd.s32 %v1390_v24, %v1380_v13 }
 0x178   :  { %v972_v26 = vadd.s32 127, %v971_v12  ;;  %v1408_v56 = vadd.s32 %v1406_v7, %v1400_v28  ;;  %v838_v11 = vmul.f32 -0.00019511016, %v5218_v52  ;;  %v1338_v48 = vshrl.u32 %v6326_v15, %v6380_v51 }
 0x179   :  { %vm6394_vm3 = vcmp.lt.s32.totalorder %v6382_v31, 4  ;;  %vm1409_vm14 = vc.u32 %v1407_v18, %v1403_v45  ;;  %v970_v60 = vor.u32 %v969_v44, %v968_v23  ;;  %v1382_v0 = vshrl.u32 %v5164_v35, 16 }
 0x17a   :  { %v1359_v9 = vsel %vm6394_vm3, %v5116_v57, 2102212464  ;;  %v973_v61 = vshll.u32 %v972_v26, 23  ;;  %v1410_v47 = vsel %vm1409_vm14, 1, %v6322_v17  ;;  %v5238_v43 = vmul.f32 %v5225_v36, %v5225_v36 }
 0x17b   :  { %v1358_v39 = vsel %vm1354_vm9, %v1338_v48, %v5120_v1  ;;  %v1402_v15 = vshrl.u32 %v1398_v50, 16  ;;  %v1412_v51 = vadd.s32 %v1410_v47, %v1408_v56  ;;  %vm859_vm8 = vcmp.lt.s32.totalorder %v6362_v22, 0  ;;  %v6397_v47 = vld [vmem:[#allocation3_spill] sm:$0xff] }
 0x17c   :  { %v974_v57 = vor.u32 4788187, %v973_v61  ;;  %v977_v24 = vcvt.s32.f32 %v970_v60  ;;  %v1360_v35 = vsel %vm1356_vm11, %v5114_v42, %v1359_v9  ;;  %v5247_v6 = vadd.s32 %v1391_v37, %v1382_v0  ;;  %v6396_v9 = vld [vmem:[#allocation16_spill] sm:$0xff] }
 0x17d   :  { %v525_v17 = vmul.f32 %v524_v38, %v5032_v29  ;;  %v1278_v13 = vshll.u32 %v4992_v63, %v5155_v20  ;;  %v1404_v25 = vshrl.u32 %v1399_v62, 16  ;;  %v1413_v23 = vadd.s32 %v1412_v51, %v1402_v15 }
 0x17e   :  { %v6395_v1 = vxor.u32 2147483648, %v5011_v3  ;;  %v1284_v12 = vor.u32 4788187, %v1283_v2  ;;  %v975_v28 = vand.u32 2147483647, %v974_v57  ;;  %v5257_v7 = vadd.s32 %v1407_v18, %v1403_v45 }
 0x17f   :  { %v534_v42 = vmul.f32 %v533_v55, %v5016_v49  ;;  %v1280_v44 = vor.u32 %v1279_v33, %v1278_v13  ;;  %v1361_v29 = vsel %vm1355_vm7, %v1358_v39, %v1360_v35  ;;  %v1414_v38 = vadd.s32 %v1413_v23, %v1404_v25 }
 0x180   :  { %v389_v50 = vsel %vm387_vm2, %v6395_v1, %v4970_v27  ;;  %v839_v63 = vadd.f32 0.008332121, %v838_v11  ;;  %v683_v20 = vmul.f32 -0.00019511016, %v5238_v43  ;;  %v978_v62 = vmul.f32 %v977_v24, %v975_v28 }
 0x181   :  { %vm1417_vm11 = vc.u32 %v5247_v6, %v5257_v7  ;;  %v1149_v27 = vadd.f32 0.008332121, %v5167_v53  ;;  %v526_v3 = vadd.f32 1.0, %v525_v17  ;;  %v537_v2 = vand.u32 3, %v5173_v14 }
 0x182   :  { %v1418_v45 = vadd.s32 1, %v1414_v38  ;;  %vm383_vm9 = vcmp.lt.s32.totalorder %v4979_v40, 2  ;;  %v1285_v49 = vand.u32 2147483647, %v1284_v12  ;;  %v831_v31 = vmul.f32 -0.001358992, %v5218_v52 }
 0x183   :  { %v979_v55 = vxor.u32 2147483648, %v978_v62  ;;  %v1415_v33 = vmul.u32 %v5128_v4, %v1361_v29  ;;  %v1141_v18 = vmul.f32 -0.001358992, %v5057_v21  ;;  %v540_v26 = vxor.u32 2147483648, %v534_v42 }
 0x184   :  { %v826_v37 = vsub.s32 4, %v4874_v58  ;;  %v1419_v56 = vsel %vm1417_vm11, %v1418_v45, %v1414_v38  ;;  %vm535_vm7 = vweird.f32 %v6365_v34  ;;  %v1287_v53 = vcvt.s32.f32 %v1280_v44  ;;  %v1480_v44 = vpop.permute.xlu2 %1479 }
 0x185   :  { %v840_v14 = vmul.f32 %v839_v63, %v5218_v52  ;;  %v684_v11 = vadd.f32 0.008332121, %v683_v20  ;;  %v1420_v48 = vadd.s32 %v1419_v56, %v1415_v33  ;;  %vm1169_vm13 = vcmp.lt.s32.totalorder %v6396_v9, 0 }
 0x186   :  { %v1150_v60 = vmul.f32 %v1149_v27, %v5057_v21  ;;  %v543_v61 = vxor.u32 2147483648, %v526_v3  ;;  %v676_v4 = vmul.f32 -0.001358992, %v5238_v43  ;;  %v980_v0 = vsel %vm859_vm8, %v979_v55, %v978_v62 }
 0x187   :  { %vm380_vm1 = vweird.f32 %v6397_v47  ;;  %vm539_vm15 = vcmp.eq.s32.totalorder %v537_v2, 0  ;;  %v1288_v39 = vmul.f32 %v1287_v53, %v1285_v49  ;;  %v832_v15 = vadd.f32 0.041655596, %v831_v31 }
 0x188   :  { %v1421_v51 = vadd.s32 536870912, %v1420_v48  ;;  %v541_v57 = vsel %vm539_vm15, %v526_v3, %v540_v26  ;;  %vm542_vm0 = vcmp.eq.s32.totalorder %v537_v2, 2  ;;  %v827_v24 = vsel %vm704_vm12, %v826_v37, %v4874_v58 }
 0x189   :  { %v6398_v35 = vand.u32 2147483647, %v6362_v22  ;;  %v841_v13 = vadd.f32 -0.16666654, %v840_v14  ;;  %v685_v25 = vmul.f32 %v684_v11, %v5238_v43  ;;  %v1142_v12 = vadd.f32 0.041655596, %v1141_v18  ;;  %v1485_v14 = vpop.permute.xlu0 %1484 }
 0x18a   :  { %v5295_v1 = vshrl.u32 %v1421_v51, 30  ;;  %vm538_vm5 = vcmp.lt.s32.totalorder %v537_v2, 2  ;;  %v544_v28 = vsel %vm542_vm0, %v543_v61, %v534_v42  ;;  %v677_v58 = vadd.f32 0.041655596, %v676_v4 }
 0x18b   :  { %vm5285_vm2 = vcmp.le.f32.partialorder %v6398_v35, 0.7853982  ;;  %v545_v29 = vsel %vm538_vm5, %v541_v57, %v544_v28  ;;  %v1289_v38 = vxor.u32 2147483648, %v1288_v39  ;;  %v833_v63 = vmul.f32 %v832_v15, %v5218_v52 }
 0x18c   :  { %v5293_v23 = vsel %vm5285_vm2, %v6362_v22, %v980_v0  ;;  %v1423_v20 = vshll.u32 %v5295_v1, 30  ;;  %v1151_v62 = vadd.f32 -0.16666654, %v1150_v60  ;;  %v390_v27 = vsel %vm383_vm9, %v5046_v41, %v389_v50 }
 0x18d   :  { %v829_v3 = vsel %vm5193_vm4, 0, %v827_v24  ;;  %v5306_v2 = vmul.f32 %v5293_v23, %v5293_v23  ;;  %v842_v42 = vmul.f32 %v841_v13, %v5218_v52  ;;  %v671_v45 = vsub.s32 4, %v4983_v59 }
 0x18e   :  { %v686_v49 = vadd.f32 -0.16666654, %v685_v25  ;;  %v5310_v31 = vsub.s32 %v1420_v48, %v1423_v20  ;;  %v1143_v55 = vmul.f32 %v1142_v12, %v5057_v21  ;;  %v546_v40 = vsel %vm535_vm7, nan, %v545_v29  ;;  %v5348_v25 = vpop.permute.xlu2 %1532 }
 0x18f   :  { %v6401_v41 = vand.u32 2147483647, %v6396_v9  ;;  %v678_v50 = vmul.f32 %v677_v58, %v5238_v43  ;;  %v1290_v33 = vsel %vm1169_vm13, %v1289_v38, %v1288_v39  ;;  %v834_v18 = vadd.f32 -0.4999988, %v833_v63 }
 0x190   :  { %vm1425_vm4 = vcmp.lt.s32.totalorder %v5310_v31, 0  ;;  %v1426_v26 = vsub.s32 0, %v5310_v31  ;;  %v1152_v37 = vmul.f32 %v1151_v62, %v5057_v21  ;;  %v391_v34 = vsel %vm380_vm1, nan, %v390_v27 }
 0x191   :  { %vm5317_vm12 = vcmp.le.f32.partialorder %v6401_v41, 0.7853982  ;;  %v846_v56 = vadd.s32 3, %v829_v3  ;;  %v993_v53 = vmul.f32 -0.00019511016, %v5306_v2  ;;  %v843_v11 = vadd.f32 1.0, %v842_v42 }
 0x192   :  { %v672_v48 = vsel %vm549_vm6, %v671_v45, %v4983_v59  ;;  %v687_v60 = vmul.f32 %v686_v49, %v5238_v43  ;;  %v1427_v61 = vsel %vm1425_vm4, %v1426_v26, %v5310_v31  ;;  %v1518_v4 = vmul.f32 %v1485_v14, %v546_v40  ;;  %v5366_v26 = vpop.permute.xlu1 %1527 }
 0x193   :  { %v5338_v0 = vsel %vm5317_vm12, %v6396_v9, %v1290_v33  ;;  %v679_v47 = vadd.f32 -0.4999988, %v678_v50  ;;  %v1428_v39 = vclz %v1427_v61  ;;  %v5340_v15 = vadd.f32 -0.4999988, %v1143_v55 }
 0x194   :  { %v5343_v51 = vand.u32 3, %v5042_v8  ;;  %v835_v57 = vmul.f32 %v834_v18, %v5218_v52  ;;  %v1517_v59 = vmul.f32 %v1480_v44, %v391_v34  ;;  %v674_v24 = vsel %vm5205_vm10, 0, %v672_v48 }
 0x195   :  { %v994_v35 = vadd.f32 0.008332121, %v993_v53  ;;  %v3252_v13 = vadd.s32 4294967294, %v1428_v39  ;;  %v5352_v12 = vmul.f32 %v5338_v0, %v5338_v0  ;;  %v844_v28 = vmul.f32 %v843_v11, %v5201_v5  ;;  %v2107_v53 = vld [vmem:[%s6222_s9] sm:$0xf] }
 0x196   :  { %v847_v58 = vand.u32 3, %v846_v56  ;;  %v688_v29 = vadd.f32 1.0, %v687_v60  ;;  %v5355_v8 = vadd.f32 1.0, %v1152_v37  ;;  %v1566_v52 = vmul.f32 %v5348_v25, %v1518_v4 }
 0x197   :  { %v680_v44 = vmul.f32 %v679_v47, %v5238_v43  ;;  %vm3253_vm6 = vcmp.lt.s32.totalorder %v3252_v13, 0  ;;  %v836_v54 = vadd.f32 1.0, %v835_v57  ;;  %v691_v38 = vadd.s32 3, %v674_v24 }
 0x198   :  { %v986_v63 = vmul.f32 -0.001358992, %v5306_v2  ;;  %v1431_v20 = vsel %vm3253_vm6, 0, %v3252_v13  ;;  %v995_v62 = vmul.f32 %v994_v35, %v5306_v2  ;;  %v1416_v27 = vadd.s32 %v5257_v7, %v5247_v6  ;;  %v1490_v35 = vpop.permute.xlu0 %1489 }
 0x199   :  { %v1432_v5 = vsub.s32 32, %v1431_v20  ;;  %v1436_v3 = vsub.s32 4294967266, %v1431_v20  ;;  %v1303_v42 = vmul.f32 -0.00019511016, %v5352_v12  ;;  %vm848_vm10 = vcmp.lt.s32.totalorder %v847_v58, 2 }
 0x19a   :  { %v850_v45 = vxor.u32 2147483648, %v844_v28  ;;  %v689_v49 = vmul.f32 %v688_v29, %v5225_v36  ;;  %v681_v43 = vadd.f32 1.0, %v680_v44  ;;  %v1433_v55 = vshll.u32 %v5310_v31, %v1431_v20  ;;  %v1623_v31 = vld [vmem:[%s6221_s5] sm:$0xf] }
 0x19b   :  { %v1434_v40 = vshrl.u32 %v1416_v27, %v1432_v5  ;;  %v1437_v41 = vadd.s32 127, %v1436_v3  ;;  %vm849_vm3 = vcmp.eq.s32.totalorder %v847_v58, 0  ;;  %v853_v50 = vxor.u32 2147483648, %v836_v54 }
 0x19c   :  { %v692_v33 = vand.u32 3, %v691_v38  ;;  %v987_v18 = vadd.f32 0.041655596, %v986_v63  ;;  %v981_v6 = vsub.s32 4, %v5157_v32  ;;  %v996_v7 = vadd.f32 -0.16666654, %v995_v62 }
 0x19d   :  { %v1435_v37 = vor.u32 %v1434_v40, %v1433_v55  ;;  %v1438_v34 = vshll.u32 %v1437_v41, 23  ;;  %vm1324_vm14 = vcmp.lt.s32.totalorder %v6379_v19, 0  ;;  %v1565_v36 = vmul.f32 %v5366_v26, %v1517_v59 }
 0x19e   :  { %v695_v56 = vxor.u32 2147483648, %v689_v49  ;;  %vm1637_vm11 = vcmask 1043456   ;;  %v851_v14 = vsel %vm849_vm3, %v836_v54, %v850_v45  ;;  %v698_v11 = vxor.u32 2147483648, %v681_v43 }
 0x19f   :  { %v1439_v48 = vor.u32 4788187, %v1438_v34  ;;  %v1639_v60 = vsel %vm1637_vm11, %v1623_v31, 0  ;;  %v988_v61 = vmul.f32 %v987_v18, %v5306_v2  ;;  %v2113_v4 = vsel %vm1637_vm11, %v2107_v53, 0 }
 0x1a0   :  { %1648 = vmatpush.bf16.msra.mxu0 %v1639_v60  ;;  %v5380_v47 = vpack.c.bf16 %v1566_v52, %v1565_v36  ;;  %vm1624_vm9 = vcmask 64512   ;;  %vm852_vm7 = vcmp.eq.s32.totalorder %v847_v58, 2  ;;  %vm694_vm1 = vcmp.eq.s32.totalorder %v692_v33, 0  ;;  %2122 = vmatpush.bf16.msra.mxu2 %v2113_v4 }
 0x1a1   :  { %v1440_v39 = vand.u32 2147483647, %v1439_v48  ;;  %v1442_v57 = vcvt.s32.f32 %v1435_v37  ;;  %v854_v59 = vsel %vm852_vm7, %v853_v50, %v844_v28  ;;  %v696_v24 = vsel %vm694_vm1, %v681_v43, %v695_v56  ;;  %v5420_v56 = vpop.permute.xlu0 %1542  ;;  %v5424_v48 = vpop.permute.xlu2 %1537 }
 0x1a2   :  { %v982_v13 = vsel %vm859_vm8, %v981_v6, %v5157_v32  ;;  %v997_v29 = vmul.f32 %v996_v7, %v5306_v2  ;;  %v1304_v44 = vadd.f32 0.008332121, %v1303_v42  ;;  %v855_v54 = vsel %vm848_vm10, %v851_v14, %v854_v59  ;;  %v1495_v42 = vpop.permute.xlu1 %1494  ;;  %v6407_v6 = vld [vmem:[#allocation7_spill] sm:$0xff] }
 0x1a3   :  { %vm697_vm15 = vcmp.eq.s32.totalorder %v692_v33, 2  ;;  %v1443_v52 = vmul.f32 %v1442_v57, %v1440_v39  ;;  %3254 = vmatmul.msk.bf16.vlgmr.msra.gmra.mxu0 %vm1624_vm9, %v5380_v47  ;;  %v1145_v38 = vmul.f32 %v5340_v15, %v5057_v21  ;;  %vm693_vm0 = vcmp.lt.s32.totalorder %v692_v33, 2  ;;  %3306 = vmatmul.msk.bf16.vlgmr.msra.gmra.mxu2 %vm1624_vm9, %v5380_v47 }
 0x1a4   :  { %v699_v28 = vsel %vm697_vm15, %v698_v11, %v689_v49  ;;  %v989_v63 = vadd.f32 -0.4999988, %v988_v61  ;;  %vm845_vm8 = vweird.f32 %v6386_v10  ;;  %v984_v58 = vsel %vm5285_vm2, 0, %v982_v13 }
 0x1a5   :  { %v700_v32 = vsel %vm693_vm0, %v696_v24, %v699_v28  ;;  %v1444_v20 = vxor.u32 2147483648, %v1443_v52  ;;  %v1154_v62 = vmul.f32 %v5355_v8, %v5040_v16  ;;  %v1296_v27 = vmul.f32 -0.001358992, %v5352_v12 }
 0x1a6   :  { %v856_v5 = vsel %vm845_vm8, nan, %v855_v54  ;;  %v998_v21 = vadd.f32 1.0, %v997_v29  ;;  %v1305_v15 = vmul.f32 %v1304_v44, %v5352_v12  ;;  %vm690_vm5 = vweird.f32 %v6356_v46 }
 0x1a7   :  { %v6404_v3 = vand.u32 2147483647, %v6379_v19  ;;  %v1445_v17 = vsel %vm1324_vm14, %v1444_v20, %v1443_v52  ;;  %v701_v45 = vsel %vm690_vm5, nan, %v700_v32  ;;  %v990_v16 = vmul.f32 %v989_v63, %v5306_v2 }
 0x1a8   :  { %v1001_v8 = vadd.s32 3, %v984_v58  ;;  %v1520_v46 = vmul.f32 %v1495_v42, %v856_v5  ;;  %v1146_v55 = vadd.f32 1.0, %v1145_v38  ;;  %vm1158_vm2 = vcmp.lt.s32.totalorder %v5343_v51, 2 }
 0x1a9   :  { %vm5403_vm4 = vcmp.le.f32.partialorder %v6404_v3, 0.7853982  ;;  %v1297_v40 = vadd.f32 0.041655596, %v1296_v27  ;;  %v999_v41 = vmul.f32 %v998_v21, %v5293_v23  ;;  %v1160_v50 = vxor.u32 2147483648, %v1154_v62 }
 0x1aa   :  { %v5413_v49 = vsel %vm5403_vm4, %v6379_v19, %v1445_v17  ;;  %v1519_v33 = vmul.f32 %v1490_v35, %v701_v45  ;;  %v1291_v7 = vsub.s32 4, %v6407_v6  ;;  %v1306_v37 = vadd.f32 -0.16666654, %v1305_v15  ;;  %v1500_v63 = vpop.permute.xlu1 %1499 }
 0x1ab   :  { %v1450_v43 = vmul.f32 %v5413_v49, %v5413_v49  ;;  %v991_v34 = vadd.f32 1.0, %v990_v16  ;;  %v1002_v36 = vand.u32 3, %v1001_v8  ;;  %v1568_v31 = vmul.f32 %v5420_v56, %v1520_v46  ;;  %v1505_v8 = vpop.permute.xlu2 %1504 }
 0x1ac   :  { %v1446_v53 = vsub.s32 4, %v5295_v1  ;;  %vm1159_vm6 = vcmp.eq.s32.totalorder %v5343_v51, 0  ;;  %v1163_v23 = vxor.u32 2147483648, %v1146_v55  ;;  %v1298_v60 = vmul.f32 %v1297_v40, %v5352_v12 }
 0x1ad   :  { %v1451_v18 = vmul.f32 -0.001358992, %v1450_v43  ;;  %v1458_v2 = vmul.f32 -0.00019511016, %v1450_v43  ;;  %v1005_v61 = vxor.u32 2147483648, %v999_v41  ;;  %vm1162_vm10 = vcmp.eq.s32.totalorder %v5343_v51, 2 }
 0x1ae   :  { %v1567_v4 = vmul.f32 %v5424_v48, %v1519_v33  ;;  %v1161_v59 = vsel %vm1159_vm6, %v1146_v55, %v1160_v50  ;;  %v1292_v24 = vsel %vm1169_vm13, %v1291_v7, %v6407_v6  ;;  %v1307_v35 = vmul.f32 %v1306_v37, %v5352_v12  ;;  %v3407_v51 = vld [vmem:[%s6222_s9 + $0x4] sm:$0xf] }
 0x1af   :  { %v1452_v14 = vadd.f32 0.041655596, %v1451_v18  ;;  %v1459_v11 = vadd.f32 0.008332121, %v1458_v2  ;;  %v1008_v13 = vxor.u32 2147483648, %v991_v34  ;;  %vm1004_vm3 = vcmp.eq.s32.totalorder %v1002_v36, 0 }
 0x1b0   :  { %v1447_v29 = vsel %vm1324_vm14, %v1446_v53, %v5295_v1  ;;  %v5437_v54 = vpack.c.bf16 %v1568_v31, %v1567_v4  ;;  %v1164_v52 = vsel %vm1162_vm10, %v1163_v23, %v1154_v62  ;;  %v1299_v38 = vadd.f32 -0.4999988, %v1298_v60 }
 0x1b1   :  { %v1453_v39 = vmul.f32 %v1452_v14, %v1450_v43  ;;  %v1460_v57 = vmul.f32 %v1459_v11, %v1450_v43  ;;  %v1006_v28 = vsel %vm1004_vm3, %v991_v34, %v1005_v61  ;;  %v1165_v58 = vsel %vm1158_vm2, %v1161_v59, %v1164_v52  ;;  %v5461_v34 = vpop.permute.xlu0 %1547 }
 0x1b2   :  { %v1294_v20 = vsel %vm5317_vm12, 0, %v1292_v24  ;;  %vm1007_vm13 = vcmp.eq.s32.totalorder %v1002_v36, 2  ;;  %v1308_v1 = vadd.f32 1.0, %v1307_v35  ;;  %vm1003_vm14 = vcmp.lt.s32.totalorder %v1002_v36, 2 }
 0x1b3   :  { %v1461_v44 = vadd.f32 -0.16666654, %v1460_v57  ;;  %v1454_v32 = vadd.f32 -0.4999988, %v1453_v39  ;;  %3255 = vmatmul.msk.bf16.gmra.mxu0 %vm1624_vm9, %v5437_v54  ;;  %v1009_v5 = vsel %vm1007_vm13, %v1008_v13, %v999_v41  ;;  %v1449_v62 = vsel %vm5403_vm4, 0, %v1447_v29  ;;  %3307 = vmatmul.msk.bf16.gmra.mxu2 %vm1624_vm9, %v5437_v54  ;;  %v1510_v11 = vpop.permute.xlu2 %1509 }
 0x1b4   :  { %vm1155_vm12 = vweird.f32 %v6408_v30  ;;  %v1010_v21 = vsel %vm1003_vm14, %v1006_v28, %v1009_v5  ;;  %v2700_v3 = vsel %vm1637_vm11, %v3407_v51, 0  ;;  %v1300_v42 = vmul.f32 %v1299_v38, %v5352_v12  ;;  %v5458_v12 = vpop.permute.xlu1 %1552  ;;  %v5491_v38 = vld [vmem:[%s6225_s1] sm:$0xff] }
 0x1b5   :  { %v1462_v27 = vmul.f32 %v1461_v44, %v1450_v43  ;;  %v1166_v17 = vsel %vm1155_vm12, nan, %v1165_v58  ;;  %v1455_v45 = vmul.f32 %v1454_v32, %v1450_v43  ;;  %2709 = vmatpush.bf16.msrb.mxu2 %v2700_v3  ;;  %v1311_v10 = vadd.s32 3, %v1294_v20 }
 0x1b6   :  { %vm1000_vm7 = vweird.f32 %v6362_v22  ;;  %v1466_v16 = vadd.s32 3, %v1449_v62  ;;  %v1309_v46 = vmul.f32 %v1308_v1, %v5338_v0  ;;  %v1522_v41 = vmul.f32 %v1505_v8, %v1166_v17  ;;  %v3542_v62 = vld [vmem:[%s6227_s7 + $0x38] sm:$0xff] }
 0x1b7   :  { %v1463_v15 = vadd.f32 1.0, %v1462_v27  ;;  %v1011_v55 = vsel %vm1000_vm7, nan, %v1010_v21  ;;  %v1301_v50 = vadd.f32 1.0, %v1300_v42  ;;  %v1456_v33 = vadd.f32 1.0, %v1455_v45  ;;  %1918 = vmatpush.bf16.msra.mxu1 %v3542_v62  ;;  %v3536_v62 = vld [vmem:[%s6227_s7 + $0x8] sm:$0xff] }
 0x1b8   :  { %v1312_v18 = vand.u32 3, %v1311_v10  ;;  %v1521_v2 = vmul.f32 %v1500_v63, %v1011_v55  ;;  %v1467_v6 = vand.u32 3, %v1466_v16  ;;  %v1315_v7 = vxor.u32 2147483648, %v1309_v46  ;;  %v3541_v16 = vld [vmem:[%s6227_s7 + $0x30] sm:$0xff] }
 0x1b9   :  { %v1464_v40 = vmul.f32 %v1463_v15, %v5413_v49  ;;  %v1570_v37 = vmul.f32 %v5458_v12, %v1522_v41  ;;  %v1318_v22 = vxor.u32 2147483648, %v1301_v50  ;;  %v1473_v36 = vxor.u32 2147483648, %v1456_v33  ;;  %v1515_v57 = vpop.permute.xlu0 %1514 }
 0x1ba   :  { %vm1314_vm11 = vcmp.eq.s32.totalorder %v1312_v18, 0  ;;  %v1569_v0 = vmul.f32 %v5461_v34, %v1521_v2  ;;  %vm1469_vm1 = vcmp.eq.s32.totalorder %v1467_v6, 0  ;;  %vm1317_vm15 = vcmp.eq.s32.totalorder %v1312_v18, 2 }
 0x1bb   :  { %v1470_v43 = vxor.u32 2147483648, %v1464_v40  ;;  %v1316_v49 = vsel %vm1314_vm11, %v1301_v50, %v1315_v7  ;;  %vm1472_vm0 = vcmp.eq.s32.totalorder %v1467_v6, 2  ;;  %vm1313_vm8 = vcmp.lt.s32.totalorder %v1312_v18, 2  ;;  %v5468_v35 = vpop.permute.xlu2 %1562  ;;  %1919 = vmatpush.bf16.msra.mxu1 %v3541_v16 }
 0x1bc   :  { %v1575_v53 = vpack.c.bf16 %v1570_v37, %v1569_v0  ;;  %v1319_v14 = vsel %vm1317_vm15, %v1318_v22, %v1309_v46  ;;  %vm1468_vm5 = vcmp.lt.s32.totalorder %v1467_v6, 2  ;;  %v1474_v23 = vsel %vm1472_vm0, %v1473_v36, %v1464_v40  ;;  %v5470_v13 = vpop.permute.xlu1 %1557  ;;  %v3540_v40 = vld [vmem:[%s6227_s7 + $0x28] sm:$0xff]  ;;  %v3539_v22 = vld [vmem:[%s6227_s7 + $0x20] sm:$0xff] }
 0x1bd   :  { %v1471_v31 = vsel %vm1469_vm1, %v1456_v33, %v1470_v43  ;;  %v1320_v60 = vsel %vm1313_vm8, %v1316_v49, %v1319_v14  ;;  %vm1310_vm4 = vweird.f32 %v6396_v9  ;;  %vm1465_vm2 = vweird.f32 %v6379_v19  ;;  %v5484_v19 = vld [vmem:[%s6224_s0] sm:$0xff] }
 0x1be   :  { %v1475_v61 = vsel %vm1468_vm5, %v1471_v31, %v1474_v23  ;;  %v1321_v4 = vsel %vm1310_vm4, nan, %v1320_v60  ;;  %v1587_v9 = vperm.slane %v5484_v19, 0  ;;  %v1580_v63 = vrot.slane %v5484_v19, 1 }
 0x1bf   :  { %v1476_v39 = vsel %vm1465_vm2, nan, %v1475_v61  ;;  %v1523_v59 = vmul.f32 %v1510_v11, %v1321_v4  ;;  %v1581_v51 = vrot.slane %v5484_v19, 2  ;;  %v1582_v8 = vrot.slane %v5484_v19, 3  ;;  %1920 = vmatpush.bf16.msra.mxu1 %v3540_v40 }
 0x1c0   :  { %v1524_v24 = vmul.f32 %v1515_v57, %v1476_v39  ;;  %v1588_v20 = vperm.slane %v1580_v63, 0  ;;  %v1583_v36 = vrot.slane %v5484_v19, 4 }
 0x1c1   :  { %v1571_v29 = vmul.f32 %v5470_v13, %v1523_v59  ;;  %v1589_v15 = vperm.slane %v1581_v51, 0  ;;  %v1590_v41 = vperm.slane %v1582_v8, 0 }
 0x1c2   :  { %v1572_v44 = vmul.f32 %v5468_v35, %v1524_v24  ;;  %v1604_v1 = vadd.f32 %v1588_v20, %v5491_v38  ;;  %v1591_v14 = vperm.slane %v1583_v36, 0 }
 0x1c3   :  { %3256 = vmatmul.msk.bf16.gmra.mxu0 %vm1624_vm9, %v1575_v53  ;;  %3308 = vmatmul.msk.bf16.gmra.mxu2 %vm1624_vm9, %v1575_v53  ;;  %v1605_v42 = vadd.f32 %v1589_v15, %v5491_v38  ;;  %v1606_v18 = vadd.f32 %v1590_v41, %v5491_v38 }
 0x1c4   :  { %v1576_v52 = vpack.c.bf16 %v1572_v44, %v1571_v29  ;;  %1921 = vmatpush.bf16.msra.mxu1 %v3539_v22  ;;  %v1607_v61 = vadd.f32 %v1591_v14, %v5491_v38 }
 0x1d3   :  { %3257 = vmatmul.msk.bf16.gmra.mxu0 %vm1624_vm9, %v1576_v52  ;;  %3309 = vmatmul.msk.bf16.gmra.mxu2 %vm1624_vm9, %v1576_v52 }
 0x1e3   :  { %3409 = vmatmul.msk.bf16.vlgmr.msrb.gmra.mxu2 %vm1624_vm9, %v5380_v47  ;;  %v1603_v47 = vadd.f32 %v1587_v9, %v5491_v38 }
 0x1f3   :  { %3410 = vmatmul.msk.bf16.gmra.mxu2 %vm1624_vm9, %v5437_v54  ;;  %v5497_v54 = vld [vmem:[%s6220_s6] ss:$0 sm:$0xff] }
 0x1f4   :  { %v1615_v28 = vadd.f32 %v5497_v54, %v1603_v47  ;;  %v1616_v5 = vadd.f32 %v5497_v54, %v1604_v1  ;;  %v1617_v10 = vadd.f32 %v5497_v54, %v1605_v42  ;;  %v1618_v43 = vadd.f32 %v5497_v54, %v1606_v18  ;;  %v3537_v47 = vld [vmem:[%s6227_s7 + $0x10] sm:$0xff] }
 0x1f5   :  { %v1619_v9 = vadd.f32 %v5497_v54, %v1607_v61 }
 0x203   :  { %3411 = vmatmul.msk.bf16.gmra.mxu2 %vm1624_vm9, %v1575_v53  ;;  %v3538_v53 = vld [vmem:[%s6227_s7 + $0x18] sm:$0xff] }
 0x204   :  { %1922 = vmatpush.bf16.msra.mxu1 %v3538_v53 }
 0x208   :  { %1923 = vmatpush.bf16.msra.mxu1 %v3537_v47  ;;  %v1586_v47 = vrot.slane %v5484_v19, 7 }
 0x20c   :  { %1924 = vmatpush.bf16.msra.mxu1 %v3536_v62 }
 0x213   :  { %3412 = vmatmul.msk.bf16.gmra.mxu2 %vm1624_vm9, %v1576_v52 }
 0x220   :  { %v1650_v32 = vpop.f32.mrf.mxu0 }
 0x221   :  { %v5501_v58 = vadd.f32 %v1650_v32, %v1615_v28 }
 0x223   :  { %v3258_v27 = vmul.f32 -1.442695, %v5501_v58 }
 0x225   :  { %3627 = vpow2.f32 %v3258_v27  ;;  %v1584_v27 = vrot.slane %v5484_v19, 5 }
 0x228   :  { %v1652_v30 = vpop.f32.mrf.mxu0 }
 0x229   :  { %v5510_v21 = vadd.f32 %v1652_v30, %v1616_v5  ;;  %v1592_v30 = vperm.slane %v1584_v27, 0 }
 0x22b   :  { %v3628_v3 = vpop.eup %3627  ;;  %v3259_v17 = vmul.f32 -1.442695, %v5510_v21  ;;  %v1608_v16 = vadd.f32 %v1592_v30, %v5491_v38 }
 0x22c   :  { %v1702_v45 = vadd.f32 1.0, %v3628_v3 }
 0x22d   :  { %3629 = vpow2.f32 %v3259_v17  ;;  %v1620_v18 = vadd.f32 %v5497_v54, %v1608_v16 }
 0x22e   :  { %3631 = vrcp.f32 %v1702_v45  ;;  %v1721_v39 = vand.u32 2147483648, %v1702_v45  ;;  %vm1715_vm6 = vweird.f32 %v1702_v45  ;;  %v1719_v59 = vand.u32 2147483647, %v1702_v45 }
 0x230   :  { %v1655_v46 = vpop.f32.mrf.mxu0  ;;  %v1722_v28 = vor.u32 1.1754944e-38, %v1721_v39  ;;  %vm1720_vm3 = vcmp.eq.f32.partialorder %v1719_v59, 8.507059e+37 }
 0x231   :  { %v5519_v55 = vadd.f32 %v1655_v46, %v1617_v10 }
 0x233   :  { %v3630_v50 = vpop.eup %3629  ;;  %v3260_v33 = vmul.f32 -1.442695, %v5519_v55 }
 0x234   :  { %v3632_v2 = vpop.eup %3631  ;;  %v1703_v6 = vadd.f32 1.0, %v3630_v50 }
 0x235   :  { %v1711_v7 = vmul.f32 %v3632_v2, %v1702_v45  ;;  %3633 = vpow2.f32 %v3260_v33  ;;  %vm1716_vm9 = vweird.f32 %v3632_v2 }
 0x236   :  { %3635 = vrcp.f32 %v1703_v6  ;;  %vm5540_vm10 = vmor %vm1715_vm6, %vm1716_vm9  ;;  %v1734_v63 = vand.u32 2147483647, %v1703_v6  ;;  %v1736_v32 = vand.u32 2147483648, %v1703_v6  ;;  %vm1730_vm14 = vweird.f32 %v1703_v6 }
 0x237   :  { %v1712_v37 = vsub.f32 1.0, %v1711_v7  ;;  %v1585_v7 = vrot.slane %v5484_v19, 6 }
 0x238   :  { %v1657_v0 = vpop.f32.mrf.mxu0  ;;  %vm1735_vm7 = vcmp.eq.f32.partialorder %v1734_v63, 8.507059e+37  ;;  %v1737_v45 = vor.u32 1.1754944e-38, %v1736_v32  ;;  %v1594_v32 = vperm.slane %v1586_v47, 0 }
 0x239   :  { %v1713_v49 = vmul.f32 %v3632_v2, %v1712_v37  ;;  %v5531_v31 = vadd.f32 %v1657_v0, %v1618_v43 }
 0x23b   :  { %v3634_v11 = vpop.eup %3633  ;;  %v1714_v23 = vadd.f32 %v3632_v2, %v1713_v49  ;;  %v3261_v60 = vmul.f32 -1.442695, %v5531_v31 }
 0x23c   :  { %v3636_v4 = vpop.eup %3635  ;;  %v5538_v57 = vadd.f32 1.0, %v3634_v11 }
 0x23d   :  { %v1726_v24 = vmul.f32 %v3636_v4, %v1703_v6  ;;  %3637 = vpow2.f32 %v3261_v60  ;;  %v1718_v44 = vsel %vm5540_vm10, %v3632_v2, %v1714_v23  ;;  %vm1731_vm13 = vweird.f32 %v3636_v4  ;;  %v3535_v2 = vld [vmem:[%s6227_s7] sm:$0xff] }
 0x23e   :  { %3639 = vrcp.f32 %v5538_v57  ;;  %v1723_v51 = vsel %vm1720_vm3, %v1722_v28, %v1718_v44  ;;  %vm1732_vm12 = vmor %vm1730_vm14, %vm1731_vm13  ;;  %1925 = vmatpush.bf16.msra.mxu1 %v3535_v2  ;;  %v1751_v11 = vand.u32 2147483648, %v5538_v57  ;;  %vm1745_vm1 = vweird.f32 %v5538_v57 }
 0x23f   :  { %v1727_v52 = vsub.f32 1.0, %v1726_v24  ;;  %v1830_v8 = vmul.f32 %v1723_v51, %v5501_v58  ;;  %v1749_v61 = vand.u32 2147483647, %v5538_v57 }
 0x240   :  { %v1660_v20 = vpop.f32.mrf.mxu0  ;;  %v1752_v29 = vor.u32 1.1754944e-38, %v1751_v11 }
 0x241   :  { %v1728_v1 = vmul.f32 %v3636_v4, %v1727_v52  ;;  %v5552_v5 = vadd.f32 %v1660_v20, %v1619_v9  ;;  %v5570_v37 = vmul.f32 %v1830_v8, %v5366_v26  ;;  %vm1750_vm0 = vcmp.eq.f32.partialorder %v1749_v61, 8.507059e+37 }
 0x243   :  { %v3638_v15 = vpop.eup %3637  ;;  %v1729_v3 = vadd.f32 %v3636_v4, %v1728_v1  ;;  %v3262_v17 = vmul.f32 -1.442695, %v5552_v5 }
 0x244   :  { %v3640_v42 = vpop.eup %3639  ;;  %v1705_v10 = vadd.f32 1.0, %v3638_v15  ;;  %v1610_v15 = vadd.f32 %v1594_v32, %v5491_v38 }
 0x245   :  { %v1733_v46 = vsel %vm1732_vm12, %v3636_v4, %v1729_v3  ;;  %v1741_v40 = vmul.f32 %v3640_v42, %v5538_v57  ;;  %3641 = vpow2.f32 %v3262_v17  ;;  %vm1746_vm11 = vweird.f32 %v3640_v42 }
 0x246   :  { %v1738_v41 = vsel %vm1735_vm7, %v1737_v45, %v1733_v46  ;;  %3643 = vrcp.f32 %v1705_v10  ;;  %vm1747_vm15 = vmor %vm1745_vm1, %vm1746_vm11  ;;  %v1764_v44 = vand.u32 2147483647, %v1705_v10  ;;  %v1766_v52 = vand.u32 2147483648, %v1705_v10 }
 0x247   :  { %v1831_v50 = vmul.f32 %v1738_v41, %v5510_v21  ;;  %v1742_v33 = vsub.f32 1.0, %v1741_v40  ;;  %v1593_v21 = vperm.slane %v1585_v7, 0  ;;  %vm1760_vm5 = vweird.f32 %v1705_v10 }
 0x248   :  { %v1662_v6 = vpop.f32.mrf.mxu0  ;;  %vm1765_vm2 = vcmp.eq.f32.partialorder %v1764_v44, 8.507059e+37  ;;  %v1767_v51 = vor.u32 1.1754944e-38, %v1766_v52  ;;  %v1622_v16 = vadd.f32 %v5497_v54, %v1610_v15 }
 0x249   :  { %v1743_v58 = vmul.f32 %v3640_v42, %v1742_v33  ;;  %v5567_v43 = vadd.f32 %v1662_v6, %v1620_v18  ;;  %v5573_v22 = vmul.f32 %v1831_v50, %v5348_v25  ;;  %v1609_v60 = vadd.f32 %v1593_v21, %v5491_v38 }
 0x24b   :  { %v3642_v36 = vpop.eup %3641  ;;  %v1744_v0 = vadd.f32 %v3640_v42, %v1743_v58  ;;  %v3263_v49 = vmul.f32 -1.442695, %v5567_v43  ;;  %v1846_v53 = vpack.c.bf16 %v5573_v22, %v5570_v37  ;;  %v1621_v24 = vadd.f32 %v5497_v54, %v1609_v60 }
 0x24c   :  { %v3644_v14 = vpop.eup %3643  ;;  %v5579_v23 = vadd.f32 1.0, %v3642_v36 }
 0x24d   :  { %v1756_v4 = vmul.f32 %v3644_v14, %v1705_v10  ;;  %3645 = vpow2.f32 %v3263_v49  ;;  %1926 = vmatmul.bf16.vlgmr.msra.gmra.mxu1 %v1846_v53  ;;  %v1748_v39 = vsel %vm1747_vm15, %v3640_v42, %v1744_v0  ;;  %vm1761_vm8 = vweird.f32 %v3644_v14 }
 0x24e   :  { %3647 = vrcp.f32 %v5579_v23  ;;  %v1753_v63 = vsel %vm1750_vm0, %v1752_v29, %v1748_v39  ;;  %vm1762_vm4 = vmor %vm1760_vm5, %vm1761_vm8  ;;  %v1781_v54 = vand.u32 2147483648, %v5579_v23  ;;  %vm1775_vm6 = vweird.f32 %v5579_v23 }
 0x24f   :  { %v1757_v59 = vsub.f32 1.0, %v1756_v4  ;;  %v1832_v19 = vmul.f32 %v1753_v63, %v5519_v55  ;;  %v1779_v6 = vand.u32 2147483647, %v5579_v23 }
 0x250   :  { %v1665_v9 = vpop.f32.mrf.mxu0  ;;  %v1782_v36 = vor.u32 1.1754944e-38, %v1781_v54 }
 0x251   :  { %v1758_v28 = vmul.f32 %v3644_v14, %v1757_v59  ;;  %v5587_v57 = vadd.f32 %v1665_v9, %v1621_v24  ;;  %v5598_v41 = vmul.f32 %v1832_v19, %v5424_v48  ;;  %vm1780_vm3 = vcmp.eq.f32.partialorder %v1779_v6, 8.507059e+37 }
 0x253   :  { %v3646_v20 = vpop.eup %3645  ;;  %v1759_v27 = vadd.f32 %v3644_v14, %v1758_v28  ;;  %v3264_v1 = vmul.f32 -1.442695, %v5587_v57 }
 0x254   :  { %v3648_v62 = vpop.eup %3647  ;;  %v1707_v30 = vadd.f32 1.0, %v3646_v20 }
 0x255   :  { %v1763_v3 = vsel %vm1762_vm4, %v3644_v14, %v1759_v27  ;;  %v1771_v17 = vmul.f32 %v3648_v62, %v5579_v23  ;;  %3649 = vpow2.f32 %v3264_v1  ;;  %vm1776_vm9 = vweird.f32 %v3648_v62 }
 0x256   :  { %v1768_v42 = vsel %vm1765_vm2, %v1767_v51, %v1763_v3  ;;  %3651 = vrcp.f32 %v1707_v30  ;;  %vm1777_vm10 = vmor %vm1775_vm6, %vm1776_vm9  ;;  %v1796_v0 = vand.u32 2147483648, %v1707_v30  ;;  %v1794_v53 = vand.u32 2147483647, %v1707_v30 }
 0x257   :  { %v1833_v45 = vmul.f32 %v1768_v42, %v5531_v31  ;;  %v1772_v10 = vsub.f32 1.0, %v1771_v17  ;;  %vm1790_vm14 = vweird.f32 %v1707_v30 }
 0x258   :  { %v1667_v8 = vpop.f32.mrf.mxu0  ;;  %v1797_v23 = vor.u32 1.1754944e-38, %v1796_v0  ;;  %vm1795_vm7 = vcmp.eq.f32.partialorder %v1794_v53, 8.507059e+37  ;;  %v3548_v53 = vld [vmem:[%s6229_s11 + $0x28] sm:$0xff] }
 0x259   :  { %v1773_v46 = vmul.f32 %v3648_v62, %v1772_v10  ;;  %v5595_v40 = vadd.f32 %v1667_v8, %v1622_v16  ;;  %v5601_v38 = vmul.f32 %v1833_v45, %v5420_v56 }
 0x25b   :  { %v3650_v55 = vpop.eup %3649  ;;  %v1774_v50 = vadd.f32 %v3648_v62, %v1773_v46  ;;  %v3265_v33 = vmul.f32 -1.442695, %v5595_v40  ;;  %v1847_v31 = vpack.c.bf16 %v5601_v38, %v5598_v41 }
 0x25c   :  { %v3652_v18 = vpop.eup %3651  ;;  %v1708_v2 = vadd.f32 1.0, %v3650_v55 }
 0x25d   :  { %v1786_v7 = vmul.f32 %v3652_v18, %v1707_v30  ;;  %3653 = vpow2.f32 %v3265_v33  ;;  %1931 = vmatmul.bf16.gmra.mxu1 %v1847_v31  ;;  %v1778_v58 = vsel %vm1777_vm10, %v3648_v62, %v1774_v50  ;;  %vm1791_vm13 = vweird.f32 %v3652_v18  ;;  %v5632_v33 = vld [vmem:[%s6226_s8] ss:$0 sm:$0xff] }
 0x25e   :  { %3655 = vrcp.f32 %v1708_v2  ;;  %v1783_v14 = vsel %vm1780_vm3, %v1782_v36, %v1778_v58  ;;  %vm1792_vm12 = vmor %vm1790_vm14, %vm1791_vm13  ;;  %v1811_v20 = vand.u32 2147483648, %v1708_v2  ;;  %vm1805_vm1 = vweird.f32 %v1708_v2  ;;  %v3549_v36 = vld [vmem:[%s6229_s11 + $0x30] sm:$0xff] }
 0x25f   :  { %v1787_v21 = vsub.f32 1.0, %v1786_v7  ;;  %v1834_v39 = vmul.f32 %v1783_v14, %v5552_v5  ;;  %v1809_v27 = vand.u32 2147483647, %v1708_v2 }
 0x260   :  { %v1812_v51 = vor.u32 1.1754944e-38, %v1811_v20 }
 0x261   :  { %v1788_v49 = vmul.f32 %v3652_v18, %v1787_v21  ;;  %v5612_v47 = vmul.f32 %v1834_v39, %v5461_v34  ;;  %vm1810_vm0 = vcmp.eq.f32.partialorder %v1809_v27, 8.507059e+37  ;;  %v5645_v21 = vpop.f32.mrf.mxu2  ;;  %v3547_v39 = vld [vmem:[%s6229_s11 + $0x20] sm:$0xff] }
 0x263   :  { %v3654_v11 = vpop.eup %3653  ;;  %v1789_v60 = vadd.f32 %v3652_v18, %v1788_v49 }
 0x264   :  { %v3656_v61 = vpop.eup %3655  ;;  %v1709_v4 = vadd.f32 1.0, %v3654_v11 }
 0x265   :  { %v1793_v59 = vsel %vm1792_vm12, %v3652_v18, %v1789_v60  ;;  %v1801_v24 = vmul.f32 %v3656_v61, %v1708_v2  ;;  %vm1806_vm11 = vweird.f32 %v3656_v61  ;;  %v3550_v18 = vld [vmem:[%s6229_s11 + $0x38] sm:$0xff] }
 0x266   :  { %v1798_v29 = vsel %vm1795_vm7, %v1797_v23, %v1793_v59  ;;  %3657 = vrcp.f32 %v1709_v4  ;;  %vm1807_vm15 = vmor %vm1805_vm1, %vm1806_vm11  ;;  %v1826_v30 = vand.u32 2147483648, %v1709_v4  ;;  %v1824_v19 = vand.u32 2147483647, %v1709_v4  ;;  %2224 = vmatpush.bf16.msra.mxu3 %v3550_v18 }
 0x267   :  { %v1835_v44 = vmul.f32 %v1798_v29, %v5567_v43  ;;  %v1802_v52 = vsub.f32 1.0, %v1801_v24  ;;  %vm1820_vm5 = vweird.f32 %v1709_v4 }
 0x268   :  { %v1827_v42 = vor.u32 1.1754944e-38, %v1826_v30  ;;  %vm1825_vm2 = vcmp.eq.f32.partialorder %v1824_v19, 8.507059e+37 }
 0x269   :  { %v1803_v9 = vmul.f32 %v3656_v61, %v1802_v52  ;;  %v5615_v28 = vmul.f32 %v1835_v44, %v5458_v12  ;;  %v2126_v59 = vpop.f32.mrf.mxu2  ;;  %v3546_v52 = vld [vmem:[%s6229_s11 + $0x18] sm:$0xff] }
 0x26a   :  { %2225 = vmatpush.bf16.msra.mxu3 %v3549_v36 }
 0x26b   :  { %v1804_v63 = vadd.f32 %v3656_v61, %v1803_v9  ;;  %v1848_v5 = vpack.c.bf16 %v5615_v28, %v5612_v47 }
 0x26c   :  { %v3658_v32 = vpop.eup %3657 }
 0x26d   :  { %v1816_v1 = vmul.f32 %v3658_v32, %v1709_v4  ;;  %1936 = vmatmul.bf16.gmra.mxu1 %v1848_v5  ;;  %v1808_v43 = vsel %vm1807_vm15, %v3656_v61, %v1804_v63  ;;  %vm1821_vm8 = vweird.f32 %v3658_v32 }
 0x26e   :  { %v1813_v3 = vsel %vm1810_vm0, %v1812_v51, %v1808_v43  ;;  %vm1822_vm4 = vmor %vm1820_vm5, %vm1821_vm8  ;;  %2226 = vmatpush.bf16.msra.mxu3 %v3548_v53 }
 0x26f   :  { %v1817_v62 = vsub.f32 1.0, %v1816_v1  ;;  %v1836_v45 = vmul.f32 %v1813_v3, %v5587_v57 }
 0x271   :  { %v1818_v15 = vmul.f32 %v3658_v32, %v1817_v62  ;;  %v5622_v46 = vmul.f32 %v1836_v45, %v5470_v13 }
 0x272   :  { %2227 = vmatpush.bf16.msra.mxu3 %v3547_v39 }
 0x273   :  { %v1819_v17 = vadd.f32 %v3658_v32, %v1818_v15  ;;  %v3545_v15 = vld [vmem:[%s6229_s11 + $0x10] sm:$0xff] }
 0x275   :  { %v1823_v10 = vsel %vm1822_vm4, %v3658_v32, %v1819_v17 }
 0x276   :  { %v1828_v16 = vsel %vm1825_vm2, %v1827_v42, %v1823_v10  ;;  %2228 = vmatpush.bf16.msra.mxu3 %v3546_v52 }
 0x277   :  { %v1837_v8 = vmul.f32 %v1828_v16, %v5595_v40  ;;  %v3544_v16 = vld [vmem:[%s6229_s11 + $0x8] sm:$0xff] }
 0x279   :  { %v5625_v55 = vmul.f32 %v1837_v8, %v5468_v35  ;;  %v5685_v8 = vpop.f32.mrf.mxu2 }
 0x27a   :  { %2229 = vmatpush.bf16.msra.mxu3 %v3545_v15 }
 0x27b   :  { %v1849_v50 = vpack.c.bf16 %v5625_v55, %v5622_v46 }
 0x27d   :  { %1941 = vmatmul.bf16.gmra.mxu1 %v1849_v50 }
 0x27e   :  { %2230 = vmatpush.bf16.msra.mxu3 %v3544_v16 }
 0x2ca   :  { %v1927_v57 = vpop.f32.mrf.mxu1 }
 0x2cb   :  { %v5635_v31 = vadd.f32 %v5632_v33, %v1927_v57 }
 0x2cd   :  { %v3298_v40 = vmul.f32 -1.442695, %v5635_v31 }
 0x2cf   :  { %3659 = vpow2.f32 %v3298_v40  ;;  %v5690_v40 = vld [vmem:[%s6223_s10] ss:$0 sm:$0xff] }
 0x2d2   :  { %v1929_v54 = vpop.f32.mrf.mxu1 }
 0x2d3   :  { %v5642_v2 = vadd.f32 %v5632_v33, %v1929_v54 }
 0x2d5   :  { %v3660_v6 = vpop.eup %3659  ;;  %v3299_v7 = vmul.f32 -1.442695, %v5642_v2 }
 0x2d6   :  { %v1971_v58 = vadd.f32 1.0, %v3660_v6 }
 0x2d7   :  { %3661 = vpow2.f32 %v3299_v7 }
 0x2d8   :  { %3663 = vrcp.f32 %v1971_v58  ;;  %v1990_v20 = vand.u32 2147483648, %v1971_v58  ;;  %vm1984_vm6 = vweird.f32 %v1971_v58  ;;  %v1988_v1 = vand.u32 2147483647, %v1971_v58 }
 0x2da   :  { %v1932_v0 = vpop.f32.mrf.mxu1  ;;  %v1991_v19 = vor.u32 1.1754944e-38, %v1990_v20  ;;  %vm1989_vm3 = vcmp.eq.f32.partialorder %v1988_v1, 8.507059e+37 }
 0x2db   :  { %v5651_v49 = vadd.f32 %v5632_v33, %v1932_v0 }
 0x2dd   :  { %v3662_v14 = vpop.eup %3661  ;;  %v3300_v11 = vmul.f32 -1.442695, %v5651_v49 }
 0x2de   :  { %v3664_v60 = vpop.eup %3663  ;;  %v1972_v61 = vadd.f32 1.0, %v3662_v14 }
 0x2df   :  { %v1980_v23 = vmul.f32 %v3664_v60, %v1971_v58  ;;  %3665 = vpow2.f32 %v3300_v11  ;;  %vm1985_vm9 = vweird.f32 %v3664_v60  ;;  %v2125_v11 = vadd.f32 %v5690_v40, %v5645_v21 }
 0x2e0   :  { %3667 = vrcp.f32 %v1972_v61  ;;  %vm5669_vm10 = vmor %vm1984_vm6, %vm1985_vm9  ;;  %v2003_v3 = vand.u32 2147483647, %v1972_v61  ;;  %v2005_v17 = vand.u32 2147483648, %v1972_v61  ;;  %vm1999_vm14 = vweird.f32 %v1972_v61 }
 0x2e1   :  { %v1981_v4 = vsub.f32 1.0, %v1980_v23 }
 0x2e2   :  { %v1934_v24 = vpop.f32.mrf.mxu1  ;;  %vm2004_vm7 = vcmp.eq.f32.partialorder %v2003_v3, 8.507059e+37  ;;  %v2006_v7 = vor.u32 1.1754944e-38, %v2005_v17 }
 0x2e3   :  { %v1982_v29 = vmul.f32 %v3664_v60, %v1981_v4  ;;  %v5661_v44 = vadd.f32 %v5632_v33, %v1934_v24  ;;  %v3543_v4 = vld [vmem:[%s6229_s11] sm:$0xff] }
 0x2e4   :  { %2231 = vmatpush.bf16.msra.mxu3 %v3543_v4 }
 0x2e5   :  { %v3666_v9 = vpop.eup %3665  ;;  %v1983_v63 = vadd.f32 %v3664_v60, %v1982_v29  ;;  %v3301_v5 = vmul.f32 -1.442695, %v5661_v44 }
 0x2e6   :  { %v3668_v32 = vpop.eup %3667  ;;  %v5667_v27 = vadd.f32 1.0, %v3666_v9 }
 0x2e7   :  { %v1995_v43 = vmul.f32 %v3668_v32, %v1972_v61  ;;  %3669 = vpow2.f32 %v3301_v5  ;;  %v1987_v51 = vsel %vm5669_vm10, %v3664_v60, %v1983_v63  ;;  %vm2000_vm13 = vweird.f32 %v3668_v32  ;;  %v2131_v5 = vpop.f32.mrf.mxu2 }
 0x2e8   :  { %3671 = vrcp.f32 %v5667_v27  ;;  %v1992_v50 = vsel %vm1989_vm3, %v1991_v19, %v1987_v51  ;;  %vm2001_vm12 = vmor %vm1999_vm14, %vm2000_vm13  ;;  %v2127_v60 = vadd.f32 %v5690_v40, %v2126_v59  ;;  %vm2014_vm1 = vweird.f32 %v5667_v27 }
 0x2e9   :  { %v1996_v30 = vsub.f32 1.0, %v1995_v43  ;;  %v2099_v36 = vmul.f32 %v1992_v50, %v5635_v31  ;;  %v2018_v1 = vand.u32 2147483647, %v5667_v27 }
 0x2ea   :  { %v1937_v42 = vpop.f32.mrf.mxu1 }
 0x2eb   :  { %v1997_v45 = vmul.f32 %v3668_v32, %v1996_v30  ;;  %v5680_v10 = vadd.f32 %v5632_v33, %v1937_v42  ;;  %v2144_v29 = vmul.f32 %v2125_v11, %v2099_v36  ;;  %vm2019_vm0 = vcmp.eq.f32.partialorder %v2018_v1, 8.507059e+37 }
 0x2ed   :  { %v3670_v57 = vpop.eup %3669  ;;  %v1998_v18 = vadd.f32 %v3668_v32, %v1997_v45  ;;  %v3302_v54 = vmul.f32 -1.442695, %v5680_v10 }
 0x2ee   :  { %v3672_v6 = vpop.eup %3671  ;;  %v1974_v58 = vadd.f32 1.0, %v3670_v57 }
 0x2ef   :  { %v2002_v0 = vsel %vm2001_vm12, %v3668_v32, %v1998_v18  ;;  %v2010_v53 = vmul.f32 %v3672_v6, %v5667_v27  ;;  %3673 = vpow2.f32 %v3302_v54  ;;  %vm2015_vm11 = vweird.f32 %v3672_v6 }
 0x2f0   :  { %v2007_v14 = vsel %vm2004_vm7, %v2006_v7, %v2002_v0  ;;  %3675 = vrcp.f32 %v1974_v58  ;;  %v2020_v32 = vand.u32 2147483648, %v5667_v27  ;;  %vm2016_vm15 = vmor %vm2014_vm1, %vm2015_vm11  ;;  %v2033_v15 = vand.u32 2147483647, %v1974_v58  ;;  %v2134_v0 = vpop.f32.mrf.mxu2 }
 0x2f1   :  { %v2100_v61 = vmul.f32 %v2007_v14, %v5642_v2  ;;  %v2011_v23 = vsub.f32 1.0, %v2010_v53  ;;  %v2035_v19 = vand.u32 2147483648, %v1974_v58  ;;  %vm2029_vm5 = vweird.f32 %v1974_v58 }
 0x2f2   :  { %v1939_v31 = vpop.f32.mrf.mxu1  ;;  %v2021_v30 = vor.u32 1.1754944e-38, %v2020_v32  ;;  %vm2034_vm2 = vcmp.eq.f32.partialorder %v2033_v15, 8.507059e+37  ;;  %v2130_v14 = vadd.f32 %v5690_v40, %v5685_v8  ;;  %v3557_v32 = vld [vmem:[%s6227_s7 + $0x70] sm:$0xff] }
 0x2f3   :  { %v2012_v39 = vmul.f32 %v3672_v6, %v2011_v23  ;;  %v5703_v24 = vadd.f32 %v5632_v33, %v1939_v31  ;;  %v2145_v52 = vmul.f32 %v2127_v60, %v2100_v61  ;;  %v2036_v18 = vor.u32 1.1754944e-38, %v2035_v19 }
 0x2f5   :  { %v3674_v9 = vpop.eup %3673  ;;  %v2013_v63 = vadd.f32 %v3672_v6, %v2012_v39  ;;  %v3303_v21 = vmul.f32 -1.442695, %v5703_v24  ;;  %v2152_v59 = vpack.c.bf16 %v2145_v52, %v2144_v29 }
 0x2f6   :  { %v3676_v2 = vpop.eup %3675  ;;  %v5707_v20 = vadd.f32 1.0, %v3674_v9 }
 0x2f7   :  { %v2025_v43 = vmul.f32 %v3676_v2, %v1974_v58  ;;  %3677 = vpow2.f32 %v3303_v21  ;;  %2232 = vmatmul.bf16.vlgmr.msra.gmra.mxu3 %v2152_v59  ;;  %v2017_v62 = vsel %vm2016_vm15, %v3672_v6, %v2013_v63  ;;  %vm2030_vm8 = vweird.f32 %v3676_v2 }
 0x2f8   :  { %3679 = vrcp.f32 %v5707_v20  ;;  %v2022_v45 = vsel %vm2019_vm0, %v2021_v30, %v2017_v62  ;;  %vm2031_vm4 = vmor %vm2029_vm5, %vm2030_vm8  ;;  %v2132_v58 = vadd.f32 %v5690_v40, %v2131_v5  ;;  %v2050_v8 = vand.u32 2147483648, %v5707_v20  ;;  %v2136_v1 = vpop.f32.mrf.mxu2 }
 0x2f9   :  { %v2026_v51 = vsub.f32 1.0, %v2025_v43  ;;  %v2101_v6 = vmul.f32 %v2022_v45, %v5651_v49  ;;  %vm2044_vm6 = vweird.f32 %v5707_v20 }
 0x2fa   :  { %v1942_v3 = vpop.f32.mrf.mxu1  ;;  %v2051_v43 = vor.u32 1.1754944e-38, %v2050_v8 }
 0x2fb   :  { %v2027_v17 = vmul.f32 %v3676_v2, %v2026_v51  ;;  %v5713_v42 = vadd.f32 %v5632_v33, %v1942_v3  ;;  %v2146_v49 = vmul.f32 %v2130_v14, %v2101_v6  ;;  %v3556_v3 = vld [vmem:[%s6227_s7 + $0x68] sm:$0xff]  ;;  %v2135_v6 = vadd.f32 %v5690_v40, %v2134_v0 }
 0x2fd   :  { %v3678_v27 = vpop.eup %3677  ;;  %v2028_v16 = vadd.f32 %v3676_v2, %v2027_v17  ;;  %v3304_v50 = vmul.f32 -1.442695, %v5713_v42 }
 0x2fe   :  { %v3680_v57 = vpop.eup %3679  ;;  %v1976_v54 = vadd.f32 1.0, %v3678_v27 }
 0x2ff   :  { %v2032_v7 = vsel %vm2031_vm4, %v3676_v2, %v2028_v16  ;;  %v2040_v36 = vmul.f32 %v3680_v57, %v5707_v20  ;;  %3681 = vpow2.f32 %v3304_v50  ;;  %vm2045_vm9 = vweird.f32 %v3680_v57 }
 0x300   :  { %v2037_v53 = vsel %vm2034_vm2, %v2036_v18, %v2032_v7  ;;  %3683 = vrcp.f32 %v1976_v54  ;;  %vm2046_vm10 = vmor %vm2044_vm6, %vm2045_vm9  ;;  %v2065_v62 = vand.u32 2147483648, %v1976_v54  ;;  %v2063_v51 = vand.u32 2147483647, %v1976_v54 }
 0x301   :  { %v2102_v11 = vmul.f32 %v2037_v53, %v5661_v44  ;;  %v2041_v60 = vsub.f32 1.0, %v2040_v36  ;;  %v2048_v44 = vand.u32 2147483647, %v5707_v20  ;;  %vm2059_vm14 = vweird.f32 %v1976_v54 }
 0x302   :  { %v1944_v61 = vpop.f32.mrf.mxu1  ;;  %v2066_v45 = vor.u32 1.1754944e-38, %v2065_v62  ;;  %vm2064_vm7 = vcmp.eq.f32.partialorder %v2063_v51, 8.507059e+37  ;;  %v5749_v51 = vld [vmem:[%s6228_s12] ss:$0 sm:$0xff] }
 0x303   :  { %v2042_v23 = vmul.f32 %v3680_v57, %v2041_v60  ;;  %v5723_v4 = vadd.f32 %v5632_v33, %v1944_v61  ;;  %v2147_v31 = vmul.f32 %v2132_v58, %v2102_v11  ;;  %v3558_v33 = vld [vmem:[%s6227_s7 + $0x78] sm:$0xff]  ;;  %vm2049_vm3 = vcmp.eq.f32.partialorder %v2048_v44, 8.507059e+37  ;;  %v2139_v11 = vpop.f32.mrf.mxu2 }
 0x304   :  { %2503 = vmatpush.bf16.msrb.mxu0 %v3558_v33 }
 0x305   :  { %v3682_v39 = vpop.eup %3681  ;;  %v2043_v29 = vadd.f32 %v3680_v57, %v2042_v23  ;;  %v3305_v52 = vmul.f32 -1.442695, %v5723_v4  ;;  %v2153_v9 = vpack.c.bf16 %v2147_v31, %v2146_v49 }
 0x306   :  { %v3684_v63 = vpop.eup %3683  ;;  %v1977_v21 = vadd.f32 1.0, %v3682_v39 }
 0x307   :  { %v2055_v59 = vmul.f32 %v3684_v63, %v1976_v54  ;;  %3685 = vpow2.f32 %v3305_v52  ;;  %2237 = vmatmul.bf16.gmra.mxu3 %v2153_v9  ;;  %v2047_v2 = vsel %vm2046_vm10, %v3680_v57, %v2043_v29  ;;  %vm2060_vm13 = vweird.f32 %v3684_v63 }
 0x308   :  { %3687 = vrcp.f32 %v1977_v21  ;;  %v2052_v30 = vsel %vm2049_vm3, %v2051_v43, %v2047_v2  ;;  %2504 = vmatpush.bf16.msrb.mxu0 %v3557_v32  ;;  %vm2061_vm12 = vmor %vm2059_vm14, %vm2060_vm13  ;;  %v2137_v54 = vadd.f32 %v5690_v40, %v2136_v1  ;;  %v2080_v23 = vand.u32 2147483648, %v1977_v21 }
 0x309   :  { %v2056_v5 = vsub.f32 1.0, %v2055_v59  ;;  %v2103_v16 = vmul.f32 %v2052_v30, %v5680_v10  ;;  %vm2074_vm1 = vweird.f32 %v1977_v21  ;;  %v2078_v49 = vand.u32 2147483647, %v1977_v21 }
 0x30a   :  { %v2081_v29 = vor.u32 1.1754944e-38, %v2080_v23 }
 0x30b   :  { %v2057_v20 = vmul.f32 %v3684_v63, %v2056_v5  ;;  %v2148_v14 = vmul.f32 %v2135_v6, %v2103_v16  ;;  %vm2079_vm0 = vcmp.eq.f32.partialorder %v2078_v49, 8.507059e+37  ;;  %v2141_v44 = vpop.f32.mrf.mxu2  ;;  %v2140_v5 = vadd.f32 %v5690_v40, %v2139_v11 }
 0x30c   :  { %2505 = vmatpush.bf16.msrb.mxu0 %v3556_v3  ;;  %v2142_v32 = vadd.f32 %v5690_v40, %v2141_v44  ;;  %v3554_v3 = vld [vmem:[%s6227_s7 + $0x58] sm:$0xff] }
 0x30d   :  { %v3686_v15 = vpop.eup %3685  ;;  %v2058_v19 = vadd.f32 %v3684_v63, %v2057_v20 }
 0x30e   :  { %v3688_v17 = vpop.eup %3687  ;;  %v1978_v27 = vadd.f32 1.0, %v3686_v15  ;;  %v3555_v15 = vld [vmem:[%s6227_s7 + $0x60] sm:$0xff] }
 0x30f   :  { %v2062_v50 = vsel %vm2061_vm12, %v3684_v63, %v2058_v19  ;;  %v2070_v57 = vmul.f32 %v3688_v17, %v1977_v21  ;;  %vm2075_vm11 = vweird.f32 %v3688_v17 }
 0x310   :  { %v2067_v18 = vsel %vm2064_vm7, %v2066_v45, %v2062_v50  ;;  %3689 = vrcp.f32 %v1978_v27  ;;  %vm2076_vm15 = vmor %vm2074_vm1, %vm2075_vm11  ;;  %v2093_v9 = vand.u32 2147483647, %v1978_v27  ;;  %vm2089_vm5 = vweird.f32 %v1978_v27  ;;  %2506 = vmatpush.bf16.msrb.mxu0 %v3555_v15 }
 0x311   :  { %v2104_v7 = vmul.f32 %v2067_v18, %v5703_v24  ;;  %v2071_v36 = vsub.f32 1.0, %v2070_v57  ;;  %v2095_v24 = vand.u32 2147483648, %v1978_v27  ;;  %v3553_v57 = vld [vmem:[%s6227_s7 + $0x50] sm:$0xff] }
 0x312   :  { %vm2094_vm2 = vcmp.eq.f32.partialorder %v2093_v9, 8.507059e+37 }
 0x313   :  { %v2072_v53 = vmul.f32 %v3688_v17, %v2071_v36  ;;  %v2149_v58 = vmul.f32 %v2137_v54, %v2104_v7  ;;  %v2096_v59 = vor.u32 1.1754944e-38, %v2095_v24 }
 0x314   :  { %2507 = vmatpush.bf16.msrb.mxu0 %v3554_v3 }
 0x315   :  { %v2073_v60 = vadd.f32 %v3688_v17, %v2072_v53  ;;  %v2154_v10 = vpack.c.bf16 %v2149_v58, %v2148_v14 }
 0x316   :  { %v3690_v61 = vpop.eup %3689 }
 0x317   :  { %v2085_v31 = vmul.f32 %v3690_v61, %v1978_v27  ;;  %2242 = vmatmul.bf16.gmra.mxu3 %v2154_v10  ;;  %v2077_v0 = vsel %vm2076_vm15, %v3688_v17, %v2073_v60  ;;  %vm2090_vm8 = vweird.f32 %v3690_v61  ;;  %v3552_v60 = vld [vmem:[%s6227_s7 + $0x48] sm:$0xff] }
 0x318   :  { %v2082_v63 = vsel %vm2079_vm0, %v2081_v29, %v2077_v0  ;;  %vm2091_vm4 = vmor %vm2089_vm5, %vm2090_vm8  ;;  %2508 = vmatpush.bf16.msrb.mxu0 %v3553_v57 }
 0x319   :  { %v2086_v39 = vsub.f32 1.0, %v2085_v31  ;;  %v2105_v33 = vmul.f32 %v2082_v63, %v5713_v42 }
 0x31b   :  { %v2087_v52 = vmul.f32 %v3690_v61, %v2086_v39  ;;  %v2150_v43 = vmul.f32 %v2140_v5, %v2105_v33 }
 0x31c   :  { %2509 = vmatpush.bf16.msrb.mxu0 %v3552_v60 }
 0x31d   :  { %v2088_v8 = vadd.f32 %v3690_v61, %v2087_v52 }
 0x31f   :  { %v2092_v21 = vsel %vm2091_vm4, %v3690_v61, %v2088_v8 }
 0x320   :  { %v2097_v2 = vsel %vm2094_vm2, %v2096_v59, %v2092_v21  ;;  %v3551_v21 = vld [vmem:[%s6227_s7 + $0x40] sm:$0xff] }
 0x321   :  { %v2106_v1 = vmul.f32 %v2097_v2, %v5723_v4  ;;  %2510 = vmatpush.bf16.msrb.mxu0 %v3551_v21 }
 0x323   :  { %v2151_v62 = vmul.f32 %v2142_v32, %v2106_v1 }
 0x325   :  { %v2155_v20 = vpack.c.bf16 %v2151_v62, %v2150_v43 }
 0x327   :  { %2247 = vmatmul.bf16.gmra.mxu3 %v2155_v20 }
 0x37a   :  { %v2233_v30 = vpop.f32.mrf.mxu3 }
 0x37b   :  { %v5752_v42 = vadd.f32 %v5749_v51, %v2233_v30 }
 0x37d   :  { %v3342_v40 = vmul.f32 -1.442695, %v5752_v42 }
 0x37f   :  { %3691 = vpow2.f32 %v3342_v40 }
 0x382   :  { %v2235_v4 = vpop.f32.mrf.mxu3 }
 0x383   :  { %v5759_v19 = vadd.f32 %v5749_v51, %v2235_v4 }
 0x385   :  { %v3692_v17 = vpop.eup %3691  ;;  %v3343_v45 = vmul.f32 -1.442695, %v5759_v19 }
 0x386   :  { %v2277_v27 = vadd.f32 1.0, %v3692_v17 }
 0x387   :  { %3693 = vpow2.f32 %v3343_v45 }
 0x388   :  { %3695 = vrcp.f32 %v2277_v27  ;;  %v2296_v31 = vand.u32 2147483648, %v2277_v27  ;;  %vm2290_vm6 = vweird.f32 %v2277_v27  ;;  %v2294_v39 = vand.u32 2147483647, %v2277_v27 }
 0x38a   :  { %v2238_v16 = vpop.f32.mrf.mxu3  ;;  %v2297_v9 = vor.u32 1.1754944e-38, %v2296_v31  ;;  %vm2295_vm3 = vcmp.eq.f32.partialorder %v2294_v39, 8.507059e+37 }
 0x38b   :  { %v5766_v50 = vadd.f32 %v5749_v51, %v2238_v16 }
 0x38d   :  { %v3694_v18 = vpop.eup %3693  ;;  %v3344_v6 = vmul.f32 -1.442695, %v5766_v50 }
 0x38e   :  { %v3696_v54 = vpop.eup %3695  ;;  %v2278_v7 = vadd.f32 1.0, %v3694_v18 }
 0x38f   :  { %v2286_v36 = vmul.f32 %v3696_v54, %v2277_v27  ;;  %3697 = vpow2.f32 %v3344_v6  ;;  %vm2291_vm9 = vweird.f32 %v3696_v54 }
 0x390   :  { %3699 = vrcp.f32 %v2278_v7  ;;  %vm2292_vm10 = vmor %vm2290_vm6, %vm2291_vm9  ;;  %v2309_v63 = vand.u32 2147483647, %v2278_v7  ;;  %v2311_v8 = vand.u32 2147483648, %v2278_v7  ;;  %vm2305_vm14 = vweird.f32 %v2278_v7 }
 0x391   :  { %v2287_v53 = vsub.f32 1.0, %v2286_v36 }
 0x392   :  { %v2240_v14 = vpop.f32.mrf.mxu3  ;;  %vm2310_vm7 = vcmp.eq.f32.partialorder %v2309_v63, 8.507059e+37  ;;  %v2312_v62 = vor.u32 1.1754944e-38, %v2311_v8 }
 0x393   :  { %v2288_v58 = vmul.f32 %v3696_v54, %v2287_v53  ;;  %v5773_v11 = vadd.f32 %v5749_v51, %v2240_v14 }
 0x395   :  { %v3698_v10 = vpop.eup %3697  ;;  %v2289_v61 = vadd.f32 %v3696_v54, %v2288_v58  ;;  %v3345_v23 = vmul.f32 -1.442695, %v5773_v11 }
 0x396   :  { %v3700_v49 = vpop.eup %3699  ;;  %v2279_v0 = vadd.f32 1.0, %v3698_v10 }
 0x397   :  { %v2301_v29 = vmul.f32 %v3700_v49, %v2278_v7  ;;  %3701 = vpow2.f32 %v3345_v23  ;;  %v2293_v24 = vsel %vm2292_vm10, %v3696_v54, %v2289_v61  ;;  %vm2306_vm13 = vweird.f32 %v3700_v49 }
 0x398   :  { %3703 = vrcp.f32 %v2279_v0  ;;  %v2298_v2 = vsel %vm2295_vm3, %v2297_v9, %v2293_v24  ;;  %vm2307_vm12 = vmor %vm2305_vm14, %vm2306_vm13  ;;  %v2326_v54 = vand.u32 2147483648, %v2279_v0  ;;  %vm2320_vm1 = vweird.f32 %v2279_v0 }
 0x399   :  { %v2302_v52 = vsub.f32 1.0, %v2301_v29  ;;  %v2405_v30 = vmul.f32 %v2298_v2, %v5752_v42  ;;  %v2324_v53 = vand.u32 2147483647, %v2279_v0 }
 0x39a   :  { %v2243_v44 = vpop.f32.mrf.mxu3  ;;  %v2327_v60 = vor.u32 1.1754944e-38, %v2326_v54 }
 0x39b   :  { %v2303_v59 = vmul.f32 %v3700_v49, %v2302_v52  ;;  %v5780_v33 = vadd.f32 %v5749_v51, %v2243_v44  ;;  %v2413_v27 = vadd.f32 %v2405_v30, %v5570_v37  ;;  %vm2325_vm0 = vcmp.eq.f32.partialorder %v2324_v53, 8.507059e+37  ;;  %v3566_v53 = vld [vmem:[%s6229_s11 + $0x78] sm:$0xff] }
 0x39c   :  { %3583 = vmatpush.bf16.msrb.mxu1 %v3566_v53  ;;  %2813 = vmatpush.bf16.msra.mxu0 %v3566_v53  ;;  %v5868_v53 = vpop.f32.mrf.mxu2 }
 0x39d   :  { %v3702_v5 = vpop.eup %3701  ;;  %v2304_v32 = vadd.f32 %v3700_v49, %v2303_v59  ;;  %v3346_v1 = vmul.f32 -1.442695, %v5780_v33 }
 0x39e   :  { %v3704_v43 = vpop.eup %3703  ;;  %v2280_v20 = vadd.f32 1.0, %v3702_v5 }
 0x39f   :  { %v2308_v15 = vsel %vm2307_vm12, %v3700_v49, %v2304_v32  ;;  %v2316_v40 = vmul.f32 %v3704_v43, %v2279_v0  ;;  %3705 = vpow2.f32 %v3346_v1  ;;  %vm2321_vm11 = vweird.f32 %v3704_v43 }
 0x3a0   :  { %v2313_v4 = vsel %vm2310_vm7, %v2312_v62, %v2308_v15  ;;  %3707 = vrcp.f32 %v2280_v20  ;;  %vm2322_vm15 = vmor %vm2320_vm1, %vm2321_vm11  ;;  %v2339_v23 = vand.u32 2147483647, %v2280_v20  ;;  %v2341_v49 = vand.u32 2147483648, %v2280_v20 }
 0x3a1   :  { %v2406_v3 = vmul.f32 %v2313_v4, %v5759_v19  ;;  %v2317_v17 = vsub.f32 1.0, %v2316_v40  ;;  %vm2335_vm5 = vweird.f32 %v2280_v20 }
 0x3a2   :  { %v2245_v45 = vpop.f32.mrf.mxu3  ;;  %v2342_v44 = vor.u32 1.1754944e-38, %v2341_v49  ;;  %vm2340_vm2 = vcmp.eq.f32.partialorder %v2339_v23, 8.507059e+37 }
 0x3a3   :  { %v2414_v16 = vadd.f32 %v2406_v3, %v5573_v22  ;;  %v2318_v57 = vmul.f32 %v3704_v43, %v2317_v17  ;;  %v5791_v18 = vadd.f32 %v5749_v51, %v2245_v45  ;;  %v5798_v22 = vmul.f32 %v2413_v27, %v5366_v26 }
 0x3a5   :  { %v3706_v6 = vpop.eup %3705  ;;  %v2319_v42 = vadd.f32 %v3704_v43, %v2318_v57  ;;  %v3347_v7 = vmul.f32 -1.442695, %v5791_v18  ;;  %v5795_v36 = vmul.f32 %v2414_v16, %v5348_v25 }
 0x3a6   :  { %v3708_v19 = vpop.eup %3707  ;;  %v2281_v14 = vadd.f32 1.0, %v3706_v6 }
 0x3a7   :  { %v2331_v37 = vmul.f32 %v3708_v19, %v2280_v20  ;;  %3709 = vpow2.f32 %v3347_v7  ;;  %v2323_v58 = vsel %vm2322_vm15, %v3704_v43, %v2319_v42  ;;  %v2429_v61 = vpack.c.bf16 %v5795_v36, %v5798_v22 }
 0x3a8   :  { %3711 = vrcp.f32 %v2281_v14  ;;  %v2328_v39 = vsel %vm2325_vm0, %v2327_v60, %v2323_v58  ;;  %vm2336_vm8 = vweird.f32 %v3708_v19  ;;  %vm2350_vm6 = vweird.f32 %v2281_v14 }
 0x3a9   :  { %v2332_v10 = vsub.f32 1.0, %v2331_v37  ;;  %2511 = vmatmul.bf16.vlgmr.msrb.gmra.mxu0 %v2429_v61  ;;  %v2407_v8 = vmul.f32 %v2328_v39, %v5766_v50  ;;  %vm2337_vm4 = vmor %vm2335_vm5, %vm2336_vm8  ;;  %v2356_v15 = vand.u32 2147483648, %v2281_v14  ;;  %v2354_v3 = vand.u32 2147483647, %v2281_v14 }
 0x3aa   :  { %v2248_v31 = vpop.f32.mrf.mxu3 }
 0x3ab   :  { %v2333_v0 = vmul.f32 %v3708_v19, %v2332_v10  ;;  %v5803_v29 = vadd.f32 %v5749_v51, %v2248_v31  ;;  %v2415_v43 = vadd.f32 %v2407_v8, %v5598_v41  ;;  %vm2355_vm3 = vcmp.eq.f32.partialorder %v2354_v3, 8.507059e+37 }
 0x3ad   :  { %v3710_v24 = vpop.eup %3709  ;;  %v2334_v52 = vadd.f32 %v3708_v19, %v2333_v0  ;;  %v3348_v9 = vmul.f32 -1.442695, %v5803_v29  ;;  %v5818_v16 = vmul.f32 %v2415_v43, %v5424_v48 }
 0x3ae   :  { %v3712_v63 = vpop.eup %3711  ;;  %v2282_v59 = vadd.f32 1.0, %v3710_v24 }
 0x3af   :  { %v2338_v21 = vsel %vm2337_vm4, %v3708_v19, %v2334_v52  ;;  %v2346_v2 = vmul.f32 %v3712_v63, %v2281_v14  ;;  %3713 = vpow2.f32 %v3348_v9  ;;  %vm2351_vm9 = vweird.f32 %v3712_v63 }
 0x3b0   :  { %v2343_v5 = vsel %vm2340_vm2, %v2342_v44, %v2338_v21  ;;  %3715 = vrcp.f32 %v2282_v59  ;;  %vm2352_vm10 = vmor %vm2350_vm6, %vm2351_vm9  ;;  %v2371_v54 = vand.u32 2147483648, %v2282_v59  ;;  %v2369_v19 = vand.u32 2147483647, %v2282_v59 }
 0x3b1   :  { %v2408_v32 = vmul.f32 %v2343_v5, %v5773_v11  ;;  %v2347_v1 = vsub.f32 1.0, %v2346_v2  ;;  %vm2365_vm14 = vweird.f32 %v2282_v59 }
 0x3b2   :  { %v2250_v62 = vpop.f32.mrf.mxu3  ;;  %v2372_v10 = vor.u32 1.1754944e-38, %v2371_v54  ;;  %vm2370_vm7 = vcmp.eq.f32.partialorder %v2369_v19, 8.507059e+37 }
 0x3b3   :  { %v2416_v20 = vadd.f32 %v2408_v32, %v5601_v38  ;;  %v2348_v30 = vmul.f32 %v3712_v63, %v2347_v1  ;;  %v5811_v50 = vadd.f32 %v5749_v51, %v2250_v62  ;;  %v2357_v51 = vor.u32 1.1754944e-38, %v2356_v15 }
 0x3b5   :  { %v3714_v40 = vpop.eup %3713  ;;  %v2349_v4 = vadd.f32 %v3712_v63, %v2348_v30  ;;  %v3349_v17 = vmul.f32 -1.442695, %v5811_v50  ;;  %v5815_v11 = vmul.f32 %v2416_v20, %v5420_v56 }
 0x3b6   :  { %v3716_v45 = vpop.eup %3715  ;;  %v2283_v41 = vadd.f32 1.0, %v3714_v40 }
 0x3b7   :  { %v2353_v27 = vsel %vm2352_vm10, %v3712_v63, %v2349_v4  ;;  %v2361_v38 = vmul.f32 %v3716_v45, %v2282_v59  ;;  %3717 = vpow2.f32 %v3349_v17  ;;  %v2430_v6 = vpack.c.bf16 %v5815_v11, %v5818_v16 }
 0x3b8   :  { %3719 = vrcp.f32 %v2283_v41  ;;  %v2358_v42 = vsel %vm2355_vm3, %v2357_v51, %v2353_v27  ;;  %vm2366_vm13 = vweird.f32 %v3716_v45  ;;  %vm2380_vm1 = vweird.f32 %v2283_v41 }
 0x3b9   :  { %v2362_v57 = vsub.f32 1.0, %v2361_v38  ;;  %2516 = vmatmul.bf16.gmra.mxu0 %v2430_v6  ;;  %v2409_v37 = vmul.f32 %v2358_v42, %v5780_v33  ;;  %vm2367_vm12 = vmor %vm2365_vm14, %vm2366_vm13  ;;  %v2386_v9 = vand.u32 2147483648, %v2283_v41  ;;  %v2384_v8 = vand.u32 2147483647, %v2283_v41  ;;  %v5852_v38 = vld [vmem:[%s6226_s8 + $0x1] ss:$0 sm:$0xff] }
 0x3bb   :  { %v2363_v7 = vmul.f32 %v3716_v45, %v2362_v57  ;;  %v2417_v39 = vadd.f32 %v2409_v37, %v5612_v47  ;;  %vm2385_vm0 = vcmp.eq.f32.partialorder %v2384_v8, 8.507059e+37 }
 0x3bd   :  { %v3718_v14 = vpop.eup %3717  ;;  %v2364_v58 = vadd.f32 %v3716_v45, %v2363_v7  ;;  %v5830_v44 = vmul.f32 %v2417_v39, %v5461_v34  ;;  %v3564_v7 = vld [vmem:[%s6229_s11 + $0x68] sm:$0xff]  ;;  %v2713_v39 = vpop.f32.mrf.mxu2 }
 0x3be   :  { %v3720_v60 = vpop.eup %3719  ;;  %v2284_v61 = vadd.f32 1.0, %v3718_v14 }
 0x3bf   :  { %v2368_v23 = vsel %vm2367_vm12, %v3716_v45, %v2364_v58  ;;  %v2376_v49 = vmul.f32 %v3720_v60, %v2283_v41  ;;  %vm2381_vm11 = vweird.f32 %v3720_v60  ;;  %v3563_v58 = vld [vmem:[%s6229_s11 + $0x60] sm:$0xff] }
 0x3c0   :  { %v2373_v31 = vsel %vm2370_vm7, %v2372_v10, %v2368_v23  ;;  %3721 = vrcp.f32 %v2284_v61  ;;  %vm2382_vm15 = vmor %vm2380_vm1, %vm2381_vm11  ;;  %v2401_v1 = vand.u32 2147483648, %v2284_v61  ;;  %v2399_v62 = vand.u32 2147483647, %v2284_v61 }
 0x3c1   :  { %v2410_v0 = vmul.f32 %v2373_v31, %v5791_v18  ;;  %v2377_v24 = vsub.f32 1.0, %v2376_v49  ;;  %vm2395_vm5 = vweird.f32 %v2284_v61 }
 0x3c2   :  { %v2402_v15 = vor.u32 1.1754944e-38, %v2401_v1  ;;  %vm2400_vm2 = vcmp.eq.f32.partialorder %v2399_v62, 8.507059e+37 }
 0x3c3   :  { %v2418_v33 = vadd.f32 %v2410_v0, %v5615_v28  ;;  %v2378_v52 = vmul.f32 %v3720_v60, %v2377_v24  ;;  %v2387_v28 = vor.u32 1.1754944e-38, %v2386_v9 }
 0x3c5   :  { %v2379_v63 = vadd.f32 %v3720_v60, %v2378_v52  ;;  %v5833_v59 = vmul.f32 %v2418_v33, %v5458_v12  ;;  %v3562_v52 = vld [vmem:[%s6229_s11 + $0x58] sm:$0xff] }
 0x3c6   :  { %v3722_v21 = vpop.eup %3721 }
 0x3c7   :  { %v2383_v47 = vsel %vm2382_vm15, %v3720_v60, %v2379_v63  ;;  %v2391_v2 = vmul.f32 %v3722_v21, %v2284_v61  ;;  %v2431_v18 = vpack.c.bf16 %v5833_v59, %v5830_v44  ;;  %vm2396_vm8 = vweird.f32 %v3722_v21 }
 0x3c8   :  { %v2388_v32 = vsel %vm2385_vm0, %v2387_v28, %v2383_v47  ;;  %vm2397_vm4 = vmor %vm2395_vm5, %vm2396_vm8 }
 0x3c9   :  { %v2392_v5 = vsub.f32 1.0, %v2391_v2  ;;  %2521 = vmatmul.bf16.gmra.mxu0 %v2431_v18  ;;  %v2411_v20 = vmul.f32 %v2388_v32, %v5803_v29  ;;  %v3561_v32 = vld [vmem:[%s6229_s11 + $0x50] sm:$0xff] }
 0x3cb   :  { %v2393_v43 = vmul.f32 %v3722_v21, %v2392_v5  ;;  %v2419_v3 = vadd.f32 %v2411_v20, %v5622_v46 }
 0x3cd   :  { %v2394_v30 = vadd.f32 %v3722_v21, %v2393_v43  ;;  %v5842_v41 = vmul.f32 %v2419_v3, %v5470_v13 }
 0x3cf   :  { %v2398_v40 = vsel %vm2397_vm4, %v3722_v21, %v2394_v30 }
 0x3d0   :  { %v2403_v4 = vsel %vm2400_vm2, %v2402_v15, %v2398_v40  ;;  %v3560_v40 = vld [vmem:[%s6229_s11 + $0x48] sm:$0xff] }
 0x3d1   :  { %v2412_v17 = vmul.f32 %v2403_v4, %v5811_v50 }
 0x3d3   :  { %v2420_v45 = vadd.f32 %v2412_v17, %v5625_v55  ;;  %v3565_v55 = vld [vmem:[%s6229_s11 + $0x70] sm:$0xff]  ;;  %v5902_v17 = vpop.f32.mrf.mxu2 }
 0x3d4   :  { %3584 = vmatpush.bf16.msrb.mxu1 %v3565_v55  ;;  %2814 = vmatpush.bf16.msra.mxu0 %v3565_v55 }
 0x3d5   :  { %v5845_v27 = vmul.f32 %v2420_v45, %v5468_v35 }
 0x3d7   :  { %v2432_v29 = vpack.c.bf16 %v5845_v27, %v5842_v41 }
 0x3d8   :  { %3585 = vmatpush.bf16.msrb.mxu1 %v3564_v7  ;;  %2815 = vmatpush.bf16.msra.mxu0 %v3564_v7 }
 0x3d9   :  { %2526 = vmatmul.bf16.gmra.mxu0 %v2432_v29 }
 0x3dc   :  { %3586 = vmatpush.bf16.msrb.mxu1 %v3563_v58  ;;  %2816 = vmatpush.bf16.msra.mxu0 %v3563_v58 }
 0x3e0   :  { %3587 = vmatpush.bf16.msrb.mxu1 %v3562_v52  ;;  %2817 = vmatpush.bf16.msra.mxu0 %v3562_v52 }
 0x3e4   :  { %2818 = vmatpush.bf16.msra.mxu0 %v3561_v32  ;;  %3588 = vmatpush.bf16.msrb.mxu1 %v3561_v32 }
 0x3e8   :  { %2819 = vmatpush.bf16.msra.mxu0 %v3560_v40  ;;  %3589 = vmatpush.bf16.msrb.mxu1 %v3560_v40 }
 0x426   :  { %v2512_v46 = vpop.f32.mrf.mxu0 }
 0x427   :  { %v5855_v50 = vadd.f32 %v5852_v38, %v2512_v46  ;;  %v5907_v46 = vld [vmem:[%s6223_s10 + $0x1] ss:$0 sm:$0xff] }
 0x429   :  { %v3399_v51 = vmul.f32 -1.442695, %v5855_v50 }
 0x42b   :  { %3723 = vpow2.f32 %v3399_v51 }
 0x42e   :  { %v2514_v57 = vpop.f32.mrf.mxu0 }
 0x42f   :  { %v5862_v6 = vadd.f32 %v5852_v38, %v2514_v57 }
 0x431   :  { %v3724_v42 = vpop.eup %3723  ;;  %v3400_v54 = vmul.f32 -1.442695, %v5862_v6 }
 0x432   :  { %v2556_v19 = vadd.f32 1.0, %v3724_v42 }
 0x433   :  { %3725 = vpow2.f32 %v3400_v54 }
 0x434   :  { %3727 = vrcp.f32 %v2556_v19  ;;  %v2575_v47 = vand.u32 2147483648, %v2556_v19  ;;  %vm2569_vm6 = vweird.f32 %v2556_v19  ;;  %v2573_v18 = vand.u32 2147483647, %v2556_v19 }
 0x436   :  { %v2517_v14 = vpop.f32.mrf.mxu0  ;;  %v2576_v62 = vor.u32 1.1754944e-38, %v2575_v47  ;;  %vm2574_vm3 = vcmp.eq.f32.partialorder %v2573_v18, 8.507059e+37 }
 0x437   :  { %v5871_v37 = vadd.f32 %v5852_v38, %v2517_v14 }
 0x439   :  { %v3726_v60 = vpop.eup %3725  ;;  %v3401_v10 = vmul.f32 -1.442695, %v5871_v37 }
 0x43a   :  { %v3728_v61 = vpop.eup %3727  ;;  %v2557_v23 = vadd.f32 1.0, %v3726_v60  ;;  %v3559_v60 = vld [vmem:[%s6229_s11 + $0x40] sm:$0xff] }
 0x43b   :  { %v2565_v49 = vmul.f32 %v3728_v61, %v2556_v19  ;;  %3729 = vpow2.f32 %v3401_v10  ;;  %vm2570_vm9 = vweird.f32 %v3728_v61  ;;  %v2712_v10 = vadd.f32 %v5907_v46, %v5868_v53  ;;  %2820 = vmatpush.bf16.msra.mxu0 %v3559_v60  ;;  %3590 = vmatpush.bf16.msrb.mxu1 %v3559_v60 }
 0x43c   :  { %3731 = vrcp.f32 %v2557_v23  ;;  %vm5886_vm10 = vmor %vm2569_vm6, %vm2570_vm9  ;;  %v2588_v20 = vand.u32 2147483647, %v2557_v23  ;;  %v2590_v30 = vand.u32 2147483648, %v2557_v23  ;;  %vm2584_vm14 = vweird.f32 %v2557_v23 }
 0x43d   :  { %v2566_v31 = vsub.f32 1.0, %v2565_v49 }
 0x43e   :  { %v2519_v0 = vpop.f32.mrf.mxu0  ;;  %vm2589_vm7 = vcmp.eq.f32.partialorder %v2588_v20, 8.507059e+37  ;;  %v2591_v42 = vor.u32 1.1754944e-38, %v2590_v30 }
 0x43f   :  { %v2567_v24 = vmul.f32 %v3728_v61, %v2566_v31  ;;  %v5878_v33 = vadd.f32 %v5852_v38, %v2519_v0 }
 0x441   :  { %v3730_v9 = vpop.eup %3729  ;;  %v2568_v63 = vadd.f32 %v3728_v61, %v2567_v24  ;;  %v3402_v8 = vmul.f32 -1.442695, %v5878_v33 }
 0x442   :  { %v3732_v21 = vpop.eup %3731  ;;  %v5884_v2 = vadd.f32 1.0, %v3730_v9 }
 0x443   :  { %v2580_v28 = vmul.f32 %v3732_v21, %v2557_v23  ;;  %3733 = vpow2.f32 %v3402_v8  ;;  %v2572_v1 = vsel %vm5886_vm10, %v3728_v61, %v2568_v63  ;;  %vm2585_vm13 = vweird.f32 %v3732_v21 }
 0x444   :  { %3735 = vrcp.f32 %v5884_v2  ;;  %v2577_v45 = vsel %vm2574_vm3, %v2576_v62, %v2572_v1  ;;  %vm2586_vm12 = vmor %vm2584_vm14, %vm2585_vm13  ;;  %v2714_v61 = vadd.f32 %v5907_v46, %v2713_v39  ;;  %v2718_v39 = vpop.f32.mrf.mxu2  ;;  %vm2599_vm1 = vweird.f32 %v5884_v2 }
 0x445   :  { %v2581_v43 = vsub.f32 1.0, %v2580_v28  ;;  %v2684_v7 = vmul.f32 %v2577_v45, %v5855_v50  ;;  %v2603_v18 = vand.u32 2147483647, %v5884_v2 }
 0x446   :  { %v2522_v15 = vpop.f32.mrf.mxu0 }
 0x447   :  { %v2582_v4 = vmul.f32 %v3732_v21, %v2581_v43  ;;  %v5900_v3 = vadd.f32 %v5852_v38, %v2522_v15  ;;  %v2731_v50 = vmul.f32 %v2712_v10, %v2684_v7  ;;  %vm2604_vm0 = vcmp.eq.f32.partialorder %v2603_v18, 8.507059e+37 }
 0x449   :  { %v3734_v29 = vpop.eup %3733  ;;  %v2583_v55 = vadd.f32 %v3732_v21, %v2582_v4  ;;  %v3403_v51 = vmul.f32 -1.442695, %v5900_v3 }
 0x44a   :  { %v3736_v57 = vpop.eup %3735  ;;  %v2559_v54 = vadd.f32 1.0, %v3734_v29 }
 0x44b   :  { %v2587_v19 = vsel %vm2586_vm12, %v3732_v21, %v2583_v55  ;;  %v2595_v14 = vmul.f32 %v3736_v57, %v5884_v2  ;;  %3737 = vpow2.f32 %v3403_v51  ;;  %vm2600_vm11 = vweird.f32 %v3736_v57 }
 0x44c   :  { %v2592_v58 = vsel %vm2589_vm7, %v2591_v42, %v2587_v19  ;;  %3739 = vrcp.f32 %v2559_v54  ;;  %vm2601_vm15 = vmor %vm2599_vm1, %vm2600_vm11  ;;  %v2618_v43 = vand.u32 2147483647, %v2559_v54  ;;  %v2620_v62 = vand.u32 2147483648, %v2559_v54  ;;  %v2721_v19 = vpop.f32.mrf.mxu2 }
 0x44d   :  { %v2685_v23 = vmul.f32 %v2592_v58, %v5862_v6  ;;  %v2596_v49 = vsub.f32 1.0, %v2595_v14  ;;  %v2605_v6 = vand.u32 2147483648, %v5884_v2  ;;  %vm2614_vm5 = vweird.f32 %v2559_v54 }
 0x44e   :  { %v2524_v31 = vpop.f32.mrf.mxu0  ;;  %vm2619_vm2 = vcmp.eq.f32.partialorder %v2618_v43, 8.507059e+37  ;;  %v2621_v55 = vor.u32 1.1754944e-38, %v2620_v62  ;;  %v2717_v58 = vadd.f32 %v5907_v46, %v5902_v17 }
 0x44f   :  { %v2732_v0 = vmul.f32 %v2714_v61, %v2685_v23  ;;  %v2597_v24 = vmul.f32 %v3736_v57, %v2596_v49  ;;  %v5920_v52 = vadd.f32 %v5852_v38, %v2524_v31  ;;  %v2606_v1 = vor.u32 1.1754944e-38, %v2605_v6 }
 0x451   :  { %v3738_v9 = vpop.eup %3737  ;;  %v2739_v63 = vpack.c.bf16 %v2732_v0, %v2731_v50  ;;  %v2598_v8 = vadd.f32 %v3736_v57, %v2597_v24  ;;  %v3404_v53 = vmul.f32 -1.442695, %v5920_v52 }
 0x452   :  { %v3740_v21 = vpop.eup %3739  ;;  %v5924_v47 = vadd.f32 1.0, %v3738_v9 }
 0x453   :  { %v2610_v28 = vmul.f32 %v3740_v21, %v2559_v54  ;;  %3741 = vpow2.f32 %v3404_v53  ;;  %2821 = vmatmul.bf16.vlgmr.msra.gmra.mxu0 %v2739_v63  ;;  %v2602_v5 = vsel %vm2601_vm15, %v3736_v57, %v2598_v8  ;;  %vm2615_vm8 = vweird.f32 %v3740_v21 }
 0x454   :  { %3743 = vrcp.f32 %v5924_v47  ;;  %v2607_v40 = vsel %vm2604_vm0, %v2606_v1, %v2602_v5  ;;  %vm2616_vm4 = vmor %vm2614_vm5, %vm2615_vm8  ;;  %v2719_v54 = vadd.f32 %v5907_v46, %v2718_v39  ;;  %v2635_v17 = vand.u32 2147483648, %v5924_v47  ;;  %v2723_v39 = vpop.f32.mrf.mxu2 }
 0x455   :  { %v2611_v32 = vsub.f32 1.0, %v2610_v28  ;;  %v2686_v57 = vmul.f32 %v2607_v40, %v5871_v37  ;;  %vm2629_vm6 = vweird.f32 %v5924_v47 }
 0x456   :  { %v2527_v20 = vpop.f32.mrf.mxu0  ;;  %v2636_v6 = vor.u32 1.1754944e-38, %v2635_v17 }
 0x457   :  { %v2612_v30 = vmul.f32 %v3740_v21, %v2611_v32  ;;  %v5930_v15 = vadd.f32 %v5852_v38, %v2527_v20  ;;  %v2733_v23 = vmul.f32 %v2717_v58, %v2686_v57 }
 0x459   :  { %v3742_v2 = vpop.eup %3741  ;;  %v2613_v4 = vadd.f32 %v3740_v21, %v2612_v30  ;;  %v3405_v45 = vmul.f32 -1.442695, %v5930_v15 }
 0x45a   :  { %v3744_v29 = vpop.eup %3743  ;;  %v2561_v51 = vadd.f32 1.0, %v3742_v2 }
 0x45b   :  { %v2617_v42 = vsel %vm2616_vm4, %v3740_v21, %v2613_v4  ;;  %v2625_v7 = vmul.f32 %v3744_v29, %v5924_v47  ;;  %3745 = vpow2.f32 %v3405_v45  ;;  %vm2630_vm9 = vweird.f32 %v3744_v29 }
 0x45c   :  { %v2622_v14 = vsel %vm2619_vm2, %v2621_v55, %v2617_v42  ;;  %3747 = vrcp.f32 %v2561_v51  ;;  %vm2631_vm10 = vmor %vm2629_vm6, %vm2630_vm9  ;;  %v2650_v18 = vand.u32 2147483648, %v2561_v51  ;;  %v2648_v5 = vand.u32 2147483647, %v2561_v51 }
 0x45d   :  { %v2687_v60 = vmul.f32 %v2622_v14, %v5878_v33  ;;  %v2626_v10 = vsub.f32 1.0, %v2625_v7  ;;  %v2633_v33 = vand.u32 2147483647, %v5924_v47  ;;  %vm2644_vm14 = vweird.f32 %v2561_v51  ;;  %v2726_v14 = vpop.f32.mrf.mxu2 }
 0x45e   :  { %v2529_v61 = vpop.f32.mrf.mxu0  ;;  %v2651_v47 = vor.u32 1.1754944e-38, %v2650_v18  ;;  %vm2649_vm7 = vcmp.eq.f32.partialorder %v2648_v5, 8.507059e+37  ;;  %v2722_v45 = vadd.f32 %v5907_v46, %v2721_v19  ;;  %v5957_v5 = vld [vmem:[%s6228_s12 + $0x1] ss:$0 sm:$0xff] }
 0x45f   :  { %v2734_v49 = vmul.f32 %v2719_v54, %v2687_v60  ;;  %v2627_v31 = vmul.f32 %v3744_v29, %v2626_v10  ;;  %v5940_v37 = vadd.f32 %v5852_v38, %v2529_v61  ;;  %vm2634_vm3 = vcmp.eq.f32.partialorder %v2633_v33, 8.507059e+37 }
 0x461   :  { %v3746_v50 = vpop.eup %3745  ;;  %v2628_v0 = vadd.f32 %v3744_v29, %v2627_v31  ;;  %v3406_v24 = vmul.f32 -1.442695, %v5940_v37  ;;  %v2740_v9 = vpack.c.bf16 %v2734_v49, %v2733_v23 }
 0x462   :  { %v3748_v63 = vpop.eup %3747  ;;  %v2562_v8 = vadd.f32 1.0, %v3746_v50 }
 0x463   :  { %v2640_v53 = vmul.f32 %v3748_v63, %v2561_v51  ;;  %3749 = vpow2.f32 %v3406_v24  ;;  %2826 = vmatmul.bf16.vlgmr.msrb.gmra.mxu1 %v2740_v9  ;;  %v2632_v38 = vsel %vm2631_vm10, %v3744_v29, %v2628_v0  ;;  %vm2645_vm13 = vweird.f32 %v3748_v63 }
 0x464   :  { %3751 = vrcp.f32 %v2562_v8  ;;  %v2637_v32 = vsel %vm2634_vm3, %v2636_v6, %v2632_v38  ;;  %vm2646_vm12 = vmor %vm2644_vm14, %vm2645_vm13  ;;  %v2724_v29 = vadd.f32 %v5907_v46, %v2723_v39  ;;  %v2665_v60 = vand.u32 2147483648, %v2562_v8 }
 0x465   :  { %v2641_v21 = vsub.f32 1.0, %v2640_v53  ;;  %v2688_v30 = vmul.f32 %v2637_v32, %v5900_v3  ;;  %vm2659_vm1 = vweird.f32 %v2562_v8  ;;  %v2663_v10 = vand.u32 2147483647, %v2562_v8  ;;  %v2728_v9 = vpop.f32.mrf.mxu2 }
 0x466   :  { %v2666_v49 = vor.u32 1.1754944e-38, %v2665_v60  ;;  %v2727_v53 = vadd.f32 %v5907_v46, %v2726_v14  ;;  %v2729_v38 = vadd.f32 %v5907_v46, %v2728_v9  ;;  %v3573_v9 = vld [vmem:[%s6231_s13 + $0x30] sm:$0xff] }
 0x467   :  { %v2642_v28 = vmul.f32 %v3748_v63, %v2641_v21  ;;  %v2735_v51 = vmul.f32 %v2722_v45, %v2688_v30  ;;  %vm2664_vm0 = vcmp.eq.f32.partialorder %v2663_v10, 8.507059e+37 }
 0x469   :  { %v3750_v1 = vpop.eup %3749  ;;  %v2643_v43 = vadd.f32 %v3748_v63, %v2642_v28 }
 0x46a   :  { %v3752_v62 = vpop.eup %3751  ;;  %v2563_v20 = vadd.f32 1.0, %v3750_v1 }
 0x46b   :  { %v2647_v40 = vsel %vm2646_vm12, %v3748_v63, %v2643_v43  ;;  %v2655_v2 = vmul.f32 %v3752_v62, %v2562_v8  ;;  %vm2660_vm11 = vweird.f32 %v3752_v62 }
 0x46c   :  { %v2652_v4 = vsel %vm2649_vm7, %v2651_v47, %v2647_v40  ;;  %3753 = vrcp.f32 %v2563_v20  ;;  %vm2661_vm15 = vmor %vm2659_vm1, %vm2660_vm11  ;;  %v2680_v31 = vand.u32 2147483648, %v2563_v20  ;;  %v2678_v50 = vand.u32 2147483647, %v2563_v20 }
 0x46d   :  { %v2689_v55 = vmul.f32 %v2652_v4, %v5920_v52  ;;  %v2656_v57 = vsub.f32 1.0, %v2655_v2  ;;  %vm2674_vm5 = vweird.f32 %v2563_v20 }
 0x46e   :  { %v2681_v63 = vor.u32 1.1754944e-38, %v2680_v31  ;;  %vm2679_vm2 = vcmp.eq.f32.partialorder %v2678_v50, 8.507059e+37 }
 0x46f   :  { %v2657_v42 = vmul.f32 %v3752_v62, %v2656_v57  ;;  %v2736_v7 = vmul.f32 %v2724_v29, %v2689_v55 }
 0x471   :  { %v2658_v58 = vadd.f32 %v3752_v62, %v2657_v42  ;;  %v2741_v54 = vpack.c.bf16 %v2736_v7, %v2735_v51 }
 0x472   :  { %v3754_v3 = vpop.eup %3753 }
 0x473   :  { %v2670_v61 = vmul.f32 %v3754_v3, %v2563_v20  ;;  %2831 = vmatmul.bf16.gmra.mxu1 %v2741_v54  ;;  %v2662_v19 = vsel %vm2661_vm15, %v3752_v62, %v2658_v58  ;;  %vm2675_vm8 = vweird.f32 %v3754_v3  ;;  %v3574_v54 = vld [vmem:[%s6231_s13 + $0x38] sm:$0xff] }
 0x474   :  { %v2667_v0 = vsel %vm2664_vm0, %v2666_v49, %v2662_v19  ;;  %vm2676_vm4 = vmor %vm2674_vm5, %vm2675_vm8  ;;  %3110 = vmatpush.bf16.msrb.mxu3 %v3574_v54 }
 0x475   :  { %v2671_v23 = vsub.f32 1.0, %v2670_v61  ;;  %v2690_v17 = vmul.f32 %v2667_v0, %v5930_v15 }
 0x477   :  { %v2672_v52 = vmul.f32 %v3754_v3, %v2671_v23  ;;  %v2737_v39 = vmul.f32 %v2727_v53, %v2690_v17 }
 0x478   :  { %3111 = vmatpush.bf16.msrb.mxu3 %v3573_v9 }
 0x479   :  { %v2673_v24 = vadd.f32 %v3754_v3, %v2672_v52 }
 0x47b   :  { %v2677_v8 = vsel %vm2676_vm4, %v3754_v3, %v2673_v24 }
 0x47c   :  { %v2682_v33 = vsel %vm2679_vm2, %v2681_v63, %v2677_v8 }
 0x47d   :  { %v2691_v21 = vmul.f32 %v2682_v33, %v5940_v37 }
 0x47f   :  { %v2738_v6 = vmul.f32 %v2729_v38, %v2691_v21 }
 0x481   :  { %v2742_v18 = vpack.c.bf16 %v2738_v6, %v2737_v39 }
 0x483   :  { %2836 = vmatmul.bf16.gmra.mxu1 %v2742_v18 }
 0x4d0   :  { %v2822_v28 = vpop.f32.mrf.mxu0 }
 0x4d1   :  { %v5960_v32 = vadd.f32 %v5957_v5, %v2822_v28 }
 0x4d3   :  { %v3462_v46 = vmul.f32 -1.442695, %v5960_v32 }
 0x4d5   :  { %3755 = vpow2.f32 %v3462_v46 }
 0x4d8   :  { %v2824_v15 = vpop.f32.mrf.mxu0 }
 0x4d9   :  { %v5963_v1 = vadd.f32 %v5957_v5, %v2824_v15  ;;  %v3572_v15 = vld [vmem:[%s6231_s13 + $0x28] sm:$0xff] }
 0x4da   :  { %3112 = vmatpush.bf16.msrb.mxu3 %v3572_v15 }
 0x4db   :  { %v3463_v43 = vmul.f32 -1.442695, %v5963_v1  ;;  %v3756_v30 = vpop.eup %3755 }
 0x4dc   :  { %v5975_v29 = vadd.f32 1.0, %v3756_v30 }
 0x4dd   :  { %3757 = vpow2.f32 %v3463_v43 }
 0x4de   :  { %vm2879_vm9 = vweird.f32 %v5975_v29  ;;  %v2885_v30 = vand.u32 2147483648, %v5975_v29 }
 0x4e0   :  { %v2827_v37 = vpop.f32.mrf.mxu1 }
 0x4e1   :  { %v5968_v62 = vadd.f32 %v5957_v5, %v2827_v37 }
 0x4e3   :  { %v3464_v47 = vmul.f32 -1.442695, %v5968_v62  ;;  %v3758_v2 = vpop.eup %3757 }
 0x4e4   :  { %v5977_v55 = vadd.f32 1.0, %v3758_v2 }
 0x4e5   :  { %3759 = vpow2.f32 %v3464_v47 }
 0x4e6   :  { %vm2894_vm10 = vweird.f32 %v5977_v55 }
 0x4e8   :  { %v2829_v20 = vpop.f32.mrf.mxu1 }
 0x4e9   :  { %v5972_v40 = vadd.f32 %v5957_v5, %v2829_v20  ;;  %v2883_v20 = vand.u32 2147483647, %v5975_v29 }
 0x4eb   :  { %v3465_v4 = vmul.f32 -1.442695, %v5972_v40  ;;  %v3760_v45 = vpop.eup %3759  ;;  %vm2884_vm11 = vcmp.eq.f32.partialorder %v2883_v20, 8.507059e+37 }
 0x4ec   :  { %v5979_v57 = vadd.f32 1.0, %v3760_v45  ;;  %v2900_v45 = vand.u32 2147483648, %v5977_v55 }
 0x4ed   :  { %3761 = vpow2.f32 %v3465_v4  ;;  %v2898_v4 = vand.u32 2147483647, %v5977_v55 }
 0x4ee   :  { %3763 = vrcp.f32 %v5975_v29  ;;  %vm2909_vm7 = vweird.f32 %v5979_v57  ;;  %v2901_v9 = vor.u32 1.1754944e-38, %v2900_v45 }
 0x4ef   :  { %3765 = vrcp.f32 %v5977_v55  ;;  %vm6076_vm1 = vcmp.eq.f32.partialorder %v2898_v4, 8.507059e+37 }
 0x4f0   :  { %v2832_v42 = vpop.f32.mrf.mxu1  ;;  %3767 = vrcp.f32 %v5979_v57 }
 0x4f1   :  { %v5983_v51 = vadd.f32 %v5957_v5, %v2832_v42 }
 0x4f3   :  { %v3762_v7 = vpop.eup %3761  ;;  %v3466_v14 = vmul.f32 -1.442695, %v5983_v51 }
 0x4f4   :  { %v5988_v58 = vadd.f32 1.0, %v3762_v7  ;;  %v5993_v3 = vpop.eup %3763 }
 0x4f5   :  { %3769 = vpow2.f32 %v3466_v14  ;;  %v5995_v60 = vpop.eup %3765  ;;  %v2875_v19 = vmul.f32 %v5993_v3, %v5975_v29  ;;  %vm2880_vm6 = vweird.f32 %v5993_v3 }
 0x4f6   :  { %3771 = vrcp.f32 %v5988_v58  ;;  %v5998_v61 = vpop.eup %3767  ;;  %v2890_v52 = vmul.f32 %v5995_v60, %v5977_v55  ;;  %vm2895_vm3 = vweird.f32 %v5995_v60  ;;  %vm6047_vm13 = vmor %vm2879_vm9, %vm2880_vm6  ;;  %vm2924_vm5 = vweird.f32 %v5988_v58 }
 0x4f7   :  { %v2905_v50 = vmul.f32 %v5998_v61, %v5979_v57  ;;  %v2876_v24 = vsub.f32 1.0, %v2875_v19  ;;  %vm2910_vm14 = vweird.f32 %v5998_v61  ;;  %vm6069_vm12 = vmor %vm2894_vm10, %vm2895_vm3 }
 0x4f8   :  { %v2834_v10 = vpop.f32.mrf.mxu1  ;;  %v2891_v17 = vsub.f32 1.0, %v2890_v52  ;;  %v2886_v52 = vor.u32 1.1754944e-38, %v2885_v30  ;;  %vm6082_vm15 = vmor %vm2909_vm7, %vm2910_vm14 }
 0x4f9   :  { %v6003_v23 = vadd.f32 %v5957_v5, %v2834_v10  ;;  %v2906_v8 = vsub.f32 1.0, %v2905_v50  ;;  %v2877_v53 = vmul.f32 %v5993_v3, %v2876_v24 }
 0x4fa   :  { %v2892_v18 = vmul.f32 %v5995_v60, %v2891_v17 }
 0x4fb   :  { %v3770_v49 = vpop.eup %3769  ;;  %v3467_v31 = vmul.f32 -1.442695, %v6003_v23  ;;  %v2907_v28 = vmul.f32 %v5998_v61, %v2906_v8  ;;  %v2878_v37 = vadd.f32 %v5993_v3, %v2877_v53  ;;  %v3570_v8 = vld [vmem:[%s6231_s13 + $0x18] sm:$0xff] }
 0x4fc   :  { %v6010_v0 = vadd.f32 1.0, %v3770_v49  ;;  %v6015_v63 = vpop.eup %3771  ;;  %v2893_v7 = vadd.f32 %v5995_v60, %v2892_v18 }
 0x4fd   :  { %v2920_v38 = vmul.f32 %v6015_v63, %v5988_v58  ;;  %v2908_v14 = vadd.f32 %v5998_v61, %v2907_v28  ;;  %v2882_v10 = vsel %vm6047_vm13, %v5993_v3, %v2878_v37  ;;  %v2913_v3 = vand.u32 2147483647, %v5979_v57 }
 0x4fe   :  { %3773 = vrcp.f32 %v6010_v0  ;;  %v2897_v53 = vsel %vm6069_vm12, %v5995_v60, %v2893_v7  ;;  %vm2925_vm0 = vweird.f32 %v6015_v63  ;;  %v2928_v37 = vand.u32 2147483647, %v5988_v58 }
 0x4ff   :  { %3775 = vpow2.f32 %v3467_v31  ;;  %v2921_v43 = vsub.f32 1.0, %v2920_v38  ;;  %v3571_v31 = vld [vmem:[%s6231_s13 + $0x20] sm:$0xff]  ;;  %v2912_v38 = vsel %vm6082_vm15, %v5998_v61, %v2908_v14  ;;  %vm2914_vm8 = vcmp.eq.f32.partialorder %v2913_v3, 8.507059e+37  ;;  %vm6114_vm4 = vmor %vm2924_vm5, %vm2925_vm0 }
 0x500   :  { %v2837_v33 = vpop.f32.mrf.mxu1  ;;  %3113 = vmatpush.bf16.msrb.mxu3 %v3571_v31  ;;  %v2930_v60 = vand.u32 2147483648, %v5988_v58  ;;  %vm2929_vm9 = vcmp.eq.f32.partialorder %v2928_v37, 8.507059e+37  ;;  %v2945_v14 = vand.u32 2147483648, %v6010_v0  ;;  %vm2939_vm6 = vweird.f32 %v6010_v0 }
 0x501   :  { %v6022_v21 = vadd.f32 %v5957_v5, %v2837_v33  ;;  %v2922_v19 = vmul.f32 %v6015_v63, %v2921_v43  ;;  %v2887_v33 = vsel %vm2884_vm11, %v2886_v52, %v2882_v10  ;;  %v2902_v43 = vsel %vm6076_vm1, %v2901_v9, %v2897_v53 }
 0x502   :  { %v2994_v20 = vmul.f32 %v2887_v33, %v5960_v32  ;;  %v2995_v7 = vmul.f32 %v2902_v43, %v5963_v1  ;;  %v2931_v32 = vor.u32 1.1754944e-38, %v2930_v60  ;;  %v2943_v10 = vand.u32 2147483647, %v6010_v0 }
 0x503   :  { %v3468_v39 = vmul.f32 -1.442695, %v6022_v21  ;;  %v2946_v24 = vor.u32 1.1754944e-38, %v2945_v14 }
 0x504   :  { %v6025_v6 = vpop.eup %3773  ;;  %3114 = vmatpush.bf16.msrb.mxu3 %v3570_v8  ;;  %vm2944_vm12 = vcmp.eq.f32.partialorder %v2943_v10, 8.507059e+37 }
 0x505   :  { %v3776_v46 = vpop.eup %3775  ;;  %v2935_v47 = vmul.f32 %v6025_v6, %v6010_v0  ;;  %3777 = vpow2.f32 %v3468_v39  ;;  %v2923_v39 = vadd.f32 %v6015_v63, %v2922_v19  ;;  %vm2940_vm2 = vweird.f32 %v6025_v6 }
 0x506   :  { %v6039_v2 = vadd.f32 1.0, %v3776_v46  ;;  %vm6133_vm3 = vmor %vm2939_vm6, %vm2940_vm2 }
 0x507   :  { %v2936_v29 = vsub.f32 1.0, %v2935_v47  ;;  %v3569_v47 = vld [vmem:[%s6231_s13 + $0x10] sm:$0xff]  ;;  %v2927_v58 = vsel %vm6114_vm4, %v6015_v63, %v2923_v39  ;;  %v3568_v63 = vld [vmem:[%s6231_s13 + $0x8] sm:$0xff] }
 0x508   :  { %3779 = vrcp.f32 %v6039_v2  ;;  %v2839_v54 = vpop.f32.mrf.mxu1  ;;  %3115 = vmatpush.bf16.msrb.mxu3 %v3569_v47  ;;  %v2932_v31 = vsel %vm2929_vm9, %v2931_v32, %v2927_v58  ;;  %v2960_v52 = vand.u32 2147483648, %v6039_v2  ;;  %vm2954_vm13 = vweird.f32 %v6039_v2 }
 0x509   :  { %v6060_v49 = vadd.f32 %v5957_v5, %v2839_v54  ;;  %v2915_v5 = vand.u32 2147483648, %v5979_v57  ;;  %v2937_v18 = vmul.f32 %v6025_v6, %v2936_v29  ;;  %v2997_v8 = vmul.f32 %v2932_v31, %v5972_v40 }
 0x50a   :  { %v2961_v33 = vor.u32 1.1754944e-38, %v2960_v52 }
 0x50b   :  { %v3469_v17 = vmul.f32 -1.442695, %v6060_v49  ;;  %v3778_v57 = vpop.eup %3777  ;;  %v2916_v46 = vor.u32 1.1754944e-38, %v2915_v5  ;;  %v2938_v45 = vadd.f32 %v6025_v6, %v2937_v18  ;;  %v3005_v43 = vadd.f32 %v2997_v8, %v5815_v11  ;;  %v3576_v8 = vld [vmem:[%s6233_s15 + $0x8] sm:$0xff] }
 0x50c   :  { %v6099_v28 = vadd.f32 1.0, %v3778_v57  ;;  %3116 = vmatpush.bf16.msrb.mxu3 %v3568_v63 }
 0x50d   :  { %3781 = vpow2.f32 %v3469_v17  ;;  %v2917_v30 = vsel %vm2914_vm8, %v2916_v46, %v2912_v38  ;;  %v2942_v3 = vsel %vm6133_vm3, %v6025_v6, %v2938_v45  ;;  %v3003_v17 = vadd.f32 %v2995_v7, %v5795_v36 }
 0x50e   :  { %v3780_v15 = vpop.eup %3779  ;;  %3783 = vrcp.f32 %v6099_v28  ;;  %v2996_v29 = vmul.f32 %v2917_v30, %v5968_v62  ;;  %v2958_v62 = vand.u32 2147483647, %v6039_v2  ;;  %v2947_v57 = vsel %vm2944_vm12, %v2946_v24, %v2942_v3 }
 0x50f   :  { %v2950_v61 = vmul.f32 %v3780_v15, %v6039_v2  ;;  %vm2955_vm10 = vweird.f32 %v3780_v15  ;;  %v3567_v2 = vld [vmem:[%s6231_s13] sm:$0xff]  ;;  %v3002_v38 = vadd.f32 %v2994_v20, %v5798_v22  ;;  %v2975_v36 = vand.u32 2147483648, %v6099_v28 }
 0x510   :  { %vm6145_vm14 = vmor %vm2954_vm13, %vm2955_vm10  ;;  %v3004_v39 = vadd.f32 %v2996_v29, %v5818_v16  ;;  %vm2959_vm7 = vcmp.eq.f32.partialorder %v2958_v62, 8.507059e+37  ;;  %v2998_v37 = vmul.f32 %v2947_v57, %v5983_v51  ;;  %3117 = vmatpush.bf16.msrb.mxu3 %v3567_v2  ;;  %v3011_v40 = vmul.f32 %v3003_v17, %v5348_v25  ;;  %v3579_v62 = vld [vmem:[%s6233_s15 + $0x20] sm:$0xff]  ;;  %v3577_v17 = vld [vmem:[%s6233_s15 + $0x10] sm:$0xff] }
 0x511   :  { %v2951_v42 = vsub.f32 1.0, %v2950_v61  ;;  %vm2969_vm1 = vweird.f32 %v6099_v28  ;;  %v2976_v16 = vor.u32 1.1754944e-38, %v2975_v36  ;;  %v3010_v20 = vmul.f32 %v3002_v38, %v5366_v26 }
 0x512   :  { %v3012_v30 = vmul.f32 %v3004_v39, %v5424_v48  ;;  %v3006_v4 = vadd.f32 %v2998_v37, %v5830_v44  ;;  %v3013_v45 = vmul.f32 %v3005_v43, %v5420_v56  ;;  %v3575_v39 = vld [vmem:[%s6233_s15] sm:$0xff] }
 0x513   :  { %v3782_v54 = vpop.eup %3781  ;;  %v2952_v19 = vmul.f32 %v3780_v15, %v2951_v42  ;;  %v3018_v11 = vadd.f32 %v3011_v40, %v3010_v20  ;;  %v3610_v40 = vld [vmem:[%s6232_s16] ss:$0 sm:$0xff] }
 0x514   :  { %v6138_v50 = vadd.f32 1.0, %v3782_v54  ;;  %v3784_v0 = vpop.eup %3783  ;;  %v3014_v32 = vmul.f32 %v3006_v4, %v5461_v34 }
 0x515   :  { %v2953_v5 = vadd.f32 %v3780_v15, %v2952_v19  ;;  %v2965_v55 = vmul.f32 %v3784_v0, %v6099_v28  ;;  %vm2970_vm11 = vweird.f32 %v3784_v0  ;;  %v3019_v48 = vadd.f32 %v3018_v11, %v3012_v30 }
 0x516   :  { %3785 = vrcp.f32 %v6138_v50  ;;  %vm2971_vm15 = vmor %vm2969_vm1, %vm2970_vm11  ;;  %v2988_v26 = vand.u32 2147483647, %v6138_v50  ;;  %vm2984_vm5 = vweird.f32 %v6138_v50 }
 0x517   :  { %v2957_v6 = vsel %vm6145_vm14, %v3780_v15, %v2953_v5  ;;  %v2966_v53 = vsub.f32 1.0, %v2965_v55  ;;  %v2973_v15 = vand.u32 2147483647, %v6099_v28  ;;  %v3020_v54 = vadd.f32 %v3019_v48, %v3013_v45  ;;  %v3578_v55 = vld [vmem:[%s6233_s15 + $0x18] sm:$0xff] }
 0x518   :  { %v2962_v18 = vsel %vm2959_vm7, %v2961_v33, %v2957_v6  ;;  %vm2989_vm2 = vcmp.eq.f32.partialorder %v2988_v26, 8.507059e+37 }
 0x519   :  { %v2967_v46 = vmul.f32 %v3784_v0, %v2966_v53  ;;  %v2999_v22 = vmul.f32 %v2962_v18, %v6003_v23  ;;  %vm2974_vm0 = vcmp.eq.f32.partialorder %v2973_v15, 8.507059e+37  ;;  %v2990_v23 = vand.u32 2147483648, %v6138_v50 }
 0x51a   :  { %v3021_v19 = vadd.f32 %v3020_v54, %v3014_v32 }
 0x51b   :  { %v2968_v61 = vadd.f32 %v3784_v0, %v2967_v46  ;;  %v3007_v42 = vadd.f32 %v2999_v22, %v5833_v59  ;;  %v2991_v56 = vor.u32 1.1754944e-38, %v2990_v23 }
 0x51c   :  { %v3786_v60 = vpop.eup %3785 }
 0x51d   :  { %v2980_v47 = vmul.f32 %v3786_v60, %v6138_v50  ;;  %v2972_v51 = vsel %vm2971_vm15, %v3784_v0, %v2968_v61  ;;  %vm2985_vm8 = vweird.f32 %v3786_v60 }
 0x51e   :  { %v2977_v25 = vsel %vm2974_vm0, %v2976_v16, %v2972_v51  ;;  %vm2986_vm4 = vmor %vm2984_vm5, %vm2985_vm8 }
 0x51f   :  { %v2981_v58 = vsub.f32 1.0, %v2980_v47  ;;  %v3000_v28 = vmul.f32 %v2977_v25, %v6022_v21  ;;  %v3015_v21 = vmul.f32 %v3007_v42, %v5458_v12  ;;  %v3609_v12 = vld [vmem:[%s6230_s14] ss:$0 sm:$0xff] }
 0x521   :  { %v2982_v7 = vmul.f32 %v3786_v60, %v2981_v58  ;;  %v3008_v44 = vadd.f32 %v3000_v28, %v5842_v41  ;;  %v3022_v31 = vadd.f32 %v3021_v19, %v3015_v21 }
 0x523   :  { %v2983_v14 = vadd.f32 %v3786_v60, %v2982_v7  ;;  %v3016_v63 = vmul.f32 %v3008_v44, %v5470_v13  ;;  %v3582_v13 = vld [vmem:[%s6233_s15 + $0x38] sm:$0xff] }
 0x524   :  { %3212 = vmatpush.bf16.msra.mxu3 %v3582_v13 }
 0x525   :  { %v2987_v10 = vsel %vm2986_vm4, %v3786_v60, %v2983_v14  ;;  %v3023_v1 = vadd.f32 %v3022_v31, %v3016_v63 }
 0x526   :  { %v2992_v59 = vsel %vm2989_vm2, %v2991_v56, %v2987_v10 }
 0x527   :  { %v3001_v29 = vmul.f32 %v2992_v59, %v6060_v49  ;;  %v3580_v49 = vld [vmem:[%s6233_s15 + $0x28] sm:$0xff] }
 0x529   :  { %v3009_v34 = vadd.f32 %v3001_v29, %v5845_v27  ;;  %v3581_v27 = vld [vmem:[%s6233_s15 + $0x30] sm:$0xff] }
 0x52a   :  { %3213 = vmatpush.bf16.msra.mxu3 %v3581_v27 }
 0x52b   :  { %v3017_v41 = vmul.f32 %v3009_v34, %v5468_v35 }
 0x52d   :  { %v3024_v52 = vadd.f32 %v3023_v1, %v3017_v41 }
 0x52e   :  { %3214 = vmatpush.bf16.msra.mxu3 %v3580_v49 }
 0x52f   :  { %v3041_v50 = vpack.c.bf16 %v3024_v52, %v3024_v52 }
 0x531   :  { %3118 = vmatmul.bf16.vlgmr.msrb.gmra.mxu3 %v3041_v50 }
 0x532   :  { %3215 = vmatpush.bf16.msra.mxu3 %v3579_v62 }
 0x536   :  { %3216 = vmatpush.bf16.msra.mxu3 %v3578_v55 }
 0x53a   :  { %3217 = vmatpush.bf16.msra.mxu3 %v3577_v17 }
 0x53e   :  { %3218 = vmatpush.bf16.msra.mxu3 %v3576_v8 }
 0x542   :  { %3219 = vmatpush.bf16.msra.mxu3 %v3575_v39 }
 0x5b4   :  { %v3119_v0 = vpop.f32.mrf.mxu3 }
 0x5b5   :  { %v3120_v3 = vadd.f32 %v3609_v12, %v3119_v0 }
 0x5b7   :  { %v3502_v35 = vmul.f32 -1.442695, %v3120_v3 }
 0x5b9   :  { %3787 = vpow2.f32 %v3502_v35 }
 0x5bc   :  { %v3121_v5 = vpop.f32.mrf.mxu3 }
 0x5bf   :  { %v3788_v24 = vpop.eup %3787 }
 0x5c0   :  { %v3126_v9 = vadd.f32 1.0, %v3788_v24 }
 0x5c2   :  { %3789 = vrcp.f32 %v3126_v9  ;;  %v3138_v33 = vand.u32 2147483648, %v3126_v9  ;;  %v3136_v38 = vand.u32 2147483647, %v3126_v9  ;;  %vm3132_vm6 = vweird.f32 %v3126_v9 }
 0x5c4   :  { %v3139_v18 = vor.u32 1.1754944e-38, %v3138_v33  ;;  %vm3137_vm3 = vcmp.eq.f32.partialorder %v3136_v38, 8.507059e+37 }
 0x5c8   :  { %v3790_v6 = vpop.eup %3789 }
 0x5c9   :  { %v3128_v2 = vmul.f32 %v3790_v6, %v3126_v9  ;;  %vm3133_vm9 = vweird.f32 %v3790_v6 }
 0x5ca   :  { %vm3134_vm10 = vmor %vm3132_vm6, %vm3133_vm9 }
 0x5cb   :  { %v3129_v57 = vsub.f32 1.0, %v3128_v2 }
 0x5cd   :  { %v3130_v53 = vmul.f32 %v3790_v6, %v3129_v57 }
 0x5cf   :  { %v3131_v36 = vadd.f32 %v3790_v6, %v3130_v53 }
 0x5d1   :  { %v3135_v46 = vsel %vm3134_vm10, %v3790_v6, %v3131_v36 }
 0x5d2   :  { %v3140_v15 = vsel %vm3137_vm3, %v3139_v18, %v3135_v46 }
 0x5d3   :  { %v3142_v37 = vmul.f32 %v3140_v15, %v3120_v3 }
 0x5d5   :  { %v3143_v60 = vpack.c.bf16 %v3142_v37, %v3142_v37 }
 0x5d7   :  { %3220 = vmatmul.bf16.vlgmr.msra.gmra.mxu3 %v3143_v60 }
 0x65a   :  { %v3221_v43 = vpop.f32.mrf.mxu3 }
 0x65b   :  { %v3222_v61 = vadd.f32 %v3610_v40, %v3221_v43 }
 0x65d   :  { %3225 = vst [vmem:[%s6234_s17] sm:$0xff] %v3222_v61 }
 0x662   :  { %v3223_v22 = vpop.f32.mrf.mxu3 }

</bundles_post_ra>
